<compile_context>
chip_gen: v6e
topology: v6e:2x2x1
jax: 0.10.0
libtpu: 0.0.40
codegen_flags: <defaults>
</compile_context>

<pallas_src>
import jax
import jax.numpy as jnp
import numpy as np
from jax.experimental import pallas as pl
from jax.experimental.pallas import tpu as pltpu

NUM_CLASSES = 9
FEAT_C = 2048          # resnet101 layer4 channels
OMG_D = 45
EEG_D = 45
EPS = 1e-12            # torch.nn.functional.normalize default eps

# Resident (double-buffered) tile budget.  Chosen to fit the *default* scoped VMEM
# limit on every generation (v5e: 16 MiB, v6e/v7x: 32 MiB) with headroom, while
# keeping per-step feat DMAs large enough that the kernel is bandwidth- rather than
# step-overhead-bound.
_TILE_BUDGET_BYTES = 12 << 20


def _largest_tile(total, cap, step=128):
    """Largest multiple of `step` that divides `total` and is <= cap."""
    cap = max(step, min(cap, total))
    t = max(step, (cap // step) * step)
    while total % t:
        t -= step
    return t


def _choose_tiles(B, CK, itemsize):
    """Pick (tb, tk) for the streamed [B, CK] @ [CK, 9] matmul.

    tb: multiple-of-8 divisor of B (BlockSpec (8,128) rule) when possible, preferring
        >=2 steps on the parallel batch axis (v7x has 2 TensorCores); else whole B.
    tk: multiple of 128 dividing CK, sized so the double-buffered feat tile plus the
        lane-padded [tk, 9] weight tile stay inside the budget:
            2 * tk * (tb + 128) * itemsize <= _TILE_BUDGET_BYTES
    """
    if B % 8 == 0 and B > 8:
        tb = 8
        for cand in (64, 32, 16, 8):
            if B % cand == 0 and B // cand >= 2:
                tb = cand
                break
    else:
        tb = B      # small or non-multiple-of-8 batch: one batch tile
    tk_cap = _TILE_BUDGET_BYTES // (2 * itemsize * (tb + 128))
    tk = _largest_tile(CK, tk_cap)
    return tb, tk


def _recog_kernel(feat_ref, wf_ref, side_ref, out_ref, acc_ref):
    """One (batch-tile, contraction-tile) step of out = feat_flat @ wf_exp + side."""
    k = pl.program_id(1)

    @pl.when(k == 0)
    def _init():
        acc_ref[...] = jnp.zeros_like(acc_ref)

    # MXU accumulate; bf16 tiles are consumed natively, accumulation stays f32.
    acc_ref[...] += jnp.dot(feat_ref[...], wf_ref[...],
                            preferred_element_type=jnp.float32)

    @pl.when(k == pl.num_programs(1) - 1)
    def _finalize():
        out_ref[...] = (acc_ref[...] + side_ref[...]).astype(out_ref.dtype)


def recog_model_forward(feat_nchw, omg, eeg, weight, bias):
    """RecogModel.forward, post-backbone.

    feat_nchw: [B, 2048, H, W]  ResNet101 layer4 output (f32 or bf16)
    omg, eeg:  [B, 45]
    weight:    [2138, 9]        fc_extend weight (transposed vs torch Linear)
    bias:      [9]
    returns:   [B, 9] float32 logits
    """
    # TODO(synk): the pretrained torchvision resnet101 conv backbone is not
    # re-implemented; feat_nchw is its layer4 output and only the pool + fc run here.
    B, C, H, W = feat_nchw.shape
    assert C == FEAT_C, f"expected {FEAT_C} channels, got {C}"
    HW = H * W
    CK = C * HW

    # Lane-dense flatten (free for contiguous NCHW): feat[b, c*HW + s] = feat[b,c,h,w].
    feat = feat_nchw.reshape(B, CK)

    # Fold the global average pool into the fc weight: every channel row of wf is
    # repeated HW times and pre-scaled by 1/HW, so
    #   mean_s(feat[b, c, s]) @ wf  ==  feat_flat[b, :] @ wf_exp .
    wf = weight[:FEAT_C, :].astype(jnp.float32) * (1.0 / HW)
    wf_exp = jnp.repeat(wf, HW, axis=0).astype(feat.dtype)             # [CK, 9]

    # omg/eeg/bias side term (O(B*90) work): plain XLA in the wrapper, added once in
    # the kernel epilogue.  Matches torch F.normalize: x / max(||x||_2, eps).
    wo = weight[FEAT_C:FEAT_C + OMG_D, :].astype(jnp.float32)
    we = weight[FEAT_C + OMG_D:, :].astype(jnp.float32)
    omg32 = omg.astype(jnp.float32)
    eeg32 = eeg.astype(jnp.float32)
    omg_n = omg32 / jnp.maximum(
        jnp.sqrt(jnp.sum(omg32 * omg32, axis=1, keepdims=True)), EPS)
    eeg_n = eeg32 / jnp.maximum(
        jnp.sqrt(jnp.sum(eeg32 * eeg32, axis=1, keepdims=True)), EPS)
    side = (omg_n @ wo + eeg_n @ we
            + bias.astype(jnp.float32).reshape(1, NUM_CLASSES))         # [B, 9]

    tb, tk = _choose_tiles(B, CK, jnp.dtype(feat.dtype).itemsize)
    grid = (B // tb, CK // tk)          # (parallel batch, contraction last)

    return pl.pallas_call(
        _recog_kernel,
        out_shape=jax.ShapeDtypeStruct((B, NUM_CLASSES), jnp.float32),
        grid_spec=pltpu.PrefetchScalarGridSpec(
            num_scalar_prefetch=0,
            grid=grid,
            in_specs=[
                # feat stream: new (b, k) tile every step -> double-buffered DMA.
                pl.BlockSpec((tb, tk), lambda b, k: (b, k)),
                # expanded-weight chunk matching the current contraction tile.
                pl.BlockSpec((tk, NUM_CLASSES), lambda b, k: (k, 0)),
                # side term: block index constant across k -> fetched once per b tile.
                pl.BlockSpec((tb, NUM_CLASSES), lambda b, k: (b, 0)),
            ],
            out_specs=pl.BlockSpec((tb, NUM_CLASSES), lambda b, k: (b, 0)),
            scratch_shapes=[pltpu.VMEM((tb, NUM_CLASSES), jnp.float32)],
        ),
        compiler_params=pltpu.CompilerParams(
            dimension_semantics=("parallel", "arbitrary")),
    )(feat, wf_exp, side)


def _reference(feat_nchw, omg, eeg, weight, bias):
    pooled = jnp.mean(feat_nchw.astype(jnp.float32), axis=(2, 3))
    omg = omg.astype(jnp.float32)
    eeg = eeg.astype(jnp.float32)
    omg_n = omg / jnp.maximum(jnp.linalg.norm(omg, axis=1, keepdims=True), EPS)
    eeg_n = eeg / jnp.maximum(jnp.linalg.norm(eeg, axis=1, keepdims=True), EPS)
    x = jnp.concatenate([pooled, omg_n, eeg_n], axis=1)
    return x @ weight.astype(jnp.float32) + bias.astype(jnp.float32)


if __name__ == "__main__":
    key = jax.random.PRNGKey(0)
    k_feat, k_omg, k_eeg, k_w, k_b = jax.random.split(key, 5)

    B, H, W = 2, 4, 4
    feat = jax.random.normal(k_feat, (B, FEAT_C, H, W), dtype=jnp.float32)
    omg = jax.random.normal(k_omg, (B, OMG_D), dtype=jnp.float32)
    eeg = jax.random.normal(k_eeg, (B, EEG_D), dtype=jnp.float32)

    # Deterministic fc_extend init (torch.nn.Linear default: U(-1/sqrt(fan_in), +)).
    fan_in = FEAT_C + OMG_D + EEG_D
    bound = 1.0 / np.sqrt(fan_in)
    weight = jax.random.uniform(k_w, (fan_in, NUM_CLASSES), jnp.float32,
                                -bound, bound)
    bias = jax.random.uniform(k_b, (NUM_CLASSES,), jnp.float32, -bound, bound)

    out = jax.block_until_ready(recog_model_forward(feat, omg, eeg, weight, bias))
    ref = _reference(feat, omg, eeg, weight, bias)
    np.testing.assert_allclose(np.asarray(out), np.asarray(ref),
                               rtol=1e-5, atol=1e-5)

    # bf16 feature-map path: halves HBM bytes on the dominant stream; the expanded
    # weight is cast to bf16 as well and fed to the MXU natively, accumulation stays
    # f32 inside the kernel -> loose tolerance vs the f32 reference.
    out_bf16 = jax.block_until_ready(
        recog_model_forward(feat.astype(jnp.bfloat16), omg, eeg, weight, bias))
    np.testing.assert_allclose(np.asarray(out_bf16), np.asarray(ref),
                               rtol=2e-2, atol=2e-2)

    print("KERNEL_OK")
</pallas_src>

<mosaic_0001>
module attributes {stable_mosaic.version = 11 : i64} {
  func.func @_recog_kernel(%arg0: i32, %arg1: i32, %arg2: memref<2x8192xf32, #tpu.memory_space<vmem>>, %arg3: memref<8192x9xf32, #tpu.memory_space<vmem>>, %arg4: memref<2x9xf32, #tpu.memory_space<vmem>>, %arg5: memref<2x9xf32, #tpu.memory_space<vmem>>, %arg6: memref<2x9xf32, #tpu.memory_space<vmem>>) attributes {dimension_semantics = [#tpu.dimension_semantics<parallel>, #tpu.dimension_semantics<arbitrary>], iteration_bounds = array<i64: 1, 4>, scalar_prefetch = 0 : i64, scratch_operands = 1 : i64, tpu.core_type = #tpu.core_type<tc>, window_params = [{transform_indices = @transform_0, window_bounds = array<i64: 2, 8192>}, {transform_indices = @transform_1, window_bounds = array<i64: 8192, 9>}, {transform_indices = @transform_2, window_bounds = array<i64: 2, 9>}, {transform_indices = @transform_3, window_bounds = array<i64: 2, 9>}]} {
    %c0_i32 = arith.constant 0 : i32
    %0 = arith.cmpi eq, %arg1, %c0_i32 : i32
    %1 = arith.extui %0 : i1 to i32
    %c0_i32_0 = arith.constant 0 : i32
    %2 = arith.cmpi ne, %1, %c0_i32_0 : i32
    scf.if %2 {
      %cst_9 = arith.constant 0.000000e+00 : f32
      %12 = vector.broadcast %cst_9 : f32 to vector<2x9xf32>
      %c0_10 = arith.constant 0 : index
      %c0_11 = arith.constant 0 : index
      %13 = vector.load %arg6[%c0_10, %c0_11] : memref<2x9xf32, #tpu.memory_space<vmem>>, vector<2x9xf32>
      tpu.vector_store %arg6[%c0_10, %c0_11], %12 {strides = array<i32>} : memref<2x9xf32, #tpu.memory_space<vmem>>, vector<2x9xf32>,
    } else {
    }
    %c0 = arith.constant 0 : index
    %c0_1 = arith.constant 0 : index
    %3 = vector.load %arg6[%c0, %c0_1] : memref<2x9xf32, #tpu.memory_space<vmem>>, vector<2x9xf32>
    %c0_2 = arith.constant 0 : index
    %c0_3 = arith.constant 0 : index
    %4 = vector.load %arg2[%c0_2, %c0_3] : memref<2x8192xf32, #tpu.memory_space<vmem>>, vector<2x8192xf32>
    %c0_4 = arith.constant 0 : index
    %c0_5 = arith.constant 0 : index
    %5 = vector.load %arg3[%c0_4, %c0_5] : memref<8192x9xf32, #tpu.memory_space<vmem>>, vector<8192x9xf32>
    %cst = arith.constant dense<0.000000e+00> : vector<2x9xf32>
    %6 = tpu.matmul %4, %5, %cst {dimension_numbers = #tpu.dot_dimension_numbers<[1], [0], [0], [1], [0, 0, 1, 1], [], []>} : vector<2x8192xf32>, vector<8192x9xf32>, vector<2x9xf32> -> vector<2x9xf32>
    %7 = arith.addf %3, %6 : vector<2x9xf32>
    %c0_6 = arith.constant 0 : index
    %c0_7 = arith.constant 0 : index
    %8 = vector.load %arg6[%c0_6, %c0_7] : memref<2x9xf32, #tpu.memory_space<vmem>>, vector<2x9xf32>
    tpu.vector_store %arg6[%c0_6, %c0_7], %7 {strides = array<i32>} : memref<2x9xf32, #tpu.memory_space<vmem>>, vector<2x9xf32>,
    %c3_i32 = arith.constant 3 : i32
    %9 = arith.cmpi eq, %arg1, %c3_i32 : i32
    %10 = arith.extui %9 : i1 to i32
    %c0_i32_8 = arith.constant 0 : i32
    %11 = arith.cmpi ne, %10, %c0_i32_8 : i32
    scf.if %11 {
      %c0_9 = arith.constant 0 : index
      %c0_10 = arith.constant 0 : index
      %12 = vector.load %arg6[%c0_9, %c0_10] : memref<2x9xf32, #tpu.memory_space<vmem>>, vector<2x9xf32>
      %c0_11 = arith.constant 0 : index
      %c0_12 = arith.constant 0 : index
      %13 = vector.load %arg4[%c0_11, %c0_12] : memref<2x9xf32, #tpu.memory_space<vmem>>, vector<2x9xf32>
      %14 = arith.addf %12, %13 : vector<2x9xf32>
      %c0_13 = arith.constant 0 : index
      %c0_14 = arith.constant 0 : index
      %15 = vector.load %arg5[%c0_13, %c0_14] : memref<2x9xf32, #tpu.memory_space<vmem>>, vector<2x9xf32>
      tpu.vector_store %arg5[%c0_13, %c0_14], %14 {strides = array<i32>} : memref<2x9xf32, #tpu.memory_space<vmem>>, vector<2x9xf32>,
    } else {
    }
    return
  }
  func.func @transform_0(%arg0: i32, %arg1: i32) -> (i32, i32) {
    %c0_i32 = arith.constant 0 : i32
    return %arg0, %arg1 : i32, i32
  }
  func.func @transform_1(%arg0: i32, %arg1: i32) -> (i32, i32) {
    %c0_i32 = arith.constant 0 : i32
    %c0_i32_0 = arith.constant 0 : i32
    return %arg1, %c0_i32 : i32, i32
  }
  func.func @transform_2(%arg0: i32, %arg1: i32) -> (i32, i32) {
    %c0_i32 = arith.constant 0 : i32
    %c0_i32_0 = arith.constant 0 : i32
    return %arg0, %c0_i32 : i32, i32
  }
  func.func @transform_3(%arg0: i32, %arg1: i32) -> (i32, i32) {
    %c0_i32 = arith.constant 0 : i32
    %c0_i32_0 = arith.constant 0 : i32
    return %arg0, %c0_i32 : i32, i32
  }
}

</mosaic_0001>

<bundles_post_ra>
// kernel: tpu_custom_call.1
= control target key start
LH: loop header
LB: loop body
LE: loop exit
PB: predicated region body
PF: predicated region fallthrough
CT: control target
= control target key end

     0   :  { %8 = vsyncpa [#allocation4], 0  ;;  %s5230_s12 = smov 0   ;;  %s5232_s13 = smov 0   ;;  %s6368_s0 = inlined_call_operand.vmem [shape: f32[2,32768], index: 0, kind: input, shape index: {}]   ;;  %s6369_s1 = inlined_call_operand.vmem [shape: f32[32768,9], index: 1, kind: input, shape index: {}]   ;;  %s6370_s2 = inlined_call_operand.vmem [shape: f32[2,9], index: 2, kind: input, shape index: {}]   ;;  %s6371_s3 = inlined_call_operand.hbm [shape: f32[2,9], index: 3, kind: output, shape index: {}]  }
   0x1   :  { %s5234_s14 = smov 0  }
   0x2 LB: > { %s3971_s15 = sadd.s32 4294967295, %s5205_s14   ;;  %s23_s16 = sadd.s32 1, %s5201_s13  ;;  %s5205_s14 = sphi %s5234_s14, %s14_s14   ;;  %s5201_s13 = sphi %s5232_s13, %s6374_s13   ;;  %s5197_s12 = sphi %s5230_s12, %s6373_s12  }
   0x3   : > { %p24_p0 = scmp.ge.s32.totalorder %s23_s16, 4  ;;  %p3975_p1 = scmp.ge.s32.totalorder %s5205_s14, 1 }
   0x4   : > { %p177_p2 = scmp.lt.s32.totalorder %s5205_s14, 5 }
   0x5   : > { %s6376_s16 = smov (%p24_p0, %s23_s16), 0 }
   0x6   : > { %p178_p3 = pnand %p3975_p1, %p177_p2 }
   0x7   : > { %s3976_s17 = sshll.u32 (!%p178_p3), %s5197_s12, 6  ;;  %s3978_s18 = sshll.u32 (!%p178_p3), %s5197_s12, 10 }
   0x8   : > { %181 = sbr.rel (%p178_p3) target bundleno = 797 (0x31d), region = 32  ;;  %p212_p4 = scmp.lt.s32.totalorder (!%p178_p3), %s3976_s17, 255 }
   0x9   : > { %p220_p5 = scmp.lt.s32.totalorder (!%p178_p3), %s3978_s18, 4095  ;;  %p3980_p6 = scmp.ne.s32.totalorder (!%p178_p3), %s5197_s12, 0 }
   0xd   : > { %s6378_s17 = smov (!%p212_p4, %s3976_s17), 255  ;;  %s6380_s18 = smov (!%p220_p5, %s3978_s18), 4095 }
   0xe   : > { %s3977_s19 = sshll.u32 %s6378_s17, 1  ;;  %s3979_s23 = sshll.u32 %s6380_s18, 3 }
   0xf   : > { %s5256_s22 = scalar_lea.vmem %s6368_s0, %s3977_s19  ;;  %s5261_s26 = scalar_lea.vmem %s6369_s1, %s3979_s23 }
  0x10   : > { %232 = sbr.rel (%p3980_p6) target bundleno = 23 (0x17), region = 36 }
  0x15   : > { %vm233_vm0 = vcmask 66560   ;;  %v5207_v0 = vmov 0.0  }
  0x16   : > { %234 = vst.msk [vmem:[#allocation2] sm:$0x3] %vm233_vm0, %v5207_v0 }
  0x17 PF: > { %v283_v1 = vld [vmem:[%s5261_s26 + $0xf8] sm:$0xff]  ;;  %v282_v5 = vld [vmem:[%s5261_s26 + $0xf0] sm:$0xff]  ;;  %v281_v9 = vld [vmem:[%s5261_s26 + $0xe8] sm:$0xff]  ;;  %v5208_v31 = vmov 1983009808   ;;  %v1296_v33 = vlaneseq  ;;  %vm3869_vm1 = vcmask 66560  }
  0x18   : > { %v315_v2 = vld [vmem:[%s5261_s26 + $0x1f8] sm:$0xff]  ;;  %3986 = vmatprep.subr.mxu0 %v283_v1  ;;  %v314_v6 = vld [vmem:[%s5261_s26 + $0x1f0] sm:$0xff]  ;;  %v313_v10 = vld [vmem:[%s5261_s26 + $0x1e8] sm:$0xff]  ;;  %v1294_v32 = vunpack.c.l.s4 %v5208_v31  ;;  %p3981_p7 = scmp.ne.s32.totalorder %s5197_s12, 3 }
  0x19   : > { %v267_v3 = vld [vmem:[%s5261_s26 + $0x78] sm:$0xff]  ;;  %4021 = vmatprep.subr.mxu1 %v315_v2  ;;  %v266_v7 = vld [vmem:[%s5261_s26 + $0x70] sm:$0xff]  ;;  %v265_v11 = vld [vmem:[%s5261_s26 + $0x68] sm:$0xff]  ;;  %v1297_v43 = vshrl.u32 %v1296_v33, 7 }
  0x1a   : > { %v299_v4 = vld [vmem:[%s5261_s26 + $0x178] sm:$0xff]  ;;  %3987 = vmatpush3.msra.mxu0 %v267_v3  ;;  %v298_v8 = vld [vmem:[%s5261_s26 + $0x170] sm:$0xff]  ;;  %v297_v12 = vld [vmem:[%s5261_s26 + $0x168] sm:$0xff]  ;;  %v1295_v42 = vunpack.c.0.s8 %v1294_v32 }
  0x1b   : > { %4022 = vmatpush3.msra.mxu1 %v299_v4  ;;  %3988 = vmatprep.subr.mxu0 %v282_v5  ;;  %v280_v13 = vld [vmem:[%s5261_s26 + $0xe0] sm:$0xff]  ;;  %v279_v17 = vld [vmem:[%s5261_s26 + $0xd8] sm:$0xff]  ;;  %v278_v21 = vld [vmem:[%s5261_s26 + $0xd0] sm:$0xff] }
  0x1c   : > { %4023 = vmatprep.subr.mxu1 %v314_v6  ;;  %3989 = vmatpush3.msra.mxu0 %v266_v7  ;;  %v312_v14 = vld [vmem:[%s5261_s26 + $0x1e0] sm:$0xff]  ;;  %v311_v18 = vld [vmem:[%s5261_s26 + $0x1d8] sm:$0xff]  ;;  %v310_v22 = vld [vmem:[%s5261_s26 + $0x1d0] sm:$0xff]  ;;  %v5310_v52 = vsub.s32 %v1295_v42, %v1297_v43 }
  0x1d   : > { %4024 = vmatpush3.msra.mxu1 %v298_v8  ;;  %3990 = vmatprep.subr.mxu0 %v281_v9  ;;  %v264_v15 = vld [vmem:[%s5261_s26 + $0x60] sm:$0xff]  ;;  %v263_v19 = vld [vmem:[%s5261_s26 + $0x58] sm:$0xff]  ;;  %v262_v23 = vld [vmem:[%s5261_s26 + $0x50] sm:$0xff] }
  0x1e   : > { %4025 = vmatprep.subr.mxu1 %v313_v10  ;;  %v296_v16 = vld [vmem:[%s5261_s26 + $0x160] sm:$0xff]  ;;  %3991 = vmatpush3.msra.mxu0 %v265_v11  ;;  %v295_v20 = vld [vmem:[%s5261_s26 + $0x158] sm:$0xff]  ;;  %v294_v24 = vld [vmem:[%s5261_s26 + $0x150] sm:$0xff] }
  0x1f   : > { %4026 = vmatpush3.msra.mxu1 %v297_v12  ;;  %3992 = vmatprep.subr.mxu0 %v280_v13  ;;  %v277_v25 = vld [vmem:[%s5261_s26 + $0xc8] sm:$0xff]  ;;  %v276_v29 = vld [vmem:[%s5261_s26 + $0xc0] sm:$0xff]  ;;  %v275_v36 = vld [vmem:[%s5261_s26 + $0xb8] sm:$0xff] }
  0x20   : > { %4027 = vmatprep.subr.mxu1 %v312_v14  ;;  %3993 = vmatpush3.msra.mxu0 %v264_v15  ;;  %v309_v26 = vld [vmem:[%s5261_s26 + $0x1c8] sm:$0xff]  ;;  %v308_v30 = vld [vmem:[%s5261_s26 + $0x1c0] sm:$0xff]  ;;  %v307_v37 = vld [vmem:[%s5261_s26 + $0x1b8] sm:$0xff] }
  0x21   : > { %4028 = vmatpush3.msra.mxu1 %v296_v16  ;;  %3994 = vmatprep.subr.mxu0 %v279_v17  ;;  %v261_v27 = vld [vmem:[%s5261_s26 + $0x48] sm:$0xff]  ;;  %v260_v34 = vld [vmem:[%s5261_s26 + $0x40] sm:$0xff]  ;;  %v259_v38 = vld [vmem:[%s5261_s26 + $0x38] sm:$0xff] }
  0x22   : > { %4029 = vmatprep.subr.mxu1 %v311_v18  ;;  %3995 = vmatpush3.msra.mxu0 %v263_v19  ;;  %v293_v28 = vld [vmem:[%s5261_s26 + $0x148] sm:$0xff]  ;;  %v292_v35 = vld [vmem:[%s5261_s26 + $0x140] sm:$0xff]  ;;  %v291_v39 = vld [vmem:[%s5261_s26 + $0x138] sm:$0xff] }
  0x23   : > { %4030 = vmatpush3.msra.mxu1 %v295_v20  ;;  %3996 = vmatprep.subr.mxu0 %v278_v21  ;;  %v274_v40 = vld [vmem:[%s5261_s26 + $0xb0] sm:$0xff]  ;;  %v273_v46 = vld [vmem:[%s5261_s26 + $0xa8] sm:$0xff]  ;;  %v272_v50 = vld [vmem:[%s5261_s26 + $0xa0] sm:$0xff] }
  0x24   : > { %4031 = vmatprep.subr.mxu1 %v310_v22  ;;  %3997 = vmatpush3.msra.mxu0 %v262_v23  ;;  %v306_v41 = vld [vmem:[%s5261_s26 + $0x1b0] sm:$0xff]  ;;  %v305_v47 = vld [vmem:[%s5261_s26 + $0x1a8] sm:$0xff]  ;;  %v304_v51 = vld [vmem:[%s5261_s26 + $0x1a0] sm:$0xff] }
  0x25   : > { %4032 = vmatpush3.msra.mxu1 %v294_v24  ;;  %3998 = vmatprep.subr.mxu0 %v277_v25  ;;  %v258_v44 = vld [vmem:[%s5261_s26 + $0x30] sm:$0xff]  ;;  %v257_v48 = vld [vmem:[%s5261_s26 + $0x28] sm:$0xff]  ;;  %v256_v53 = vld [vmem:[%s5261_s26 + $0x20] sm:$0xff] }
  0x26   : > { %4033 = vmatprep.subr.mxu1 %v309_v26  ;;  %3999 = vmatpush3.msra.mxu0 %v261_v27  ;;  %v290_v45 = vld [vmem:[%s5261_s26 + $0x130] sm:$0xff]  ;;  %v289_v49 = vld [vmem:[%s5261_s26 + $0x128] sm:$0xff]  ;;  %v288_v54 = vld [vmem:[%s5261_s26 + $0x120] sm:$0xff] }
  0x27   : > { %4034 = vmatpush3.msra.mxu1 %v293_v28  ;;  %4000 = vmatprep.subr.mxu0 %v276_v29  ;;  %v236_v55 = vld [vmem:[%s5256_s22] sm:$0xff]  ;;  %v271_v56 = vld [vmem:[%s5261_s26 + $0x98] sm:$0xff]  ;;  %v270_v61 = vld [vmem:[%s5261_s26 + $0x90] sm:$0xff] }
  0x28   : > { %4035 = vmatprep.subr.mxu1 %v308_v30  ;;  %4001 = vmatpush3.msra.mxu0 %v260_v34  ;;  %v303_v57 = vld [vmem:[%s5261_s26 + $0x198] sm:$0xff]  ;;  %v1292_v58 = vcombine.high %v236_v55, %v236_v55  ;;  %v302_v62 = vld [vmem:[%s5261_s26 + $0x190] sm:$0xff]  ;;  %v1299_v63 = vrot.slane %v236_v55, %v5310_v52  ;;  %v269_v3 = vld [vmem:[%s5261_s26 + $0x88] sm:$0xff] }
  0x29   : > { %4036 = vmatpush3.msra.mxu1 %v292_v35  ;;  %4002 = vmatprep.subr.mxu0 %v275_v36  ;;  %v255_v59 = vld [vmem:[%s5261_s26 + $0x18] sm:$0xff]  ;;  %v254_v0 = vld [vmem:[%s5261_s26 + $0x10] sm:$0xff]  ;;  %v301_v4 = vld [vmem:[%s5261_s26 + $0x188] sm:$0xff] }
  0x2a   : > { %4037 = vmatprep.subr.mxu1 %v307_v37  ;;  %4003 = vmatpush3.msra.mxu0 %v259_v38  ;;  %v287_v60 = vld [vmem:[%s5261_s26 + $0x118] sm:$0xff]  ;;  %v286_v1 = vld [vmem:[%s5261_s26 + $0x110] sm:$0xff]  ;;  %v1306_v2 = vrot.slane %v1292_v58, %v5310_v52  ;;  %v253_v5 = vld [vmem:[%s5261_s26 + $0x8] sm:$0xff]  ;;  %v1307_v9 = vcombine.high %v1299_v63, %v1299_v63 }
  0x2b   : > { %4038 = vmatpush3.msra.mxu1 %v291_v39  ;;  %4004 = vmatprep.subr.mxu0 %v274_v40  ;;  %v285_v6 = vld [vmem:[%s5261_s26 + $0x108] sm:$0xff]  ;;  %v268_v7 = vld [vmem:[%s5261_s26 + $0x80] sm:$0xff]  ;;  %v347_v13 = vld [vmem:[%s5261_s26 + $0x2f8] sm:$0xff] }
  0x2c   : > { %4039 = vmatprep.subr.mxu1 %v306_v41  ;;  %4005 = vmatpush3.msra.mxu0 %v258_v44  ;;  %v300_v8 = vld [vmem:[%s5261_s26 + $0x180] sm:$0xff]  ;;  %v1308_v11 = vcombine.high %v1306_v2, %v1306_v2  ;;  %v379_v14 = vld [vmem:[%s5261_s26 + $0x3f8] sm:$0xff]  ;;  %v346_v17 = vld [vmem:[%s5261_s26 + $0x2f0] sm:$0xff] }
  0x2d   : > { %4040 = vmatpush3.msra.mxu1 %v290_v45  ;;  %4006 = vmatprep.subr.mxu0 %v273_v46  ;;  %v252_v10 = vld [vmem:[%s5261_s26] sm:$0xff]  ;;  %v331_v15 = vld [vmem:[%s5261_s26 + $0x278] sm:$0xff]  ;;  %v378_v18 = vld [vmem:[%s5261_s26 + $0x3f0] sm:$0xff] }
  0x2e   : > { %4041 = vmatprep.subr.mxu1 %v305_v47  ;;  %4007 = vmatpush3.msra.mxu0 %v257_v48  ;;  %v284_v12 = vld [vmem:[%s5261_s26 + $0x100] sm:$0xff]  ;;  %v363_v16 = vld [vmem:[%s5261_s26 + $0x378] sm:$0xff]  ;;  %v330_v19 = vld [vmem:[%s5261_s26 + $0x270] sm:$0xff] }
  0x2f   : > { %4042 = vmatpush3.msra.mxu1 %v289_v49  ;;  %4008 = vmatprep.subr.mxu0 %v272_v50  ;;  %v362_v20 = vld [vmem:[%s5261_s26 + $0x370] sm:$0xff]  ;;  %v345_v21 = vld [vmem:[%s5261_s26 + $0x2e8] sm:$0xff]  ;;  %v344_v25 = vld [vmem:[%s5261_s26 + $0x2e0] sm:$0xff] }
  0x30   : > { %4043 = vmatprep.subr.mxu1 %v304_v51  ;;  %4009 = vmatpush3.msra.mxu0 %v256_v53  ;;  %v377_v22 = vld [vmem:[%s5261_s26 + $0x3e8] sm:$0xff]  ;;  %v376_v26 = vld [vmem:[%s5261_s26 + $0x3e0] sm:$0xff]  ;;  %v343_v29 = vld [vmem:[%s5261_s26 + $0x2d8] sm:$0xff] }
  0x31   : > { %4044 = vmatpush3.msra.mxu1 %v288_v54  ;;  %4010 = vmatprep.subr.mxu0 %v271_v56  ;;  %v329_v23 = vld [vmem:[%s5261_s26 + $0x268] sm:$0xff]  ;;  %v328_v27 = vld [vmem:[%s5261_s26 + $0x260] sm:$0xff]  ;;  %v375_v30 = vld [vmem:[%s5261_s26 + $0x3d8] sm:$0xff] }
  0x32   : > { %4045 = vmatprep.subr.mxu1 %v303_v57  ;;  %4011 = vmatpush3.msra.mxu0 %v255_v59  ;;  %v361_v24 = vld [vmem:[%s5261_s26 + $0x368] sm:$0xff]  ;;  %v360_v28 = vld [vmem:[%s5261_s26 + $0x360] sm:$0xff]  ;;  %v327_v31 = vld [vmem:[%s5261_s26 + $0x258] sm:$0xff] }
  0x33   : > { %4046 = vmatpush3.msra.mxu1 %v287_v60  ;;  %4012 = vmatprep.subr.mxu0 %v270_v61  ;;  %v359_v32 = vld [vmem:[%s5261_s26 + $0x358] sm:$0xff]  ;;  %v342_v33 = vld [vmem:[%s5261_s26 + $0x2d0] sm:$0xff]  ;;  %v341_v37 = vld [vmem:[%s5261_s26 + $0x2c8] sm:$0xff] }
  0x34   : > { %4047 = vmatprep.subr.mxu1 %v302_v62  ;;  %4013 = vmatpush3.msra.mxu0 %v254_v0  ;;  %v374_v34 = vld [vmem:[%s5261_s26 + $0x3d0] sm:$0xff]  ;;  %v373_v38 = vld [vmem:[%s5261_s26 + $0x3c8] sm:$0xff]  ;;  %v340_v41 = vld [vmem:[%s5261_s26 + $0x2c0] sm:$0xff] }
  0x35   : > { %4048 = vmatpush3.msra.mxu1 %v286_v1  ;;  %4014 = vmatprep.subr.mxu0 %v269_v3  ;;  %v326_v35 = vld [vmem:[%s5261_s26 + $0x250] sm:$0xff]  ;;  %v325_v39 = vld [vmem:[%s5261_s26 + $0x248] sm:$0xff]  ;;  %v372_v42 = vld [vmem:[%s5261_s26 + $0x3c0] sm:$0xff] }
  0x36   : > { %4049 = vmatprep.subr.mxu1 %v301_v4  ;;  %4015 = vmatpush3.msra.mxu0 %v253_v5  ;;  %v358_v36 = vld [vmem:[%s5261_s26 + $0x350] sm:$0xff]  ;;  %v357_v40 = vld [vmem:[%s5261_s26 + $0x348] sm:$0xff]  ;;  %v324_v43 = vld [vmem:[%s5261_s26 + $0x240] sm:$0xff] }
  0x37   : > { %4050 = vmatpush3.msra.mxu1 %v285_v6  ;;  %4016 = vmatprep.subr.mxu0 %v268_v7  ;;  %v356_v44 = vld [vmem:[%s5261_s26 + $0x340] sm:$0xff]  ;;  %v339_v45 = vld [vmem:[%s5261_s26 + $0x2b8] sm:$0xff]  ;;  %v338_v49 = vld [vmem:[%s5261_s26 + $0x2b0] sm:$0xff] }
  0x38   : > { %4051 = vmatprep.subr.mxu1 %v300_v8  ;;  %4017 = vmatpush3.msra.mxu0 %v252_v10  ;;  %v371_v46 = vld [vmem:[%s5261_s26 + $0x3b8] sm:$0xff]  ;;  %v370_v50 = vld [vmem:[%s5261_s26 + $0x3b0] sm:$0xff]  ;;  %v337_v54 = vld [vmem:[%s5261_s26 + $0x2a8] sm:$0xff] }
  0x39   : > { %1692 = vmatprep.mubr.f32.mxu0 %v1307_v9  ;;  %4052 = vmatpush3.msra.mxu1 %v284_v12  ;;  %v323_v47 = vld [vmem:[%s5261_s26 + $0x238] sm:$0xff]  ;;  %v322_v51 = vld [vmem:[%s5261_s26 + $0x230] sm:$0xff]  ;;  %v369_v55 = vld [vmem:[%s5261_s26 + $0x3a8] sm:$0xff] }
  0x3a   : > { %1762 = vmatprep.mubr.f32.mxu1 %v1308_v11  ;;  %1693 = vmatmul.mubr.f32.vlgmr.msra.gmra.mxu0 %v1299_v63  ;;  %v355_v48 = vld [vmem:[%s5261_s26 + $0x338] sm:$0xff]  ;;  %v354_v53 = vld [vmem:[%s5261_s26 + $0x330] sm:$0xff]  ;;  %v321_v56 = vld [vmem:[%s5261_s26 + $0x228] sm:$0xff] }
  0x3b   : > { %1763 = vmatmul.mubr.f32.vlgmr.msra.gmra.mxu1 %v1306_v2  ;;  %4056 = vmatprep.subr.mxu0 %v347_v13  ;;  %v353_v57 = vld [vmem:[%s5261_s26 + $0x328] sm:$0xff]  ;;  %v336_v59 = vld [vmem:[%s5261_s26 + $0x2a0] sm:$0xff]  ;;  %v335_v63 = vld [vmem:[%s5261_s26 + $0x298] sm:$0xff] }
  0x3c   : > { %4091 = vmatprep.subr.mxu1 %v379_v14  ;;  %4057 = vmatpush3.msra.mxu0 %v331_v15  ;;  %v237_v58 = vld [vmem:[%s5256_s22 + $0x8] sm:$0xff]  ;;  %v368_v60 = vld [vmem:[%s5261_s26 + $0x3a0] sm:$0xff]  ;;  %v367_v0 = vld [vmem:[%s5261_s26 + $0x398] sm:$0xff] }
  0x3d   : > { %4092 = vmatpush3.msra.mxu1 %v363_v16  ;;  %4058 = vmatprep.subr.mxu0 %v346_v17  ;;  %v320_v61 = vld [vmem:[%s5261_s26 + $0x220] sm:$0xff]  ;;  %v1309_v1 = vcombine.high %v237_v58, %v237_v58  ;;  %v319_v2 = vld [vmem:[%s5261_s26 + $0x218] sm:$0xff]  ;;  %v334_v4 = vld [vmem:[%s5261_s26 + $0x290] sm:$0xff]  ;;  %v1316_v6 = vrot.slane %v237_v58, %v5310_v52 }
  0x3e   : > { %4093 = vmatprep.subr.mxu1 %v378_v18  ;;  %4059 = vmatpush3.msra.mxu0 %v330_v19  ;;  %v352_v62 = vld [vmem:[%s5261_s26 + $0x320] sm:$0xff]  ;;  %v351_v3 = vld [vmem:[%s5261_s26 + $0x318] sm:$0xff]  ;;  %v366_v5 = vld [vmem:[%s5261_s26 + $0x390] sm:$0xff] }
  0x3f   : > { %4094 = vmatpush3.msra.mxu1 %v362_v20  ;;  %4060 = vmatprep.subr.mxu0 %v345_v21  ;;  %v318_v7 = vld [vmem:[%s5261_s26 + $0x210] sm:$0xff]  ;;  %v333_v9 = vld [vmem:[%s5261_s26 + $0x288] sm:$0xff]  ;;  %v1323_v11 = vrot.slane %v1309_v1, %v5310_v52  ;;  %v332_v14 = vld [vmem:[%s5261_s26 + $0x280] sm:$0xff]  ;;  %v1324_v16 = vcombine.high %v1316_v6, %v1316_v6 }
  0x40   : > { %4095 = vmatprep.subr.mxu1 %v377_v22  ;;  %4061 = vmatpush3.msra.mxu0 %v329_v23  ;;  %v350_v8 = vld [vmem:[%s5261_s26 + $0x310] sm:$0xff]  ;;  %v365_v10 = vld [vmem:[%s5261_s26 + $0x388] sm:$0xff]  ;;  %v364_v15 = vld [vmem:[%s5261_s26 + $0x380] sm:$0xff] }
  0x41   : > { %4096 = vmatpush3.msra.mxu1 %v361_v24  ;;  %4062 = vmatprep.subr.mxu0 %v344_v25  ;;  %v317_v12 = vld [vmem:[%s5261_s26 + $0x208] sm:$0xff]  ;;  %v316_v17 = vld [vmem:[%s5261_s26 + $0x200] sm:$0xff]  ;;  %v1325_v19 = vcombine.high %v1323_v11, %v1323_v11  ;;  %v411_v20 = vld [vmem:[%s5261_s26 + $0x4f8] sm:$0xff] }
  0x42   : > { %4097 = vmatprep.subr.mxu1 %v376_v26  ;;  %4063 = vmatpush3.msra.mxu0 %v328_v27  ;;  %v349_v13 = vld [vmem:[%s5261_s26 + $0x308] sm:$0xff]  ;;  %v348_v18 = vld [vmem:[%s5261_s26 + $0x300] sm:$0xff]  ;;  %v443_v21 = vld [vmem:[%s5261_s26 + $0x5f8] sm:$0xff] }
  0x43   : > { %4098 = vmatpush3.msra.mxu1 %v360_v28  ;;  %4064 = vmatprep.subr.mxu0 %v343_v29  ;;  %v395_v22 = vld [vmem:[%s5261_s26 + $0x478] sm:$0xff]  ;;  %v410_v24 = vld [vmem:[%s5261_s26 + $0x4f0] sm:$0xff]  ;;  %v409_v28 = vld [vmem:[%s5261_s26 + $0x4e8] sm:$0xff] }
  0x44   : > { %4099 = vmatprep.subr.mxu1 %v375_v30  ;;  %4065 = vmatpush3.msra.mxu0 %v327_v31  ;;  %v427_v23 = vld [vmem:[%s5261_s26 + $0x578] sm:$0xff]  ;;  %v442_v25 = vld [vmem:[%s5261_s26 + $0x5f0] sm:$0xff]  ;;  %v441_v29 = vld [vmem:[%s5261_s26 + $0x5e8] sm:$0xff] }
  0x45   : > { %4100 = vmatpush3.msra.mxu1 %v359_v32  ;;  %4066 = vmatprep.subr.mxu0 %v342_v33  ;;  %v394_v26 = vld [vmem:[%s5261_s26 + $0x470] sm:$0xff]  ;;  %v393_v30 = vld [vmem:[%s5261_s26 + $0x468] sm:$0xff]  ;;  %v408_v32 = vld [vmem:[%s5261_s26 + $0x4e0] sm:$0xff] }
  0x46   : > { %4101 = vmatprep.subr.mxu1 %v374_v34  ;;  %4067 = vmatpush3.msra.mxu0 %v326_v35  ;;  %v426_v27 = vld [vmem:[%s5261_s26 + $0x570] sm:$0xff]  ;;  %v425_v31 = vld [vmem:[%s5261_s26 + $0x568] sm:$0xff]  ;;  %v440_v33 = vld [vmem:[%s5261_s26 + $0x5e0] sm:$0xff] }
  0x47   : > { %4102 = vmatpush3.msra.mxu1 %v358_v36  ;;  %4068 = vmatprep.subr.mxu0 %v341_v37  ;;  %v392_v34 = vld [vmem:[%s5261_s26 + $0x460] sm:$0xff]  ;;  %v407_v36 = vld [vmem:[%s5261_s26 + $0x4d8] sm:$0xff]  ;;  %v434_v58 = vld [vmem:[%s5261_s26 + $0x5b0] sm:$0xff] }
  0x48   : > { %4103 = vmatprep.subr.mxu1 %v373_v38  ;;  %4069 = vmatpush3.msra.mxu0 %v325_v39  ;;  %v424_v35 = vld [vmem:[%s5261_s26 + $0x560] sm:$0xff]  ;;  %v439_v37 = vld [vmem:[%s5261_s26 + $0x5d8] sm:$0xff]  ;;  %v238_v1 = vld [vmem:[%s5256_s22 + $0x10] sm:$0xff] }
  0x49   : > { %4104 = vmatpush3.msra.mxu1 %v357_v40  ;;  %4070 = vmatprep.subr.mxu0 %v340_v41  ;;  %v391_v38 = vld [vmem:[%s5261_s26 + $0x458] sm:$0xff]  ;;  %v406_v40 = vld [vmem:[%s5261_s26 + $0x4d0] sm:$0xff] }
  0x4a   : > { %4105 = vmatprep.subr.mxu1 %v372_v42  ;;  %4071 = vmatpush3.msra.mxu0 %v324_v43  ;;  %v423_v39 = vld [vmem:[%s5261_s26 + $0x558] sm:$0xff]  ;;  %v438_v41 = vld [vmem:[%s5261_s26 + $0x5d0] sm:$0xff] }
  0x4b   : > { %4106 = vmatpush3.msra.mxu1 %v356_v44  ;;  %4072 = vmatprep.subr.mxu0 %v339_v45  ;;  %v390_v42 = vld [vmem:[%s5261_s26 + $0x450] sm:$0xff]  ;;  %v405_v44 = vld [vmem:[%s5261_s26 + $0x4c8] sm:$0xff] }
  0x4c   : > { %4107 = vmatprep.subr.mxu1 %v371_v46  ;;  %4073 = vmatpush3.msra.mxu0 %v323_v47  ;;  %v422_v43 = vld [vmem:[%s5261_s26 + $0x550] sm:$0xff]  ;;  %v437_v45 = vld [vmem:[%s5261_s26 + $0x5c8] sm:$0xff] }
  0x4d   : > { %4108 = vmatpush3.msra.mxu1 %v355_v48  ;;  %4074 = vmatprep.subr.mxu0 %v338_v49  ;;  %v389_v46 = vld [vmem:[%s5261_s26 + $0x448] sm:$0xff]  ;;  %v404_v48 = vld [vmem:[%s5261_s26 + $0x4c0] sm:$0xff] }
  0x4e   : > { %4109 = vmatprep.subr.mxu1 %v370_v50  ;;  %4075 = vmatpush3.msra.mxu0 %v322_v51  ;;  %v421_v47 = vld [vmem:[%s5261_s26 + $0x548] sm:$0xff]  ;;  %v436_v49 = vld [vmem:[%s5261_s26 + $0x5c0] sm:$0xff] }
  0x4f   : > { %4110 = vmatpush3.msra.mxu1 %v354_v53  ;;  %4076 = vmatprep.subr.mxu0 %v337_v54  ;;  %v388_v50 = vld [vmem:[%s5261_s26 + $0x440] sm:$0xff]  ;;  %v403_v53 = vld [vmem:[%s5261_s26 + $0x4b8] sm:$0xff] }
  0x50   : > { %4111 = vmatprep.subr.mxu1 %v369_v55  ;;  %4077 = vmatpush3.msra.mxu0 %v321_v56  ;;  %v420_v51 = vld [vmem:[%s5261_s26 + $0x540] sm:$0xff]  ;;  %v435_v54 = vld [vmem:[%s5261_s26 + $0x5b8] sm:$0xff] }
  0x51   : > { %4112 = vmatpush3.msra.mxu1 %v353_v57  ;;  %4078 = vmatprep.subr.mxu0 %v336_v59  ;;  %v387_v55 = vld [vmem:[%s5261_s26 + $0x438] sm:$0xff]  ;;  %v402_v57 = vld [vmem:[%s5261_s26 + $0x4b0] sm:$0xff] }
  0x52   : > { %4113 = vmatprep.subr.mxu1 %v368_v60  ;;  %4079 = vmatpush3.msra.mxu0 %v320_v61  ;;  %v419_v56 = vld [vmem:[%s5261_s26 + $0x538] sm:$0xff]  ;;  %v386_v59 = vld [vmem:[%s5261_s26 + $0x430] sm:$0xff]  ;;  %v401_v61 = vld [vmem:[%s5261_s26 + $0x4a8] sm:$0xff] }
  0x53   : > { %4114 = vmatpush3.msra.mxu1 %v352_v62  ;;  %4080 = vmatprep.subr.mxu0 %v335_v63  ;;  %v418_v60 = vld [vmem:[%s5261_s26 + $0x530] sm:$0xff]  ;;  %v433_v62 = vld [vmem:[%s5261_s26 + $0x5a8] sm:$0xff] }
  0x54   : > { %4115 = vmatprep.subr.mxu1 %v367_v0  ;;  %4081 = vmatpush3.msra.mxu0 %v319_v2  ;;  %v385_v63 = vld [vmem:[%s5261_s26 + $0x428] sm:$0xff]  ;;  %v400_v2 = vld [vmem:[%s5261_s26 + $0x4a0] sm:$0xff] }
  0x55   : > { %4116 = vmatpush3.msra.mxu1 %v351_v3  ;;  %4082 = vmatprep.subr.mxu0 %v334_v4  ;;  %v417_v0 = vld [vmem:[%s5261_s26 + $0x528] sm:$0xff]  ;;  %v432_v3 = vld [vmem:[%s5261_s26 + $0x5a0] sm:$0xff] }
  0x56   : > { %4117 = vmatprep.subr.mxu1 %v366_v5  ;;  %4083 = vmatpush3.msra.mxu0 %v318_v7  ;;  %v384_v4 = vld [vmem:[%s5261_s26 + $0x420] sm:$0xff]  ;;  %v431_v7 = vld [vmem:[%s5261_s26 + $0x598] sm:$0xff] }
  0x57   : > { %4118 = vmatpush3.msra.mxu1 %v350_v8  ;;  %4084 = vmatprep.subr.mxu0 %v333_v9  ;;  %v416_v5 = vld [vmem:[%s5261_s26 + $0x520] sm:$0xff]  ;;  %v1326_v8 = vcombine.high %v238_v1, %v238_v1  ;;  %v383_v9 = vld [vmem:[%s5261_s26 + $0x418] sm:$0xff] }
  0x58   : > { %4119 = vmatprep.subr.mxu1 %v365_v10  ;;  %4085 = vmatpush3.msra.mxu0 %v317_v12  ;;  %v415_v10 = vld [vmem:[%s5261_s26 + $0x518] sm:$0xff]  ;;  %v430_v12 = vld [vmem:[%s5261_s26 + $0x590] sm:$0xff] }
  0x59   : > { %4120 = vmatpush3.msra.mxu1 %v349_v13  ;;  %4086 = vmatprep.subr.mxu0 %v332_v14  ;;  %v1333_v13 = vrot.slane %v238_v1, %v5310_v52  ;;  %v382_v14 = vld [vmem:[%s5261_s26 + $0x410] sm:$0xff] }
  0x5a   : > { %4121 = vmatprep.subr.mxu1 %v364_v15  ;;  %4087 = vmatpush3.msra.mxu0 %v316_v17  ;;  %v414_v15 = vld [vmem:[%s5261_s26 + $0x510] sm:$0xff]  ;;  %v429_v17 = vld [vmem:[%s5261_s26 + $0x588] sm:$0xff] }
  0x5b   : > { %1832 = vmatprep.mubr.f32.mxu0 %v1324_v16  ;;  %4122 = vmatpush3.msra.mxu1 %v348_v18  ;;  %v397_v16 = vld [vmem:[%s5261_s26 + $0x488] sm:$0xff]  ;;  %v1340_v18 = vrot.slane %v1326_v8, %v5310_v52  ;;  %v498_v1 = vld [vmem:[%s5261_s26 + $0x7b0] sm:$0xff]  ;;  %v239_v8 = vld [vmem:[%s5256_s22 + $0x18] sm:$0xff] }
  0x5c   : > { %1833 = vmatmul.mubr.f32.vlgmr.msra.gmra.mxu0 %v1316_v6  ;;  %1902 = vmatprep.mubr.f32.mxu1 %v1325_v19  ;;  %v399_v6 = vld [vmem:[%s5261_s26 + $0x498] sm:$0xff]  ;;  %v381_v19 = vld [vmem:[%s5261_s26 + $0x408] sm:$0xff] }
  0x5d   : > { %4126 = vmatprep.subr.mxu0 %v411_v20  ;;  %4161 = vmatprep.subr.mxu1 %v443_v21  ;;  %v413_v20 = vld [vmem:[%s5261_s26 + $0x508] sm:$0xff]  ;;  %v396_v21 = vld [vmem:[%s5261_s26 + $0x480] sm:$0xff] }
  0x5e   : > { %1903 = vmatmul.mubr.f32.vlgmr.msra.gmra.mxu1 %v1323_v11  ;;  %4127 = vmatpush3.msra.mxu0 %v395_v22  ;;  %v398_v11 = vld [vmem:[%s5261_s26 + $0x490] sm:$0xff]  ;;  %v428_v22 = vld [vmem:[%s5261_s26 + $0x580] sm:$0xff] }
  0x5f   : > { %4162 = vmatpush3.msra.mxu1 %v427_v23  ;;  %4128 = vmatprep.subr.mxu0 %v410_v24  ;;  %v1341_v23 = vcombine.high %v1333_v13, %v1333_v13  ;;  %v380_v24 = vld [vmem:[%s5261_s26 + $0x400] sm:$0xff] }
  0x60   : > { %4163 = vmatprep.subr.mxu1 %v442_v25  ;;  %4129 = vmatpush3.msra.mxu0 %v394_v26  ;;  %v412_v25 = vld [vmem:[%s5261_s26 + $0x500] sm:$0xff]  ;;  %v1342_v26 = vcombine.high %v1340_v18, %v1340_v18 }
  0x61   : > { %4164 = vmatpush3.msra.mxu1 %v426_v27  ;;  %4130 = vmatprep.subr.mxu0 %v409_v28  ;;  %v475_v27 = vld [vmem:[%s5261_s26 + $0x6f8] sm:$0xff] }
  0x62   : > { %4165 = vmatprep.subr.mxu1 %v441_v29  ;;  %4131 = vmatpush3.msra.mxu0 %v393_v30  ;;  %v507_v28 = vld [vmem:[%s5261_s26 + $0x7f8] sm:$0xff] }
  0x63   : > { %4166 = vmatpush3.msra.mxu1 %v425_v31  ;;  %4132 = vmatprep.subr.mxu0 %v408_v32  ;;  %v459_v29 = vld [vmem:[%s5261_s26 + $0x678] sm:$0xff]  ;;  %v474_v31 = vld [vmem:[%s5261_s26 + $0x6f0] sm:$0xff] }
  0x64   : > { %4167 = vmatprep.subr.mxu1 %v440_v33  ;;  %4133 = vmatpush3.msra.mxu0 %v392_v34  ;;  %v491_v30 = vld [vmem:[%s5261_s26 + $0x778] sm:$0xff]  ;;  %v506_v32 = vld [vmem:[%s5261_s26 + $0x7f0] sm:$0xff] }
  0x65   : > { %4168 = vmatpush3.msra.mxu1 %v424_v35  ;;  %4134 = vmatprep.subr.mxu0 %v407_v36  ;;  %v458_v33 = vld [vmem:[%s5261_s26 + $0x670] sm:$0xff]  ;;  %v473_v35 = vld [vmem:[%s5261_s26 + $0x6e8] sm:$0xff] }
  0x66   : > { %4169 = vmatprep.subr.mxu1 %v439_v37  ;;  %4135 = vmatpush3.msra.mxu0 %v391_v38  ;;  %v490_v34 = vld [vmem:[%s5261_s26 + $0x770] sm:$0xff]  ;;  %v505_v36 = vld [vmem:[%s5261_s26 + $0x7e8] sm:$0xff] }
  0x67   : > { %4170 = vmatpush3.msra.mxu1 %v423_v39  ;;  %4136 = vmatprep.subr.mxu0 %v406_v40  ;;  %v457_v37 = vld [vmem:[%s5261_s26 + $0x668] sm:$0xff]  ;;  %v472_v39 = vld [vmem:[%s5261_s26 + $0x6e0] sm:$0xff] }
  0x68   : > { %4171 = vmatprep.subr.mxu1 %v438_v41  ;;  %4137 = vmatpush3.msra.mxu0 %v390_v42  ;;  %v489_v38 = vld [vmem:[%s5261_s26 + $0x768] sm:$0xff]  ;;  %v504_v40 = vld [vmem:[%s5261_s26 + $0x7e0] sm:$0xff] }
  0x69   : > { %4172 = vmatpush3.msra.mxu1 %v422_v43  ;;  %4138 = vmatprep.subr.mxu0 %v405_v44  ;;  %v456_v41 = vld [vmem:[%s5261_s26 + $0x660] sm:$0xff]  ;;  %v471_v43 = vld [vmem:[%s5261_s26 + $0x6d8] sm:$0xff] }
  0x6a   : > { %4173 = vmatprep.subr.mxu1 %v437_v45  ;;  %4139 = vmatpush3.msra.mxu0 %v389_v46  ;;  %v488_v42 = vld [vmem:[%s5261_s26 + $0x760] sm:$0xff]  ;;  %v503_v44 = vld [vmem:[%s5261_s26 + $0x7d8] sm:$0xff] }
  0x6b   : > { %4174 = vmatpush3.msra.mxu1 %v421_v47  ;;  %4140 = vmatprep.subr.mxu0 %v404_v48  ;;  %v455_v45 = vld [vmem:[%s5261_s26 + $0x658] sm:$0xff]  ;;  %v470_v47 = vld [vmem:[%s5261_s26 + $0x6d0] sm:$0xff] }
  0x6c   : > { %4175 = vmatprep.subr.mxu1 %v436_v49  ;;  %4141 = vmatpush3.msra.mxu0 %v388_v50  ;;  %v487_v46 = vld [vmem:[%s5261_s26 + $0x758] sm:$0xff]  ;;  %v502_v48 = vld [vmem:[%s5261_s26 + $0x7d0] sm:$0xff] }
  0x6d   : > { %4176 = vmatpush3.msra.mxu1 %v420_v51  ;;  %4142 = vmatprep.subr.mxu0 %v403_v53  ;;  %v454_v49 = vld [vmem:[%s5261_s26 + $0x650] sm:$0xff]  ;;  %v469_v51 = vld [vmem:[%s5261_s26 + $0x6c8] sm:$0xff] }
  0x6e   : > { %4177 = vmatprep.subr.mxu1 %v435_v54  ;;  %4143 = vmatpush3.msra.mxu0 %v387_v55  ;;  %v486_v50 = vld [vmem:[%s5261_s26 + $0x750] sm:$0xff]  ;;  %v501_v53 = vld [vmem:[%s5261_s26 + $0x7c8] sm:$0xff] }
  0x6f   : > { %4178 = vmatpush3.msra.mxu1 %v419_v56  ;;  %4144 = vmatprep.subr.mxu0 %v402_v57  ;;  %v453_v54 = vld [vmem:[%s5261_s26 + $0x648] sm:$0xff]  ;;  %v468_v56 = vld [vmem:[%s5261_s26 + $0x6c0] sm:$0xff] }
  0x70   : > { %4179 = vmatprep.subr.mxu1 %v434_v58  ;;  %4145 = vmatpush3.msra.mxu0 %v386_v59  ;;  %v485_v55 = vld [vmem:[%s5261_s26 + $0x748] sm:$0xff]  ;;  %v500_v57 = vld [vmem:[%s5261_s26 + $0x7c0] sm:$0xff] }
  0x71   : > { %4180 = vmatpush3.msra.mxu1 %v418_v60  ;;  %4146 = vmatprep.subr.mxu0 %v401_v61  ;;  %v452_v58 = vld [vmem:[%s5261_s26 + $0x640] sm:$0xff]  ;;  %v467_v60 = vld [vmem:[%s5261_s26 + $0x6b8] sm:$0xff] }
  0x72   : > { %4181 = vmatprep.subr.mxu1 %v433_v62  ;;  %4147 = vmatpush3.msra.mxu0 %v385_v63  ;;  %v484_v59 = vld [vmem:[%s5261_s26 + $0x740] sm:$0xff]  ;;  %v499_v61 = vld [vmem:[%s5261_s26 + $0x7b8] sm:$0xff] }
  0x73   : > { %4182 = vmatpush3.msra.mxu1 %v417_v0  ;;  %4148 = vmatprep.subr.mxu0 %v400_v2  ;;  %v451_v62 = vld [vmem:[%s5261_s26 + $0x638] sm:$0xff]  ;;  %v466_v0 = vld [vmem:[%s5261_s26 + $0x6b0] sm:$0xff] }
  0x74   : > { %4183 = vmatprep.subr.mxu1 %v432_v3  ;;  %4149 = vmatpush3.msra.mxu0 %v384_v4  ;;  %v483_v63 = vld [vmem:[%s5261_s26 + $0x738] sm:$0xff]  ;;  %v450_v2 = vld [vmem:[%s5261_s26 + $0x630] sm:$0xff]  ;;  %v465_v4 = vld [vmem:[%s5261_s26 + $0x6a8] sm:$0xff] }
  0x75   : > { %4184 = vmatpush3.msra.mxu1 %v416_v5  ;;  %4150 = vmatprep.subr.mxu0 %v399_v6  ;;  %v482_v3 = vld [vmem:[%s5261_s26 + $0x730] sm:$0xff]  ;;  %v497_v5 = vld [vmem:[%s5261_s26 + $0x7a8] sm:$0xff] }
  0x76   : > { %4185 = vmatprep.subr.mxu1 %v431_v7  ;;  %4151 = vmatpush3.msra.mxu0 %v383_v9  ;;  %v449_v6 = vld [vmem:[%s5261_s26 + $0x628] sm:$0xff]  ;;  %v464_v9 = vld [vmem:[%s5261_s26 + $0x6a0] sm:$0xff] }
  0x77   : > { %4186 = vmatpush3.msra.mxu1 %v415_v10  ;;  %4152 = vmatprep.subr.mxu0 %v398_v11  ;;  %v481_v7 = vld [vmem:[%s5261_s26 + $0x728] sm:$0xff]  ;;  %v496_v10 = vld [vmem:[%s5261_s26 + $0x7a0] sm:$0xff] }
  0x78   : > { %4187 = vmatprep.subr.mxu1 %v430_v12  ;;  %4153 = vmatpush3.msra.mxu0 %v382_v14  ;;  %v448_v11 = vld [vmem:[%s5261_s26 + $0x620] sm:$0xff]  ;;  %v495_v14 = vld [vmem:[%s5261_s26 + $0x798] sm:$0xff] }
  0x79   : > { %4188 = vmatpush3.msra.mxu1 %v414_v15  ;;  %4154 = vmatprep.subr.mxu0 %v397_v16  ;;  %v480_v12 = vld [vmem:[%s5261_s26 + $0x720] sm:$0xff]  ;;  %v1343_v15 = vcombine.high %v239_v8, %v239_v8  ;;  %v447_v16 = vld [vmem:[%s5261_s26 + $0x618] sm:$0xff] }
  0x7a   : > { %4189 = vmatprep.subr.mxu1 %v429_v17  ;;  %4155 = vmatpush3.msra.mxu0 %v381_v19  ;;  %v479_v17 = vld [vmem:[%s5261_s26 + $0x718] sm:$0xff]  ;;  %v494_v19 = vld [vmem:[%s5261_s26 + $0x790] sm:$0xff] }
  0x7b   : > { %4190 = vmatpush3.msra.mxu1 %v413_v20  ;;  %4156 = vmatprep.subr.mxu0 %v396_v21  ;;  %v1350_v20 = vrot.slane %v239_v8, %v5310_v52  ;;  %v446_v21 = vld [vmem:[%s5261_s26 + $0x610] sm:$0xff] }
  0x7c   : > { %4191 = vmatprep.subr.mxu1 %v428_v22  ;;  %4157 = vmatpush3.msra.mxu0 %v380_v24  ;;  %v478_v22 = vld [vmem:[%s5261_s26 + $0x710] sm:$0xff]  ;;  %v493_v24 = vld [vmem:[%s5261_s26 + $0x788] sm:$0xff] }
  0x7d   : > { %1972 = vmatprep.mubr.f32.mxu0 %v1341_v23  ;;  %4192 = vmatpush3.msra.mxu1 %v412_v25  ;;  %v461_v23 = vld [vmem:[%s5261_s26 + $0x688] sm:$0xff]  ;;  %v1357_v25 = vrot.slane %v1343_v15, %v5310_v52  ;;  %v562_v8 = vld [vmem:[%s5261_s26 + $0x9b0] sm:$0xff]  ;;  %v240_v15 = vld [vmem:[%s5256_s22 + $0x20] sm:$0xff] }
  0x7e   : > { %1973 = vmatmul.mubr.f32.vlgmr.msra.gmra.mxu0 %v1333_v13  ;;  %2042 = vmatprep.mubr.f32.mxu1 %v1342_v26  ;;  %v463_v13 = vld [vmem:[%s5261_s26 + $0x698] sm:$0xff]  ;;  %v445_v26 = vld [vmem:[%s5261_s26 + $0x608] sm:$0xff] }
  0x7f   : > { %4196 = vmatprep.subr.mxu0 %v475_v27  ;;  %4231 = vmatprep.subr.mxu1 %v507_v28  ;;  %v477_v27 = vld [vmem:[%s5261_s26 + $0x708] sm:$0xff]  ;;  %v460_v28 = vld [vmem:[%s5261_s26 + $0x680] sm:$0xff] }
  0x80   : > { %2043 = vmatmul.mubr.f32.vlgmr.msra.gmra.mxu1 %v1340_v18  ;;  %4197 = vmatpush3.msra.mxu0 %v459_v29  ;;  %v462_v18 = vld [vmem:[%s5261_s26 + $0x690] sm:$0xff]  ;;  %v492_v29 = vld [vmem:[%s5261_s26 + $0x780] sm:$0xff] }
  0x81   : > { %4232 = vmatpush3.msra.mxu1 %v491_v30  ;;  %4198 = vmatprep.subr.mxu0 %v474_v31  ;;  %v1358_v30 = vcombine.high %v1350_v20, %v1350_v20  ;;  %v444_v31 = vld [vmem:[%s5261_s26 + $0x600] sm:$0xff] }
  0x82   : > { %4233 = vmatprep.subr.mxu1 %v506_v32  ;;  %4199 = vmatpush3.msra.mxu0 %v458_v33  ;;  %v476_v32 = vld [vmem:[%s5261_s26 + $0x700] sm:$0xff]  ;;  %v1359_v33 = vcombine.high %v1357_v25, %v1357_v25 }
  0x83   : > { %4234 = vmatpush3.msra.mxu1 %v490_v34  ;;  %4200 = vmatprep.subr.mxu0 %v473_v35  ;;  %v539_v34 = vld [vmem:[%s5261_s26 + $0x8f8] sm:$0xff] }
  0x84   : > { %4235 = vmatprep.subr.mxu1 %v505_v36  ;;  %4201 = vmatpush3.msra.mxu0 %v457_v37  ;;  %v571_v35 = vld [vmem:[%s5261_s26 + $0x9f8] sm:$0xff] }
  0x85   : > { %4236 = vmatpush3.msra.mxu1 %v489_v38  ;;  %4202 = vmatprep.subr.mxu0 %v472_v39  ;;  %v523_v36 = vld [vmem:[%s5261_s26 + $0x878] sm:$0xff]  ;;  %v538_v38 = vld [vmem:[%s5261_s26 + $0x8f0] sm:$0xff] }
  0x86   : > { %4237 = vmatprep.subr.mxu1 %v504_v40  ;;  %4203 = vmatpush3.msra.mxu0 %v456_v41  ;;  %v555_v37 = vld [vmem:[%s5261_s26 + $0x978] sm:$0xff]  ;;  %v570_v39 = vld [vmem:[%s5261_s26 + $0x9f0] sm:$0xff] }
  0x87   : > { %4238 = vmatpush3.msra.mxu1 %v488_v42  ;;  %4204 = vmatprep.subr.mxu0 %v471_v43  ;;  %v522_v40 = vld [vmem:[%s5261_s26 + $0x870] sm:$0xff]  ;;  %v537_v42 = vld [vmem:[%s5261_s26 + $0x8e8] sm:$0xff] }
  0x88   : > { %4239 = vmatprep.subr.mxu1 %v503_v44  ;;  %4205 = vmatpush3.msra.mxu0 %v455_v45  ;;  %v554_v41 = vld [vmem:[%s5261_s26 + $0x970] sm:$0xff]  ;;  %v569_v43 = vld [vmem:[%s5261_s26 + $0x9e8] sm:$0xff] }
  0x89   : > { %4240 = vmatpush3.msra.mxu1 %v487_v46  ;;  %4206 = vmatprep.subr.mxu0 %v470_v47  ;;  %v521_v44 = vld [vmem:[%s5261_s26 + $0x868] sm:$0xff]  ;;  %v536_v46 = vld [vmem:[%s5261_s26 + $0x8e0] sm:$0xff] }
  0x8a   : > { %4241 = vmatprep.subr.mxu1 %v502_v48  ;;  %4207 = vmatpush3.msra.mxu0 %v454_v49  ;;  %v553_v45 = vld [vmem:[%s5261_s26 + $0x968] sm:$0xff]  ;;  %v568_v47 = vld [vmem:[%s5261_s26 + $0x9e0] sm:$0xff] }
  0x8b   : > { %4242 = vmatpush3.msra.mxu1 %v486_v50  ;;  %4208 = vmatprep.subr.mxu0 %v469_v51  ;;  %v520_v48 = vld [vmem:[%s5261_s26 + $0x860] sm:$0xff]  ;;  %v535_v50 = vld [vmem:[%s5261_s26 + $0x8d8] sm:$0xff] }
  0x8c   : > { %4243 = vmatprep.subr.mxu1 %v501_v53  ;;  %4209 = vmatpush3.msra.mxu0 %v453_v54  ;;  %v552_v49 = vld [vmem:[%s5261_s26 + $0x960] sm:$0xff]  ;;  %v567_v51 = vld [vmem:[%s5261_s26 + $0x9d8] sm:$0xff] }
  0x8d   : > { %4244 = vmatpush3.msra.mxu1 %v485_v55  ;;  %4210 = vmatprep.subr.mxu0 %v468_v56  ;;  %v519_v53 = vld [vmem:[%s5261_s26 + $0x858] sm:$0xff]  ;;  %v534_v55 = vld [vmem:[%s5261_s26 + $0x8d0] sm:$0xff] }
  0x8e   : > { %4245 = vmatprep.subr.mxu1 %v500_v57  ;;  %4211 = vmatpush3.msra.mxu0 %v452_v58  ;;  %v551_v54 = vld [vmem:[%s5261_s26 + $0x958] sm:$0xff]  ;;  %v566_v56 = vld [vmem:[%s5261_s26 + $0x9d0] sm:$0xff] }
  0x8f   : > { %4246 = vmatpush3.msra.mxu1 %v484_v59  ;;  %4212 = vmatprep.subr.mxu0 %v467_v60  ;;  %v518_v57 = vld [vmem:[%s5261_s26 + $0x850] sm:$0xff]  ;;  %v533_v59 = vld [vmem:[%s5261_s26 + $0x8c8] sm:$0xff] }
  0x90   : > { %4247 = vmatprep.subr.mxu1 %v499_v61  ;;  %4213 = vmatpush3.msra.mxu0 %v451_v62  ;;  %v550_v58 = vld [vmem:[%s5261_s26 + $0x950] sm:$0xff]  ;;  %v565_v60 = vld [vmem:[%s5261_s26 + $0x9c8] sm:$0xff] }
  0x91   : > { %4248 = vmatpush3.msra.mxu1 %v483_v63  ;;  %4214 = vmatprep.subr.mxu0 %v466_v0  ;;  %v517_v61 = vld [vmem:[%s5261_s26 + $0x848] sm:$0xff]  ;;  %v532_v63 = vld [vmem:[%s5261_s26 + $0x8c0] sm:$0xff] }
  0x92   : > { %4249 = vmatprep.subr.mxu1 %v498_v1  ;;  %4215 = vmatpush3.msra.mxu0 %v450_v2  ;;  %v549_v62 = vld [vmem:[%s5261_s26 + $0x948] sm:$0xff]  ;;  %v564_v0 = vld [vmem:[%s5261_s26 + $0x9c0] sm:$0xff] }
  0x93   : > { %4250 = vmatpush3.msra.mxu1 %v482_v3  ;;  %4216 = vmatprep.subr.mxu0 %v465_v4  ;;  %v516_v1 = vld [vmem:[%s5261_s26 + $0x840] sm:$0xff]  ;;  %v531_v3 = vld [vmem:[%s5261_s26 + $0x8b8] sm:$0xff] }
  0x94   : > { %4251 = vmatprep.subr.mxu1 %v497_v5  ;;  %4217 = vmatpush3.msra.mxu0 %v449_v6  ;;  %v548_v2 = vld [vmem:[%s5261_s26 + $0x940] sm:$0xff]  ;;  %v563_v4 = vld [vmem:[%s5261_s26 + $0x9b8] sm:$0xff] }
  0x95   : > { %4252 = vmatpush3.msra.mxu1 %v481_v7  ;;  %4218 = vmatprep.subr.mxu0 %v464_v9  ;;  %v515_v5 = vld [vmem:[%s5261_s26 + $0x838] sm:$0xff]  ;;  %v530_v7 = vld [vmem:[%s5261_s26 + $0x8b0] sm:$0xff] }
  0x96   : > { %4253 = vmatprep.subr.mxu1 %v496_v10  ;;  %4219 = vmatpush3.msra.mxu0 %v448_v11  ;;  %v547_v6 = vld [vmem:[%s5261_s26 + $0x938] sm:$0xff]  ;;  %v514_v9 = vld [vmem:[%s5261_s26 + $0x830] sm:$0xff]  ;;  %v529_v11 = vld [vmem:[%s5261_s26 + $0x8a8] sm:$0xff] }
  0x97   : > { %4254 = vmatpush3.msra.mxu1 %v480_v12  ;;  %4220 = vmatprep.subr.mxu0 %v463_v13  ;;  %v546_v10 = vld [vmem:[%s5261_s26 + $0x930] sm:$0xff]  ;;  %v561_v12 = vld [vmem:[%s5261_s26 + $0x9a8] sm:$0xff] }
  0x98   : > { %4255 = vmatprep.subr.mxu1 %v495_v14  ;;  %4221 = vmatpush3.msra.mxu0 %v447_v16  ;;  %v513_v13 = vld [vmem:[%s5261_s26 + $0x828] sm:$0xff]  ;;  %v528_v16 = vld [vmem:[%s5261_s26 + $0x8a0] sm:$0xff] }
  0x99   : > { %4256 = vmatpush3.msra.mxu1 %v479_v17  ;;  %4222 = vmatprep.subr.mxu0 %v462_v18  ;;  %v545_v14 = vld [vmem:[%s5261_s26 + $0x928] sm:$0xff]  ;;  %v560_v17 = vld [vmem:[%s5261_s26 + $0x9a0] sm:$0xff] }
  0x9a   : > { %4257 = vmatprep.subr.mxu1 %v494_v19  ;;  %4223 = vmatpush3.msra.mxu0 %v446_v21  ;;  %v512_v18 = vld [vmem:[%s5261_s26 + $0x820] sm:$0xff]  ;;  %v559_v21 = vld [vmem:[%s5261_s26 + $0x998] sm:$0xff] }
  0x9b   : > { %4258 = vmatpush3.msra.mxu1 %v478_v22  ;;  %4224 = vmatprep.subr.mxu0 %v461_v23  ;;  %v544_v19 = vld [vmem:[%s5261_s26 + $0x920] sm:$0xff]  ;;  %v1360_v22 = vcombine.high %v240_v15, %v240_v15  ;;  %v511_v23 = vld [vmem:[%s5261_s26 + $0x818] sm:$0xff] }
  0x9c   : > { %4259 = vmatprep.subr.mxu1 %v493_v24  ;;  %4225 = vmatpush3.msra.mxu0 %v445_v26  ;;  %v543_v24 = vld [vmem:[%s5261_s26 + $0x918] sm:$0xff]  ;;  %v558_v26 = vld [vmem:[%s5261_s26 + $0x990] sm:$0xff] }
  0x9d   : > { %4260 = vmatpush3.msra.mxu1 %v477_v27  ;;  %4226 = vmatprep.subr.mxu0 %v460_v28  ;;  %v1367_v27 = vrot.slane %v240_v15, %v5310_v52  ;;  %v510_v28 = vld [vmem:[%s5261_s26 + $0x810] sm:$0xff] }
  0x9e   : > { %4261 = vmatprep.subr.mxu1 %v492_v29  ;;  %4227 = vmatpush3.msra.mxu0 %v444_v31  ;;  %v542_v29 = vld [vmem:[%s5261_s26 + $0x910] sm:$0xff]  ;;  %v557_v31 = vld [vmem:[%s5261_s26 + $0x988] sm:$0xff] }
  0x9f   : > { %2112 = vmatprep.mubr.f32.mxu0 %v1358_v30  ;;  %4262 = vmatpush3.msra.mxu1 %v476_v32  ;;  %v525_v30 = vld [vmem:[%s5261_s26 + $0x888] sm:$0xff]  ;;  %v1374_v32 = vrot.slane %v1360_v22, %v5310_v52  ;;  %v626_v15 = vld [vmem:[%s5261_s26 + $0xbb0] sm:$0xff] }
  0xa0   : > { %2113 = vmatmul.mubr.f32.vlgmr.msra.gmra.mxu0 %v1350_v20  ;;  %2182 = vmatprep.mubr.f32.mxu1 %v1359_v33  ;;  %v527_v20 = vld [vmem:[%s5261_s26 + $0x898] sm:$0xff]  ;;  %v509_v33 = vld [vmem:[%s5261_s26 + $0x808] sm:$0xff] }
  0xa1   : > { %4266 = vmatprep.subr.mxu0 %v539_v34  ;;  %4301 = vmatprep.subr.mxu1 %v571_v35  ;;  %v541_v34 = vld [vmem:[%s5261_s26 + $0x908] sm:$0xff]  ;;  %v524_v35 = vld [vmem:[%s5261_s26 + $0x880] sm:$0xff] }
  0xa2   : > { %2183 = vmatmul.mubr.f32.vlgmr.msra.gmra.mxu1 %v1357_v25  ;;  %4267 = vmatpush3.msra.mxu0 %v523_v36  ;;  %v526_v25 = vld [vmem:[%s5261_s26 + $0x890] sm:$0xff]  ;;  %v556_v36 = vld [vmem:[%s5261_s26 + $0x980] sm:$0xff]  ;;  %v241_v22 = vld [vmem:[%s5256_s22 + $0x28] sm:$0xff] }
  0xa3   : > { %4302 = vmatpush3.msra.mxu1 %v555_v37  ;;  %4268 = vmatprep.subr.mxu0 %v538_v38  ;;  %v1375_v37 = vcombine.high %v1367_v27, %v1367_v27  ;;  %v508_v38 = vld [vmem:[%s5261_s26 + $0x800] sm:$0xff] }
  0xa4   : > { %4303 = vmatprep.subr.mxu1 %v570_v39  ;;  %4269 = vmatpush3.msra.mxu0 %v522_v40  ;;  %v540_v39 = vld [vmem:[%s5261_s26 + $0x900] sm:$0xff]  ;;  %v1376_v40 = vcombine.high %v1374_v32, %v1374_v32 }
  0xa5   : > { %4304 = vmatpush3.msra.mxu1 %v554_v41  ;;  %4270 = vmatprep.subr.mxu0 %v537_v42  ;;  %v603_v41 = vld [vmem:[%s5261_s26 + $0xaf8] sm:$0xff] }
  0xa6   : > { %4305 = vmatprep.subr.mxu1 %v569_v43  ;;  %4271 = vmatpush3.msra.mxu0 %v521_v44  ;;  %v635_v42 = vld [vmem:[%s5261_s26 + $0xbf8] sm:$0xff] }
  0xa7   : > { %4306 = vmatpush3.msra.mxu1 %v553_v45  ;;  %4272 = vmatprep.subr.mxu0 %v536_v46  ;;  %v587_v43 = vld [vmem:[%s5261_s26 + $0xa78] sm:$0xff]  ;;  %v602_v45 = vld [vmem:[%s5261_s26 + $0xaf0] sm:$0xff] }
  0xa8   : > { %4307 = vmatprep.subr.mxu1 %v568_v47  ;;  %4273 = vmatpush3.msra.mxu0 %v520_v48  ;;  %v619_v44 = vld [vmem:[%s5261_s26 + $0xb78] sm:$0xff]  ;;  %v634_v46 = vld [vmem:[%s5261_s26 + $0xbf0] sm:$0xff] }
  0xa9   : > { %4308 = vmatpush3.msra.mxu1 %v552_v49  ;;  %4274 = vmatprep.subr.mxu0 %v535_v50  ;;  %v586_v47 = vld [vmem:[%s5261_s26 + $0xa70] sm:$0xff]  ;;  %v601_v49 = vld [vmem:[%s5261_s26 + $0xae8] sm:$0xff] }
  0xaa   : > { %4309 = vmatprep.subr.mxu1 %v567_v51  ;;  %4275 = vmatpush3.msra.mxu0 %v519_v53  ;;  %v618_v48 = vld [vmem:[%s5261_s26 + $0xb70] sm:$0xff]  ;;  %v633_v50 = vld [vmem:[%s5261_s26 + $0xbe8] sm:$0xff] }
  0xab   : > { %4310 = vmatpush3.msra.mxu1 %v551_v54  ;;  %4276 = vmatprep.subr.mxu0 %v534_v55  ;;  %v585_v51 = vld [vmem:[%s5261_s26 + $0xa68] sm:$0xff]  ;;  %v600_v54 = vld [vmem:[%s5261_s26 + $0xae0] sm:$0xff] }
  0xac   : > { %4311 = vmatprep.subr.mxu1 %v566_v56  ;;  %4277 = vmatpush3.msra.mxu0 %v518_v57  ;;  %v617_v53 = vld [vmem:[%s5261_s26 + $0xb68] sm:$0xff]  ;;  %v632_v55 = vld [vmem:[%s5261_s26 + $0xbe0] sm:$0xff] }
  0xad   : > { %4312 = vmatpush3.msra.mxu1 %v550_v58  ;;  %4278 = vmatprep.subr.mxu0 %v533_v59  ;;  %v584_v56 = vld [vmem:[%s5261_s26 + $0xa60] sm:$0xff]  ;;  %v599_v58 = vld [vmem:[%s5261_s26 + $0xad8] sm:$0xff] }
  0xae   : > { %4313 = vmatprep.subr.mxu1 %v565_v60  ;;  %4279 = vmatpush3.msra.mxu0 %v517_v61  ;;  %v616_v57 = vld [vmem:[%s5261_s26 + $0xb60] sm:$0xff]  ;;  %v631_v59 = vld [vmem:[%s5261_s26 + $0xbd8] sm:$0xff] }
  0xaf   : > { %4314 = vmatpush3.msra.mxu1 %v549_v62  ;;  %4280 = vmatprep.subr.mxu0 %v532_v63  ;;  %v583_v60 = vld [vmem:[%s5261_s26 + $0xa58] sm:$0xff]  ;;  %v598_v62 = vld [vmem:[%s5261_s26 + $0xad0] sm:$0xff] }
  0xb0   : > { %4315 = vmatprep.subr.mxu1 %v564_v0  ;;  %4281 = vmatpush3.msra.mxu0 %v516_v1  ;;  %v615_v61 = vld [vmem:[%s5261_s26 + $0xb58] sm:$0xff]  ;;  %v630_v63 = vld [vmem:[%s5261_s26 + $0xbd0] sm:$0xff] }
  0xb1   : > { %4316 = vmatpush3.msra.mxu1 %v548_v2  ;;  %4282 = vmatprep.subr.mxu0 %v531_v3  ;;  %v582_v0 = vld [vmem:[%s5261_s26 + $0xa50] sm:$0xff]  ;;  %v597_v2 = vld [vmem:[%s5261_s26 + $0xac8] sm:$0xff] }
  0xb2   : > { %4317 = vmatprep.subr.mxu1 %v563_v4  ;;  %4283 = vmatpush3.msra.mxu0 %v515_v5  ;;  %v614_v1 = vld [vmem:[%s5261_s26 + $0xb50] sm:$0xff]  ;;  %v629_v3 = vld [vmem:[%s5261_s26 + $0xbc8] sm:$0xff] }
  0xb3   : > { %4318 = vmatpush3.msra.mxu1 %v547_v6  ;;  %4284 = vmatprep.subr.mxu0 %v530_v7  ;;  %v581_v4 = vld [vmem:[%s5261_s26 + $0xa48] sm:$0xff]  ;;  %v596_v6 = vld [vmem:[%s5261_s26 + $0xac0] sm:$0xff] }
  0xb4   : > { %4319 = vmatprep.subr.mxu1 %v562_v8  ;;  %4285 = vmatpush3.msra.mxu0 %v514_v9  ;;  %v613_v5 = vld [vmem:[%s5261_s26 + $0xb48] sm:$0xff]  ;;  %v628_v7 = vld [vmem:[%s5261_s26 + $0xbc0] sm:$0xff] }
  0xb5   : > { %4320 = vmatpush3.msra.mxu1 %v546_v10  ;;  %4286 = vmatprep.subr.mxu0 %v529_v11  ;;  %v580_v8 = vld [vmem:[%s5261_s26 + $0xa40] sm:$0xff]  ;;  %v595_v10 = vld [vmem:[%s5261_s26 + $0xab8] sm:$0xff] }
  0xb6   : > { %4321 = vmatprep.subr.mxu1 %v561_v12  ;;  %4287 = vmatpush3.msra.mxu0 %v513_v13  ;;  %v612_v9 = vld [vmem:[%s5261_s26 + $0xb40] sm:$0xff]  ;;  %v627_v11 = vld [vmem:[%s5261_s26 + $0xbb8] sm:$0xff] }
  0xb7   : > { %4322 = vmatpush3.msra.mxu1 %v545_v14  ;;  %4288 = vmatprep.subr.mxu0 %v528_v16  ;;  %v579_v12 = vld [vmem:[%s5261_s26 + $0xa38] sm:$0xff]  ;;  %v594_v14 = vld [vmem:[%s5261_s26 + $0xab0] sm:$0xff] }
  0xb8   : > { %4323 = vmatprep.subr.mxu1 %v560_v17  ;;  %4289 = vmatpush3.msra.mxu0 %v512_v18  ;;  %v611_v13 = vld [vmem:[%s5261_s26 + $0xb38] sm:$0xff]  ;;  %v578_v16 = vld [vmem:[%s5261_s26 + $0xa30] sm:$0xff]  ;;  %v593_v18 = vld [vmem:[%s5261_s26 + $0xaa8] sm:$0xff] }
  0xb9   : > { %4324 = vmatpush3.msra.mxu1 %v544_v19  ;;  %4290 = vmatprep.subr.mxu0 %v527_v20  ;;  %v610_v17 = vld [vmem:[%s5261_s26 + $0xb30] sm:$0xff]  ;;  %v625_v19 = vld [vmem:[%s5261_s26 + $0xba8] sm:$0xff] }
  0xba   : > { %4325 = vmatprep.subr.mxu1 %v559_v21  ;;  %4291 = vmatpush3.msra.mxu0 %v511_v23  ;;  %v577_v20 = vld [vmem:[%s5261_s26 + $0xa28] sm:$0xff]  ;;  %v592_v23 = vld [vmem:[%s5261_s26 + $0xaa0] sm:$0xff] }
  0xbb   : > { %4326 = vmatpush3.msra.mxu1 %v543_v24  ;;  %4292 = vmatprep.subr.mxu0 %v526_v25  ;;  %v609_v21 = vld [vmem:[%s5261_s26 + $0xb28] sm:$0xff]  ;;  %v624_v24 = vld [vmem:[%s5261_s26 + $0xba0] sm:$0xff] }
  0xbc   : > { %4327 = vmatprep.subr.mxu1 %v558_v26  ;;  %4293 = vmatpush3.msra.mxu0 %v510_v28  ;;  %v576_v25 = vld [vmem:[%s5261_s26 + $0xa20] sm:$0xff]  ;;  %v623_v28 = vld [vmem:[%s5261_s26 + $0xb98] sm:$0xff] }
  0xbd   : > { %4328 = vmatpush3.msra.mxu1 %v542_v29  ;;  %4294 = vmatprep.subr.mxu0 %v525_v30  ;;  %v608_v26 = vld [vmem:[%s5261_s26 + $0xb20] sm:$0xff]  ;;  %v1377_v29 = vcombine.high %v241_v22, %v241_v22  ;;  %v575_v30 = vld [vmem:[%s5261_s26 + $0xa18] sm:$0xff] }
  0xbe   : > { %4329 = vmatprep.subr.mxu1 %v557_v31  ;;  %4295 = vmatpush3.msra.mxu0 %v509_v33  ;;  %v607_v31 = vld [vmem:[%s5261_s26 + $0xb18] sm:$0xff]  ;;  %v622_v33 = vld [vmem:[%s5261_s26 + $0xb90] sm:$0xff] }
  0xbf   : > { %4330 = vmatpush3.msra.mxu1 %v541_v34  ;;  %4296 = vmatprep.subr.mxu0 %v524_v35  ;;  %v1384_v34 = vrot.slane %v241_v22, %v5310_v52  ;;  %v574_v35 = vld [vmem:[%s5261_s26 + $0xa10] sm:$0xff] }
  0xc0   : > { %4331 = vmatprep.subr.mxu1 %v556_v36  ;;  %4297 = vmatpush3.msra.mxu0 %v508_v38  ;;  %v606_v36 = vld [vmem:[%s5261_s26 + $0xb10] sm:$0xff]  ;;  %v621_v38 = vld [vmem:[%s5261_s26 + $0xb88] sm:$0xff] }
  0xc1   : > { %2252 = vmatprep.mubr.f32.mxu0 %v1375_v37  ;;  %4332 = vmatpush3.msra.mxu1 %v540_v39  ;;  %v589_v37 = vld [vmem:[%s5261_s26 + $0xa88] sm:$0xff]  ;;  %v1391_v39 = vrot.slane %v1377_v29, %v5310_v52  ;;  %v690_v22 = vld [vmem:[%s5261_s26 + $0xdb0] sm:$0xff] }
  0xc2   : > { %2253 = vmatmul.mubr.f32.vlgmr.msra.gmra.mxu0 %v1367_v27  ;;  %2322 = vmatprep.mubr.f32.mxu1 %v1376_v40  ;;  %v591_v27 = vld [vmem:[%s5261_s26 + $0xa98] sm:$0xff]  ;;  %v573_v40 = vld [vmem:[%s5261_s26 + $0xa08] sm:$0xff]  ;;  %v242_v29 = vld [vmem:[%s5256_s22 + $0x30] sm:$0xff] }
  0xc3   : > { %4336 = vmatprep.subr.mxu0 %v603_v41  ;;  %4371 = vmatprep.subr.mxu1 %v635_v42  ;;  %v605_v41 = vld [vmem:[%s5261_s26 + $0xb08] sm:$0xff]  ;;  %v588_v42 = vld [vmem:[%s5261_s26 + $0xa80] sm:$0xff] }
  0xc4   : > { %2323 = vmatmul.mubr.f32.vlgmr.msra.gmra.mxu1 %v1374_v32  ;;  %4337 = vmatpush3.msra.mxu0 %v587_v43  ;;  %v590_v32 = vld [vmem:[%s5261_s26 + $0xa90] sm:$0xff]  ;;  %v620_v43 = vld [vmem:[%s5261_s26 + $0xb80] sm:$0xff] }
  0xc5   : > { %4372 = vmatpush3.msra.mxu1 %v619_v44  ;;  %4338 = vmatprep.subr.mxu0 %v602_v45  ;;  %v1392_v44 = vcombine.high %v1384_v34, %v1384_v34  ;;  %v572_v45 = vld [vmem:[%s5261_s26 + $0xa00] sm:$0xff] }
  0xc6   : > { %4373 = vmatprep.subr.mxu1 %v634_v46  ;;  %4339 = vmatpush3.msra.mxu0 %v586_v47  ;;  %v604_v46 = vld [vmem:[%s5261_s26 + $0xb00] sm:$0xff]  ;;  %v1393_v47 = vcombine.high %v1391_v39, %v1391_v39 }
  0xc7   : > { %4374 = vmatpush3.msra.mxu1 %v618_v48  ;;  %4340 = vmatprep.subr.mxu0 %v601_v49  ;;  %v667_v48 = vld [vmem:[%s5261_s26 + $0xcf8] sm:$0xff] }
  0xc8   : > { %4375 = vmatprep.subr.mxu1 %v633_v50  ;;  %4341 = vmatpush3.msra.mxu0 %v585_v51  ;;  %v699_v49 = vld [vmem:[%s5261_s26 + $0xdf8] sm:$0xff] }
  0xc9   : > { %4376 = vmatpush3.msra.mxu1 %v617_v53  ;;  %4342 = vmatprep.subr.mxu0 %v600_v54  ;;  %v651_v50 = vld [vmem:[%s5261_s26 + $0xc78] sm:$0xff]  ;;  %v666_v53 = vld [vmem:[%s5261_s26 + $0xcf0] sm:$0xff] }
  0xca   : > { %4377 = vmatprep.subr.mxu1 %v632_v55  ;;  %4343 = vmatpush3.msra.mxu0 %v584_v56  ;;  %v683_v51 = vld [vmem:[%s5261_s26 + $0xd78] sm:$0xff]  ;;  %v698_v54 = vld [vmem:[%s5261_s26 + $0xdf0] sm:$0xff] }
  0xcb   : > { %4378 = vmatpush3.msra.mxu1 %v616_v57  ;;  %4344 = vmatprep.subr.mxu0 %v599_v58  ;;  %v650_v55 = vld [vmem:[%s5261_s26 + $0xc70] sm:$0xff]  ;;  %v665_v57 = vld [vmem:[%s5261_s26 + $0xce8] sm:$0xff] }
  0xcc   : > { %4379 = vmatprep.subr.mxu1 %v631_v59  ;;  %4345 = vmatpush3.msra.mxu0 %v583_v60  ;;  %v682_v56 = vld [vmem:[%s5261_s26 + $0xd70] sm:$0xff]  ;;  %v697_v58 = vld [vmem:[%s5261_s26 + $0xde8] sm:$0xff] }
  0xcd   : > { %4380 = vmatpush3.msra.mxu1 %v615_v61  ;;  %4346 = vmatprep.subr.mxu0 %v598_v62  ;;  %v649_v59 = vld [vmem:[%s5261_s26 + $0xc68] sm:$0xff]  ;;  %v664_v61 = vld [vmem:[%s5261_s26 + $0xce0] sm:$0xff] }
  0xce   : > { %4381 = vmatprep.subr.mxu1 %v630_v63  ;;  %4347 = vmatpush3.msra.mxu0 %v582_v0  ;;  %v681_v60 = vld [vmem:[%s5261_s26 + $0xd68] sm:$0xff]  ;;  %v696_v62 = vld [vmem:[%s5261_s26 + $0xde0] sm:$0xff] }
  0xcf   : > { %4382 = vmatpush3.msra.mxu1 %v614_v1  ;;  %4348 = vmatprep.subr.mxu0 %v597_v2  ;;  %v648_v63 = vld [vmem:[%s5261_s26 + $0xc60] sm:$0xff]  ;;  %v663_v1 = vld [vmem:[%s5261_s26 + $0xcd8] sm:$0xff] }
  0xd0   : > { %4383 = vmatprep.subr.mxu1 %v629_v3  ;;  %4349 = vmatpush3.msra.mxu0 %v581_v4  ;;  %v680_v0 = vld [vmem:[%s5261_s26 + $0xd60] sm:$0xff]  ;;  %v695_v2 = vld [vmem:[%s5261_s26 + $0xdd8] sm:$0xff] }
  0xd1   : > { %4384 = vmatpush3.msra.mxu1 %v613_v5  ;;  %4350 = vmatprep.subr.mxu0 %v596_v6  ;;  %v647_v3 = vld [vmem:[%s5261_s26 + $0xc58] sm:$0xff]  ;;  %v662_v5 = vld [vmem:[%s5261_s26 + $0xcd0] sm:$0xff] }
  0xd2   : > { %4385 = vmatprep.subr.mxu1 %v628_v7  ;;  %4351 = vmatpush3.msra.mxu0 %v580_v8  ;;  %v679_v4 = vld [vmem:[%s5261_s26 + $0xd58] sm:$0xff]  ;;  %v694_v6 = vld [vmem:[%s5261_s26 + $0xdd0] sm:$0xff] }
  0xd3   : > { %4386 = vmatpush3.msra.mxu1 %v612_v9  ;;  %4352 = vmatprep.subr.mxu0 %v595_v10  ;;  %v646_v7 = vld [vmem:[%s5261_s26 + $0xc50] sm:$0xff]  ;;  %v661_v9 = vld [vmem:[%s5261_s26 + $0xcc8] sm:$0xff] }
  0xd4   : > { %4387 = vmatprep.subr.mxu1 %v627_v11  ;;  %4353 = vmatpush3.msra.mxu0 %v579_v12  ;;  %v678_v8 = vld [vmem:[%s5261_s26 + $0xd50] sm:$0xff]  ;;  %v693_v10 = vld [vmem:[%s5261_s26 + $0xdc8] sm:$0xff] }
  0xd5   : > { %4388 = vmatpush3.msra.mxu1 %v611_v13  ;;  %4354 = vmatprep.subr.mxu0 %v594_v14  ;;  %v645_v11 = vld [vmem:[%s5261_s26 + $0xc48] sm:$0xff]  ;;  %v660_v13 = vld [vmem:[%s5261_s26 + $0xcc0] sm:$0xff] }
  0xd6   : > { %4389 = vmatprep.subr.mxu1 %v626_v15  ;;  %4355 = vmatpush3.msra.mxu0 %v578_v16  ;;  %v677_v12 = vld [vmem:[%s5261_s26 + $0xd48] sm:$0xff]  ;;  %v692_v14 = vld [vmem:[%s5261_s26 + $0xdc0] sm:$0xff] }
  0xd7   : > { %4390 = vmatpush3.msra.mxu1 %v610_v17  ;;  %4356 = vmatprep.subr.mxu0 %v593_v18  ;;  %v644_v15 = vld [vmem:[%s5261_s26 + $0xc40] sm:$0xff]  ;;  %v659_v17 = vld [vmem:[%s5261_s26 + $0xcb8] sm:$0xff] }
  0xd8   : > { %4391 = vmatprep.subr.mxu1 %v625_v19  ;;  %4357 = vmatpush3.msra.mxu0 %v577_v20  ;;  %v676_v16 = vld [vmem:[%s5261_s26 + $0xd40] sm:$0xff]  ;;  %v691_v18 = vld [vmem:[%s5261_s26 + $0xdb8] sm:$0xff] }
  0xd9   : > { %4392 = vmatpush3.msra.mxu1 %v609_v21  ;;  %4358 = vmatprep.subr.mxu0 %v592_v23  ;;  %v643_v19 = vld [vmem:[%s5261_s26 + $0xc38] sm:$0xff]  ;;  %v658_v21 = vld [vmem:[%s5261_s26 + $0xcb0] sm:$0xff] }
  0xda   : > { %4393 = vmatprep.subr.mxu1 %v624_v24  ;;  %4359 = vmatpush3.msra.mxu0 %v576_v25  ;;  %v675_v20 = vld [vmem:[%s5261_s26 + $0xd38] sm:$0xff]  ;;  %v642_v23 = vld [vmem:[%s5261_s26 + $0xc30] sm:$0xff]  ;;  %v657_v25 = vld [vmem:[%s5261_s26 + $0xca8] sm:$0xff] }
  0xdb   : > { %4394 = vmatpush3.msra.mxu1 %v608_v26  ;;  %4360 = vmatprep.subr.mxu0 %v591_v27  ;;  %v674_v24 = vld [vmem:[%s5261_s26 + $0xd30] sm:$0xff]  ;;  %v689_v26 = vld [vmem:[%s5261_s26 + $0xda8] sm:$0xff] }
  0xdc   : > { %4395 = vmatprep.subr.mxu1 %v623_v28  ;;  %4361 = vmatpush3.msra.mxu0 %v575_v30  ;;  %v641_v27 = vld [vmem:[%s5261_s26 + $0xc28] sm:$0xff]  ;;  %v656_v30 = vld [vmem:[%s5261_s26 + $0xca0] sm:$0xff] }
  0xdd   : > { %4396 = vmatpush3.msra.mxu1 %v607_v31  ;;  %4362 = vmatprep.subr.mxu0 %v590_v32  ;;  %v673_v28 = vld [vmem:[%s5261_s26 + $0xd28] sm:$0xff]  ;;  %v688_v31 = vld [vmem:[%s5261_s26 + $0xda0] sm:$0xff] }
  0xde   : > { %4397 = vmatprep.subr.mxu1 %v622_v33  ;;  %4363 = vmatpush3.msra.mxu0 %v574_v35  ;;  %v640_v32 = vld [vmem:[%s5261_s26 + $0xc20] sm:$0xff]  ;;  %v687_v35 = vld [vmem:[%s5261_s26 + $0xd98] sm:$0xff] }
  0xdf   : > { %4398 = vmatpush3.msra.mxu1 %v606_v36  ;;  %4364 = vmatprep.subr.mxu0 %v589_v37  ;;  %v672_v33 = vld [vmem:[%s5261_s26 + $0xd20] sm:$0xff]  ;;  %v1394_v36 = vcombine.high %v242_v29, %v242_v29  ;;  %v639_v37 = vld [vmem:[%s5261_s26 + $0xc18] sm:$0xff] }
  0xe0   : > { %4399 = vmatprep.subr.mxu1 %v621_v38  ;;  %4365 = vmatpush3.msra.mxu0 %v573_v40  ;;  %v671_v38 = vld [vmem:[%s5261_s26 + $0xd18] sm:$0xff]  ;;  %v686_v40 = vld [vmem:[%s5261_s26 + $0xd90] sm:$0xff] }
  0xe1   : > { %4400 = vmatpush3.msra.mxu1 %v605_v41  ;;  %4366 = vmatprep.subr.mxu0 %v588_v42  ;;  %v1401_v41 = vrot.slane %v242_v29, %v5310_v52  ;;  %v638_v42 = vld [vmem:[%s5261_s26 + $0xc10] sm:$0xff] }
  0xe2   : > { %4401 = vmatprep.subr.mxu1 %v620_v43  ;;  %4367 = vmatpush3.msra.mxu0 %v572_v45  ;;  %v670_v43 = vld [vmem:[%s5261_s26 + $0xd10] sm:$0xff]  ;;  %v685_v45 = vld [vmem:[%s5261_s26 + $0xd88] sm:$0xff] }
  0xe3   : > { %2392 = vmatprep.mubr.f32.mxu0 %v1392_v44  ;;  %4402 = vmatpush3.msra.mxu1 %v604_v46  ;;  %v653_v44 = vld [vmem:[%s5261_s26 + $0xc88] sm:$0xff]  ;;  %v1408_v46 = vrot.slane %v1394_v36, %v5310_v52  ;;  %v754_v29 = vld [vmem:[%s5261_s26 + $0xfb0] sm:$0xff]  ;;  %v243_v36 = vld [vmem:[%s5256_s22 + $0x38] sm:$0xff] }
  0xe4   : > { %2393 = vmatmul.mubr.f32.vlgmr.msra.gmra.mxu0 %v1384_v34  ;;  %2462 = vmatprep.mubr.f32.mxu1 %v1393_v47  ;;  %v655_v34 = vld [vmem:[%s5261_s26 + $0xc98] sm:$0xff]  ;;  %v637_v47 = vld [vmem:[%s5261_s26 + $0xc08] sm:$0xff] }
  0xe5   : > { %4406 = vmatprep.subr.mxu0 %v667_v48  ;;  %4441 = vmatprep.subr.mxu1 %v699_v49  ;;  %v669_v48 = vld [vmem:[%s5261_s26 + $0xd08] sm:$0xff]  ;;  %v652_v49 = vld [vmem:[%s5261_s26 + $0xc80] sm:$0xff] }
  0xe6   : > { %2463 = vmatmul.mubr.f32.vlgmr.msra.gmra.mxu1 %v1391_v39  ;;  %4407 = vmatpush3.msra.mxu0 %v651_v50  ;;  %v654_v39 = vld [vmem:[%s5261_s26 + $0xc90] sm:$0xff]  ;;  %v684_v50 = vld [vmem:[%s5261_s26 + $0xd80] sm:$0xff] }
  0xe7   : > { %4442 = vmatpush3.msra.mxu1 %v683_v51  ;;  %4408 = vmatprep.subr.mxu0 %v666_v53  ;;  %v1409_v51 = vcombine.high %v1401_v41, %v1401_v41  ;;  %v636_v53 = vld [vmem:[%s5261_s26 + $0xc00] sm:$0xff] }
  0xe8   : > { %4443 = vmatprep.subr.mxu1 %v698_v54  ;;  %4409 = vmatpush3.msra.mxu0 %v650_v55  ;;  %v668_v54 = vld [vmem:[%s5261_s26 + $0xd00] sm:$0xff]  ;;  %v1410_v55 = vcombine.high %v1408_v46, %v1408_v46 }
  0xe9   : > { %4444 = vmatpush3.msra.mxu1 %v682_v56  ;;  %4410 = vmatprep.subr.mxu0 %v665_v57  ;;  %v731_v56 = vld [vmem:[%s5261_s26 + $0xef8] sm:$0xff] }
  0xea   : > { %4445 = vmatprep.subr.mxu1 %v697_v58  ;;  %4411 = vmatpush3.msra.mxu0 %v649_v59  ;;  %v763_v57 = vld [vmem:[%s5261_s26 + $0xff8] sm:$0xff] }
  0xeb   : > { %4446 = vmatpush3.msra.mxu1 %v681_v60  ;;  %4412 = vmatprep.subr.mxu0 %v664_v61  ;;  %v715_v58 = vld [vmem:[%s5261_s26 + $0xe78] sm:$0xff]  ;;  %v730_v60 = vld [vmem:[%s5261_s26 + $0xef0] sm:$0xff] }
  0xec   : > { %4447 = vmatprep.subr.mxu1 %v696_v62  ;;  %4413 = vmatpush3.msra.mxu0 %v648_v63  ;;  %v747_v59 = vld [vmem:[%s5261_s26 + $0xf78] sm:$0xff]  ;;  %v762_v61 = vld [vmem:[%s5261_s26 + $0xff0] sm:$0xff] }
  0xed   : > { %4448 = vmatpush3.msra.mxu1 %v680_v0  ;;  %4414 = vmatprep.subr.mxu0 %v663_v1  ;;  %v714_v62 = vld [vmem:[%s5261_s26 + $0xe70] sm:$0xff]  ;;  %v729_v0 = vld [vmem:[%s5261_s26 + $0xee8] sm:$0xff] }
  0xee   : > { %4449 = vmatprep.subr.mxu1 %v695_v2  ;;  %4415 = vmatpush3.msra.mxu0 %v647_v3  ;;  %v746_v63 = vld [vmem:[%s5261_s26 + $0xf70] sm:$0xff]  ;;  %v761_v1 = vld [vmem:[%s5261_s26 + $0xfe8] sm:$0xff] }
  0xef   : > { %4450 = vmatpush3.msra.mxu1 %v679_v4  ;;  %4416 = vmatprep.subr.mxu0 %v662_v5  ;;  %v713_v2 = vld [vmem:[%s5261_s26 + $0xe68] sm:$0xff]  ;;  %v728_v4 = vld [vmem:[%s5261_s26 + $0xee0] sm:$0xff] }
  0xf0   : > { %4451 = vmatprep.subr.mxu1 %v694_v6  ;;  %4417 = vmatpush3.msra.mxu0 %v646_v7  ;;  %v745_v3 = vld [vmem:[%s5261_s26 + $0xf68] sm:$0xff]  ;;  %v760_v5 = vld [vmem:[%s5261_s26 + $0xfe0] sm:$0xff] }
  0xf1   : > { %4452 = vmatpush3.msra.mxu1 %v678_v8  ;;  %4418 = vmatprep.subr.mxu0 %v661_v9  ;;  %v712_v6 = vld [vmem:[%s5261_s26 + $0xe60] sm:$0xff]  ;;  %v727_v8 = vld [vmem:[%s5261_s26 + $0xed8] sm:$0xff] }
  0xf2   : > { %4453 = vmatprep.subr.mxu1 %v693_v10  ;;  %4419 = vmatpush3.msra.mxu0 %v645_v11  ;;  %v744_v7 = vld [vmem:[%s5261_s26 + $0xf60] sm:$0xff]  ;;  %v759_v9 = vld [vmem:[%s5261_s26 + $0xfd8] sm:$0xff] }
  0xf3   : > { %4454 = vmatpush3.msra.mxu1 %v677_v12  ;;  %4420 = vmatprep.subr.mxu0 %v660_v13  ;;  %v711_v10 = vld [vmem:[%s5261_s26 + $0xe58] sm:$0xff]  ;;  %v726_v12 = vld [vmem:[%s5261_s26 + $0xed0] sm:$0xff] }
  0xf4   : > { %4455 = vmatprep.subr.mxu1 %v692_v14  ;;  %4421 = vmatpush3.msra.mxu0 %v644_v15  ;;  %v743_v11 = vld [vmem:[%s5261_s26 + $0xf58] sm:$0xff]  ;;  %v758_v13 = vld [vmem:[%s5261_s26 + $0xfd0] sm:$0xff] }
  0xf5   : > { %4456 = vmatpush3.msra.mxu1 %v676_v16  ;;  %4422 = vmatprep.subr.mxu0 %v659_v17  ;;  %v710_v14 = vld [vmem:[%s5261_s26 + $0xe50] sm:$0xff]  ;;  %v725_v16 = vld [vmem:[%s5261_s26 + $0xec8] sm:$0xff] }
  0xf6   : > { %4457 = vmatprep.subr.mxu1 %v691_v18  ;;  %4423 = vmatpush3.msra.mxu0 %v643_v19  ;;  %v742_v15 = vld [vmem:[%s5261_s26 + $0xf50] sm:$0xff]  ;;  %v757_v17 = vld [vmem:[%s5261_s26 + $0xfc8] sm:$0xff] }
  0xf7   : > { %4458 = vmatpush3.msra.mxu1 %v675_v20  ;;  %4424 = vmatprep.subr.mxu0 %v658_v21  ;;  %v709_v18 = vld [vmem:[%s5261_s26 + $0xe48] sm:$0xff]  ;;  %v724_v20 = vld [vmem:[%s5261_s26 + $0xec0] sm:$0xff] }
  0xf8   : > { %4459 = vmatprep.subr.mxu1 %v690_v22  ;;  %4425 = vmatpush3.msra.mxu0 %v642_v23  ;;  %v741_v19 = vld [vmem:[%s5261_s26 + $0xf48] sm:$0xff]  ;;  %v756_v21 = vld [vmem:[%s5261_s26 + $0xfc0] sm:$0xff] }
  0xf9   : > { %4460 = vmatpush3.msra.mxu1 %v674_v24  ;;  %4426 = vmatprep.subr.mxu0 %v657_v25  ;;  %v708_v22 = vld [vmem:[%s5261_s26 + $0xe40] sm:$0xff]  ;;  %v723_v24 = vld [vmem:[%s5261_s26 + $0xeb8] sm:$0xff] }
  0xfa   : > { %4461 = vmatprep.subr.mxu1 %v689_v26  ;;  %4427 = vmatpush3.msra.mxu0 %v641_v27  ;;  %v740_v23 = vld [vmem:[%s5261_s26 + $0xf40] sm:$0xff]  ;;  %v755_v25 = vld [vmem:[%s5261_s26 + $0xfb8] sm:$0xff] }
  0xfb   : > { %4462 = vmatpush3.msra.mxu1 %v673_v28  ;;  %4428 = vmatprep.subr.mxu0 %v656_v30  ;;  %v707_v26 = vld [vmem:[%s5261_s26 + $0xe38] sm:$0xff]  ;;  %v722_v28 = vld [vmem:[%s5261_s26 + $0xeb0] sm:$0xff] }
  0xfc   : > { %4463 = vmatprep.subr.mxu1 %v688_v31  ;;  %4429 = vmatpush3.msra.mxu0 %v640_v32  ;;  %v739_v27 = vld [vmem:[%s5261_s26 + $0xf38] sm:$0xff]  ;;  %v706_v30 = vld [vmem:[%s5261_s26 + $0xe30] sm:$0xff]  ;;  %v721_v32 = vld [vmem:[%s5261_s26 + $0xea8] sm:$0xff] }
  0xfd   : > { %4464 = vmatpush3.msra.mxu1 %v672_v33  ;;  %4430 = vmatprep.subr.mxu0 %v655_v34  ;;  %v738_v31 = vld [vmem:[%s5261_s26 + $0xf30] sm:$0xff]  ;;  %v753_v33 = vld [vmem:[%s5261_s26 + $0xfa8] sm:$0xff] }
  0xfe   : > { %4465 = vmatprep.subr.mxu1 %v687_v35  ;;  %4431 = vmatpush3.msra.mxu0 %v639_v37  ;;  %v705_v34 = vld [vmem:[%s5261_s26 + $0xe28] sm:$0xff]  ;;  %v720_v37 = vld [vmem:[%s5261_s26 + $0xea0] sm:$0xff] }
  0xff   : > { %4466 = vmatpush3.msra.mxu1 %v671_v38  ;;  %4432 = vmatprep.subr.mxu0 %v654_v39  ;;  %v737_v35 = vld [vmem:[%s5261_s26 + $0xf28] sm:$0xff]  ;;  %v752_v38 = vld [vmem:[%s5261_s26 + $0xfa0] sm:$0xff] }
 0x100   : > { %4467 = vmatprep.subr.mxu1 %v686_v40  ;;  %4433 = vmatpush3.msra.mxu0 %v638_v42  ;;  %v704_v39 = vld [vmem:[%s5261_s26 + $0xe20] sm:$0xff]  ;;  %v751_v42 = vld [vmem:[%s5261_s26 + $0xf98] sm:$0xff] }
 0x101   : > { %4468 = vmatpush3.msra.mxu1 %v670_v43  ;;  %4434 = vmatprep.subr.mxu0 %v653_v44  ;;  %v736_v40 = vld [vmem:[%s5261_s26 + $0xf20] sm:$0xff]  ;;  %v1411_v43 = vcombine.high %v243_v36, %v243_v36  ;;  %v703_v44 = vld [vmem:[%s5261_s26 + $0xe18] sm:$0xff] }
 0x102   : > { %4469 = vmatprep.subr.mxu1 %v685_v45  ;;  %4435 = vmatpush3.msra.mxu0 %v637_v47  ;;  %v735_v45 = vld [vmem:[%s5261_s26 + $0xf18] sm:$0xff]  ;;  %v750_v47 = vld [vmem:[%s5261_s26 + $0xf90] sm:$0xff] }
 0x103   : > { %4470 = vmatpush3.msra.mxu1 %v669_v48  ;;  %4436 = vmatprep.subr.mxu0 %v652_v49  ;;  %v1418_v48 = vrot.slane %v243_v36, %v5310_v52  ;;  %v702_v49 = vld [vmem:[%s5261_s26 + $0xe10] sm:$0xff] }
 0x104   : > { %4471 = vmatprep.subr.mxu1 %v684_v50  ;;  %4437 = vmatpush3.msra.mxu0 %v636_v53  ;;  %v734_v50 = vld [vmem:[%s5261_s26 + $0xf10] sm:$0xff]  ;;  %v749_v53 = vld [vmem:[%s5261_s26 + $0xf88] sm:$0xff] }
 0x105   : > { %2532 = vmatprep.mubr.f32.mxu0 %v1409_v51  ;;  %4472 = vmatpush3.msra.mxu1 %v668_v54  ;;  %v717_v51 = vld [vmem:[%s5261_s26 + $0xe88] sm:$0xff]  ;;  %v1425_v54 = vrot.slane %v1411_v43, %v5310_v52  ;;  %v818_v36 = vld [vmem:[%s5261_s26 + $0x11b0] sm:$0xff]  ;;  %v244_v43 = vld [vmem:[%s5256_s22 + $0x40] sm:$0xff] }
 0x106   : > { %2533 = vmatmul.mubr.f32.vlgmr.msra.gmra.mxu0 %v1401_v41  ;;  %2602 = vmatprep.mubr.f32.mxu1 %v1410_v55  ;;  %v719_v41 = vld [vmem:[%s5261_s26 + $0xe98] sm:$0xff]  ;;  %v701_v55 = vld [vmem:[%s5261_s26 + $0xe08] sm:$0xff] }
 0x107   : > { %4476 = vmatprep.subr.mxu0 %v731_v56  ;;  %4511 = vmatprep.subr.mxu1 %v763_v57  ;;  %v733_v56 = vld [vmem:[%s5261_s26 + $0xf08] sm:$0xff]  ;;  %v716_v57 = vld [vmem:[%s5261_s26 + $0xe80] sm:$0xff] }
 0x108   : > { %2603 = vmatmul.mubr.f32.vlgmr.msra.gmra.mxu1 %v1408_v46  ;;  %4477 = vmatpush3.msra.mxu0 %v715_v58  ;;  %v718_v46 = vld [vmem:[%s5261_s26 + $0xe90] sm:$0xff]  ;;  %v748_v58 = vld [vmem:[%s5261_s26 + $0xf80] sm:$0xff] }
 0x109   : > { %4512 = vmatpush3.msra.mxu1 %v747_v59  ;;  %4478 = vmatprep.subr.mxu0 %v730_v60  ;;  %v1426_v59 = vcombine.high %v1418_v48, %v1418_v48  ;;  %v700_v60 = vld [vmem:[%s5261_s26 + $0xe00] sm:$0xff] }
 0x10a   : > { %4513 = vmatprep.subr.mxu1 %v762_v61  ;;  %4479 = vmatpush3.msra.mxu0 %v714_v62  ;;  %v732_v61 = vld [vmem:[%s5261_s26 + $0xf00] sm:$0xff]  ;;  %v1427_v62 = vcombine.high %v1425_v54, %v1425_v54 }
 0x10b   : > { %4514 = vmatpush3.msra.mxu1 %v746_v63  ;;  %4480 = vmatprep.subr.mxu0 %v729_v0  ;;  %v795_v63 = vld [vmem:[%s5261_s26 + $0x10f8] sm:$0xff] }
 0x10c   : > { %4515 = vmatprep.subr.mxu1 %v761_v1  ;;  %4481 = vmatpush3.msra.mxu0 %v713_v2  ;;  %v827_v0 = vld [vmem:[%s5261_s26 + $0x11f8] sm:$0xff] }
 0x10d   : > { %4516 = vmatpush3.msra.mxu1 %v745_v3  ;;  %4482 = vmatprep.subr.mxu0 %v728_v4  ;;  %v779_v1 = vld [vmem:[%s5261_s26 + $0x1078] sm:$0xff]  ;;  %v794_v3 = vld [vmem:[%s5261_s26 + $0x10f0] sm:$0xff] }
 0x10e   : > { %4517 = vmatprep.subr.mxu1 %v760_v5  ;;  %4483 = vmatpush3.msra.mxu0 %v712_v6  ;;  %v811_v2 = vld [vmem:[%s5261_s26 + $0x1178] sm:$0xff]  ;;  %v826_v4 = vld [vmem:[%s5261_s26 + $0x11f0] sm:$0xff] }
 0x10f   : > { %4518 = vmatpush3.msra.mxu1 %v744_v7  ;;  %4484 = vmatprep.subr.mxu0 %v727_v8  ;;  %v778_v5 = vld [vmem:[%s5261_s26 + $0x1070] sm:$0xff]  ;;  %v793_v7 = vld [vmem:[%s5261_s26 + $0x10e8] sm:$0xff] }
 0x110   : > { %4519 = vmatprep.subr.mxu1 %v759_v9  ;;  %4485 = vmatpush3.msra.mxu0 %v711_v10  ;;  %v810_v6 = vld [vmem:[%s5261_s26 + $0x1170] sm:$0xff]  ;;  %v825_v8 = vld [vmem:[%s5261_s26 + $0x11e8] sm:$0xff] }
 0x111   : > { %4520 = vmatpush3.msra.mxu1 %v743_v11  ;;  %4486 = vmatprep.subr.mxu0 %v726_v12  ;;  %v777_v9 = vld [vmem:[%s5261_s26 + $0x1068] sm:$0xff]  ;;  %v792_v11 = vld [vmem:[%s5261_s26 + $0x10e0] sm:$0xff] }
 0x112   : > { %4521 = vmatprep.subr.mxu1 %v758_v13  ;;  %4487 = vmatpush3.msra.mxu0 %v710_v14  ;;  %v809_v10 = vld [vmem:[%s5261_s26 + $0x1168] sm:$0xff]  ;;  %v824_v12 = vld [vmem:[%s5261_s26 + $0x11e0] sm:$0xff] }
 0x113   : > { %4522 = vmatpush3.msra.mxu1 %v742_v15  ;;  %4488 = vmatprep.subr.mxu0 %v725_v16  ;;  %v776_v13 = vld [vmem:[%s5261_s26 + $0x1060] sm:$0xff]  ;;  %v791_v15 = vld [vmem:[%s5261_s26 + $0x10d8] sm:$0xff] }
 0x114   : > { %4523 = vmatprep.subr.mxu1 %v757_v17  ;;  %4489 = vmatpush3.msra.mxu0 %v709_v18  ;;  %v808_v14 = vld [vmem:[%s5261_s26 + $0x1160] sm:$0xff]  ;;  %v823_v16 = vld [vmem:[%s5261_s26 + $0x11d8] sm:$0xff] }
 0x115   : > { %4524 = vmatpush3.msra.mxu1 %v741_v19  ;;  %4490 = vmatprep.subr.mxu0 %v724_v20  ;;  %v775_v17 = vld [vmem:[%s5261_s26 + $0x1058] sm:$0xff]  ;;  %v790_v19 = vld [vmem:[%s5261_s26 + $0x10d0] sm:$0xff] }
 0x116   : > { %4525 = vmatprep.subr.mxu1 %v756_v21  ;;  %4491 = vmatpush3.msra.mxu0 %v708_v22  ;;  %v807_v18 = vld [vmem:[%s5261_s26 + $0x1158] sm:$0xff]  ;;  %v822_v20 = vld [vmem:[%s5261_s26 + $0x11d0] sm:$0xff] }
 0x117   : > { %4526 = vmatpush3.msra.mxu1 %v740_v23  ;;  %4492 = vmatprep.subr.mxu0 %v723_v24  ;;  %v774_v21 = vld [vmem:[%s5261_s26 + $0x1050] sm:$0xff]  ;;  %v789_v23 = vld [vmem:[%s5261_s26 + $0x10c8] sm:$0xff] }
 0x118   : > { %4527 = vmatprep.subr.mxu1 %v755_v25  ;;  %4493 = vmatpush3.msra.mxu0 %v707_v26  ;;  %v806_v22 = vld [vmem:[%s5261_s26 + $0x1150] sm:$0xff]  ;;  %v821_v24 = vld [vmem:[%s5261_s26 + $0x11c8] sm:$0xff] }
 0x119   : > { %4528 = vmatpush3.msra.mxu1 %v739_v27  ;;  %4494 = vmatprep.subr.mxu0 %v722_v28  ;;  %v773_v25 = vld [vmem:[%s5261_s26 + $0x1048] sm:$0xff]  ;;  %v788_v27 = vld [vmem:[%s5261_s26 + $0x10c0] sm:$0xff] }
 0x11a   : > { %4529 = vmatprep.subr.mxu1 %v754_v29  ;;  %4495 = vmatpush3.msra.mxu0 %v706_v30  ;;  %v805_v26 = vld [vmem:[%s5261_s26 + $0x1148] sm:$0xff]  ;;  %v820_v28 = vld [vmem:[%s5261_s26 + $0x11c0] sm:$0xff] }
 0x11b   : > { %4530 = vmatpush3.msra.mxu1 %v738_v31  ;;  %4496 = vmatprep.subr.mxu0 %v721_v32  ;;  %v772_v29 = vld [vmem:[%s5261_s26 + $0x1040] sm:$0xff]  ;;  %v787_v31 = vld [vmem:[%s5261_s26 + $0x10b8] sm:$0xff] }
 0x11c   : > { %4531 = vmatprep.subr.mxu1 %v753_v33  ;;  %4497 = vmatpush3.msra.mxu0 %v705_v34  ;;  %v804_v30 = vld [vmem:[%s5261_s26 + $0x1140] sm:$0xff]  ;;  %v819_v32 = vld [vmem:[%s5261_s26 + $0x11b8] sm:$0xff] }
 0x11d   : > { %4532 = vmatpush3.msra.mxu1 %v737_v35  ;;  %4498 = vmatprep.subr.mxu0 %v720_v37  ;;  %v771_v33 = vld [vmem:[%s5261_s26 + $0x1038] sm:$0xff]  ;;  %v786_v35 = vld [vmem:[%s5261_s26 + $0x10b0] sm:$0xff] }
 0x11e   : > { %4533 = vmatprep.subr.mxu1 %v752_v38  ;;  %4499 = vmatpush3.msra.mxu0 %v704_v39  ;;  %v803_v34 = vld [vmem:[%s5261_s26 + $0x1138] sm:$0xff]  ;;  %v770_v37 = vld [vmem:[%s5261_s26 + $0x1030] sm:$0xff]  ;;  %v785_v39 = vld [vmem:[%s5261_s26 + $0x10a8] sm:$0xff] }
 0x11f   : > { %4534 = vmatpush3.msra.mxu1 %v736_v40  ;;  %4500 = vmatprep.subr.mxu0 %v719_v41  ;;  %v802_v38 = vld [vmem:[%s5261_s26 + $0x1130] sm:$0xff]  ;;  %v817_v40 = vld [vmem:[%s5261_s26 + $0x11a8] sm:$0xff] }
 0x120   : > { %4535 = vmatprep.subr.mxu1 %v751_v42  ;;  %4501 = vmatpush3.msra.mxu0 %v703_v44  ;;  %v769_v41 = vld [vmem:[%s5261_s26 + $0x1028] sm:$0xff]  ;;  %v784_v44 = vld [vmem:[%s5261_s26 + $0x10a0] sm:$0xff] }
 0x121   : > { %4536 = vmatpush3.msra.mxu1 %v735_v45  ;;  %4502 = vmatprep.subr.mxu0 %v718_v46  ;;  %v801_v42 = vld [vmem:[%s5261_s26 + $0x1128] sm:$0xff]  ;;  %v816_v45 = vld [vmem:[%s5261_s26 + $0x11a0] sm:$0xff] }
 0x122   : > { %4537 = vmatprep.subr.mxu1 %v750_v47  ;;  %4503 = vmatpush3.msra.mxu0 %v702_v49  ;;  %v768_v46 = vld [vmem:[%s5261_s26 + $0x1020] sm:$0xff]  ;;  %v815_v49 = vld [vmem:[%s5261_s26 + $0x1198] sm:$0xff] }
 0x123   : > { %4538 = vmatpush3.msra.mxu1 %v734_v50  ;;  %4504 = vmatprep.subr.mxu0 %v717_v51  ;;  %v800_v47 = vld [vmem:[%s5261_s26 + $0x1120] sm:$0xff]  ;;  %v1428_v50 = vcombine.high %v244_v43, %v244_v43  ;;  %v767_v51 = vld [vmem:[%s5261_s26 + $0x1018] sm:$0xff] }
 0x124   : > { %4539 = vmatprep.subr.mxu1 %v749_v53  ;;  %4505 = vmatpush3.msra.mxu0 %v701_v55  ;;  %v799_v53 = vld [vmem:[%s5261_s26 + $0x1118] sm:$0xff]  ;;  %v814_v55 = vld [vmem:[%s5261_s26 + $0x1190] sm:$0xff] }
 0x125   : > { %4540 = vmatpush3.msra.mxu1 %v733_v56  ;;  %4506 = vmatprep.subr.mxu0 %v716_v57  ;;  %v1435_v56 = vrot.slane %v244_v43, %v5310_v52  ;;  %v766_v57 = vld [vmem:[%s5261_s26 + $0x1010] sm:$0xff] }
 0x126   : > { %4541 = vmatprep.subr.mxu1 %v748_v58  ;;  %4507 = vmatpush3.msra.mxu0 %v700_v60  ;;  %v798_v58 = vld [vmem:[%s5261_s26 + $0x1110] sm:$0xff]  ;;  %v813_v60 = vld [vmem:[%s5261_s26 + $0x1188] sm:$0xff] }
 0x127   : > { %2672 = vmatprep.mubr.f32.mxu0 %v1426_v59  ;;  %4542 = vmatpush3.msra.mxu1 %v732_v61  ;;  %v781_v59 = vld [vmem:[%s5261_s26 + $0x1088] sm:$0xff]  ;;  %v1442_v61 = vrot.slane %v1428_v50, %v5310_v52  ;;  %v882_v43 = vld [vmem:[%s5261_s26 + $0x13b0] sm:$0xff] }
 0x128   : > { %2673 = vmatmul.mubr.f32.vlgmr.msra.gmra.mxu0 %v1418_v48  ;;  %2742 = vmatprep.mubr.f32.mxu1 %v1427_v62  ;;  %v783_v48 = vld [vmem:[%s5261_s26 + $0x1098] sm:$0xff]  ;;  %v765_v62 = vld [vmem:[%s5261_s26 + $0x1008] sm:$0xff] }
 0x129   : > { %4546 = vmatprep.subr.mxu0 %v795_v63  ;;  %4581 = vmatprep.subr.mxu1 %v827_v0  ;;  %v797_v63 = vld [vmem:[%s5261_s26 + $0x1108] sm:$0xff]  ;;  %v780_v0 = vld [vmem:[%s5261_s26 + $0x1080] sm:$0xff] }
 0x12a   : > { %2743 = vmatmul.mubr.f32.vlgmr.msra.gmra.mxu1 %v1425_v54  ;;  %4547 = vmatpush3.msra.mxu0 %v779_v1  ;;  %v782_v54 = vld [vmem:[%s5261_s26 + $0x1090] sm:$0xff]  ;;  %v812_v1 = vld [vmem:[%s5261_s26 + $0x1180] sm:$0xff]  ;;  %v245_v50 = vld [vmem:[%s5256_s22 + $0x48] sm:$0xff] }
 0x12b   : > { %4582 = vmatpush3.msra.mxu1 %v811_v2  ;;  %4548 = vmatprep.subr.mxu0 %v794_v3  ;;  %v1443_v2 = vcombine.high %v1435_v56, %v1435_v56  ;;  %v764_v3 = vld [vmem:[%s5261_s26 + $0x1000] sm:$0xff] }
 0x12c   : > { %4583 = vmatprep.subr.mxu1 %v826_v4  ;;  %4549 = vmatpush3.msra.mxu0 %v778_v5  ;;  %v796_v4 = vld [vmem:[%s5261_s26 + $0x1100] sm:$0xff]  ;;  %v1444_v5 = vcombine.high %v1442_v61, %v1442_v61 }
 0x12d   : > { %4584 = vmatpush3.msra.mxu1 %v810_v6  ;;  %4550 = vmatprep.subr.mxu0 %v793_v7  ;;  %v859_v6 = vld [vmem:[%s5261_s26 + $0x12f8] sm:$0xff] }
 0x12e   : > { %4585 = vmatprep.subr.mxu1 %v825_v8  ;;  %4551 = vmatpush3.msra.mxu0 %v777_v9  ;;  %v891_v7 = vld [vmem:[%s5261_s26 + $0x13f8] sm:$0xff] }
 0x12f   : > { %4586 = vmatpush3.msra.mxu1 %v809_v10  ;;  %4552 = vmatprep.subr.mxu0 %v792_v11  ;;  %v843_v8 = vld [vmem:[%s5261_s26 + $0x1278] sm:$0xff]  ;;  %v858_v10 = vld [vmem:[%s5261_s26 + $0x12f0] sm:$0xff] }
 0x130   : > { %4587 = vmatprep.subr.mxu1 %v824_v12  ;;  %4553 = vmatpush3.msra.mxu0 %v776_v13  ;;  %v875_v9 = vld [vmem:[%s5261_s26 + $0x1378] sm:$0xff]  ;;  %v890_v11 = vld [vmem:[%s5261_s26 + $0x13f0] sm:$0xff] }
 0x131   : > { %4588 = vmatpush3.msra.mxu1 %v808_v14  ;;  %4554 = vmatprep.subr.mxu0 %v791_v15  ;;  %v842_v12 = vld [vmem:[%s5261_s26 + $0x1270] sm:$0xff]  ;;  %v857_v14 = vld [vmem:[%s5261_s26 + $0x12e8] sm:$0xff] }
 0x132   : > { %4589 = vmatprep.subr.mxu1 %v823_v16  ;;  %4555 = vmatpush3.msra.mxu0 %v775_v17  ;;  %v874_v13 = vld [vmem:[%s5261_s26 + $0x1370] sm:$0xff]  ;;  %v889_v15 = vld [vmem:[%s5261_s26 + $0x13e8] sm:$0xff] }
 0x133   : > { %4590 = vmatpush3.msra.mxu1 %v807_v18  ;;  %4556 = vmatprep.subr.mxu0 %v790_v19  ;;  %v841_v16 = vld [vmem:[%s5261_s26 + $0x1268] sm:$0xff]  ;;  %v856_v18 = vld [vmem:[%s5261_s26 + $0x12e0] sm:$0xff] }
 0x134   : > { %4591 = vmatprep.subr.mxu1 %v822_v20  ;;  %4557 = vmatpush3.msra.mxu0 %v774_v21  ;;  %v873_v17 = vld [vmem:[%s5261_s26 + $0x1368] sm:$0xff]  ;;  %v888_v19 = vld [vmem:[%s5261_s26 + $0x13e0] sm:$0xff] }
 0x135   : > { %4592 = vmatpush3.msra.mxu1 %v806_v22  ;;  %4558 = vmatprep.subr.mxu0 %v789_v23  ;;  %v840_v20 = vld [vmem:[%s5261_s26 + $0x1260] sm:$0xff]  ;;  %v855_v22 = vld [vmem:[%s5261_s26 + $0x12d8] sm:$0xff] }
 0x136   : > { %4593 = vmatprep.subr.mxu1 %v821_v24  ;;  %4559 = vmatpush3.msra.mxu0 %v773_v25  ;;  %v872_v21 = vld [vmem:[%s5261_s26 + $0x1360] sm:$0xff]  ;;  %v887_v23 = vld [vmem:[%s5261_s26 + $0x13d8] sm:$0xff] }
 0x137   : > { %4594 = vmatpush3.msra.mxu1 %v805_v26  ;;  %4560 = vmatprep.subr.mxu0 %v788_v27  ;;  %v839_v24 = vld [vmem:[%s5261_s26 + $0x1258] sm:$0xff]  ;;  %v854_v26 = vld [vmem:[%s5261_s26 + $0x12d0] sm:$0xff] }
 0x138   : > { %4595 = vmatprep.subr.mxu1 %v820_v28  ;;  %4561 = vmatpush3.msra.mxu0 %v772_v29  ;;  %v871_v25 = vld [vmem:[%s5261_s26 + $0x1358] sm:$0xff]  ;;  %v886_v27 = vld [vmem:[%s5261_s26 + $0x13d0] sm:$0xff] }
 0x139   : > { %4596 = vmatpush3.msra.mxu1 %v804_v30  ;;  %4562 = vmatprep.subr.mxu0 %v787_v31  ;;  %v838_v28 = vld [vmem:[%s5261_s26 + $0x1250] sm:$0xff]  ;;  %v853_v30 = vld [vmem:[%s5261_s26 + $0x12c8] sm:$0xff] }
 0x13a   : > { %4597 = vmatprep.subr.mxu1 %v819_v32  ;;  %4563 = vmatpush3.msra.mxu0 %v771_v33  ;;  %v870_v29 = vld [vmem:[%s5261_s26 + $0x1350] sm:$0xff]  ;;  %v885_v31 = vld [vmem:[%s5261_s26 + $0x13c8] sm:$0xff] }
 0x13b   : > { %4598 = vmatpush3.msra.mxu1 %v803_v34  ;;  %4564 = vmatprep.subr.mxu0 %v786_v35  ;;  %v837_v32 = vld [vmem:[%s5261_s26 + $0x1248] sm:$0xff]  ;;  %v852_v34 = vld [vmem:[%s5261_s26 + $0x12c0] sm:$0xff] }
 0x13c   : > { %4599 = vmatprep.subr.mxu1 %v818_v36  ;;  %4565 = vmatpush3.msra.mxu0 %v770_v37  ;;  %v869_v33 = vld [vmem:[%s5261_s26 + $0x1348] sm:$0xff]  ;;  %v884_v35 = vld [vmem:[%s5261_s26 + $0x13c0] sm:$0xff] }
 0x13d   : > { %4600 = vmatpush3.msra.mxu1 %v802_v38  ;;  %4566 = vmatprep.subr.mxu0 %v785_v39  ;;  %v836_v36 = vld [vmem:[%s5261_s26 + $0x1240] sm:$0xff]  ;;  %v851_v38 = vld [vmem:[%s5261_s26 + $0x12b8] sm:$0xff] }
 0x13e   : > { %4601 = vmatprep.subr.mxu1 %v817_v40  ;;  %4567 = vmatpush3.msra.mxu0 %v769_v41  ;;  %v868_v37 = vld [vmem:[%s5261_s26 + $0x1340] sm:$0xff]  ;;  %v883_v39 = vld [vmem:[%s5261_s26 + $0x13b8] sm:$0xff] }
 0x13f   : > { %4602 = vmatpush3.msra.mxu1 %v801_v42  ;;  %4568 = vmatprep.subr.mxu0 %v784_v44  ;;  %v835_v40 = vld [vmem:[%s5261_s26 + $0x1238] sm:$0xff]  ;;  %v850_v42 = vld [vmem:[%s5261_s26 + $0x12b0] sm:$0xff] }
 0x140   : > { %4603 = vmatprep.subr.mxu1 %v816_v45  ;;  %4569 = vmatpush3.msra.mxu0 %v768_v46  ;;  %v867_v41 = vld [vmem:[%s5261_s26 + $0x1338] sm:$0xff]  ;;  %v834_v44 = vld [vmem:[%s5261_s26 + $0x1230] sm:$0xff]  ;;  %v849_v46 = vld [vmem:[%s5261_s26 + $0x12a8] sm:$0xff] }
 0x141   : > { %4604 = vmatpush3.msra.mxu1 %v800_v47  ;;  %4570 = vmatprep.subr.mxu0 %v783_v48  ;;  %v866_v45 = vld [vmem:[%s5261_s26 + $0x1330] sm:$0xff]  ;;  %v881_v47 = vld [vmem:[%s5261_s26 + $0x13a8] sm:$0xff] }
 0x142   : > { %4605 = vmatprep.subr.mxu1 %v815_v49  ;;  %4571 = vmatpush3.msra.mxu0 %v767_v51  ;;  %v833_v48 = vld [vmem:[%s5261_s26 + $0x1228] sm:$0xff]  ;;  %v848_v51 = vld [vmem:[%s5261_s26 + $0x12a0] sm:$0xff] }
 0x143   : > { %4606 = vmatpush3.msra.mxu1 %v799_v53  ;;  %4572 = vmatprep.subr.mxu0 %v782_v54  ;;  %v865_v49 = vld [vmem:[%s5261_s26 + $0x1328] sm:$0xff]  ;;  %v880_v53 = vld [vmem:[%s5261_s26 + $0x13a0] sm:$0xff] }
 0x144   : > { %4607 = vmatprep.subr.mxu1 %v814_v55  ;;  %4573 = vmatpush3.msra.mxu0 %v766_v57  ;;  %v832_v54 = vld [vmem:[%s5261_s26 + $0x1220] sm:$0xff]  ;;  %v879_v57 = vld [vmem:[%s5261_s26 + $0x1398] sm:$0xff] }
 0x145   : > { %4608 = vmatpush3.msra.mxu1 %v798_v58  ;;  %4574 = vmatprep.subr.mxu0 %v781_v59  ;;  %v864_v55 = vld [vmem:[%s5261_s26 + $0x1320] sm:$0xff]  ;;  %v1445_v58 = vcombine.high %v245_v50, %v245_v50  ;;  %v831_v59 = vld [vmem:[%s5261_s26 + $0x1218] sm:$0xff] }
 0x146   : > { %4609 = vmatprep.subr.mxu1 %v813_v60  ;;  %4575 = vmatpush3.msra.mxu0 %v765_v62  ;;  %v863_v60 = vld [vmem:[%s5261_s26 + $0x1318] sm:$0xff]  ;;  %v878_v62 = vld [vmem:[%s5261_s26 + $0x1390] sm:$0xff] }
 0x147   : > { %4610 = vmatpush3.msra.mxu1 %v797_v63  ;;  %4576 = vmatprep.subr.mxu0 %v780_v0  ;;  %v1452_v63 = vrot.slane %v245_v50, %v5310_v52  ;;  %v830_v0 = vld [vmem:[%s5261_s26 + $0x1210] sm:$0xff] }
 0x148   : > { %4611 = vmatprep.subr.mxu1 %v812_v1  ;;  %4577 = vmatpush3.msra.mxu0 %v764_v3  ;;  %v862_v1 = vld [vmem:[%s5261_s26 + $0x1310] sm:$0xff]  ;;  %v877_v3 = vld [vmem:[%s5261_s26 + $0x1388] sm:$0xff] }
 0x149   : > { %2812 = vmatprep.mubr.f32.mxu0 %v1443_v2  ;;  %4612 = vmatpush3.msra.mxu1 %v796_v4  ;;  %v845_v2 = vld [vmem:[%s5261_s26 + $0x1288] sm:$0xff]  ;;  %v1459_v4 = vrot.slane %v1445_v58, %v5310_v52  ;;  %v946_v50 = vld [vmem:[%s5261_s26 + $0x15b0] sm:$0xff] }
 0x14a   : > { %2813 = vmatmul.mubr.f32.vlgmr.msra.gmra.mxu0 %v1435_v56  ;;  %2882 = vmatprep.mubr.f32.mxu1 %v1444_v5  ;;  %v847_v56 = vld [vmem:[%s5261_s26 + $0x1298] sm:$0xff]  ;;  %v829_v5 = vld [vmem:[%s5261_s26 + $0x1208] sm:$0xff]  ;;  %v246_v58 = vld [vmem:[%s5256_s22 + $0x50] sm:$0xff] }
 0x14b   : > { %4616 = vmatprep.subr.mxu0 %v859_v6  ;;  %4651 = vmatprep.subr.mxu1 %v891_v7  ;;  %v861_v6 = vld [vmem:[%s5261_s26 + $0x1308] sm:$0xff]  ;;  %v844_v7 = vld [vmem:[%s5261_s26 + $0x1280] sm:$0xff] }
 0x14c   : > { %2883 = vmatmul.mubr.f32.vlgmr.msra.gmra.mxu1 %v1442_v61  ;;  %4617 = vmatpush3.msra.mxu0 %v843_v8  ;;  %v846_v61 = vld [vmem:[%s5261_s26 + $0x1290] sm:$0xff]  ;;  %v876_v8 = vld [vmem:[%s5261_s26 + $0x1380] sm:$0xff] }
 0x14d   : > { %4652 = vmatpush3.msra.mxu1 %v875_v9  ;;  %4618 = vmatprep.subr.mxu0 %v858_v10  ;;  %v1460_v9 = vcombine.high %v1452_v63, %v1452_v63  ;;  %v828_v10 = vld [vmem:[%s5261_s26 + $0x1200] sm:$0xff] }
 0x14e   : > { %4653 = vmatprep.subr.mxu1 %v890_v11  ;;  %4619 = vmatpush3.msra.mxu0 %v842_v12  ;;  %v860_v11 = vld [vmem:[%s5261_s26 + $0x1300] sm:$0xff]  ;;  %v1461_v12 = vcombine.high %v1459_v4, %v1459_v4 }
 0x14f   : > { %4654 = vmatpush3.msra.mxu1 %v874_v13  ;;  %4620 = vmatprep.subr.mxu0 %v857_v14  ;;  %v923_v13 = vld [vmem:[%s5261_s26 + $0x14f8] sm:$0xff] }
 0x150   : > { %4655 = vmatprep.subr.mxu1 %v889_v15  ;;  %4621 = vmatpush3.msra.mxu0 %v841_v16  ;;  %v955_v14 = vld [vmem:[%s5261_s26 + $0x15f8] sm:$0xff] }
 0x151   : > { %4656 = vmatpush3.msra.mxu1 %v873_v17  ;;  %4622 = vmatprep.subr.mxu0 %v856_v18  ;;  %v907_v15 = vld [vmem:[%s5261_s26 + $0x1478] sm:$0xff]  ;;  %v922_v17 = vld [vmem:[%s5261_s26 + $0x14f0] sm:$0xff] }
 0x152   : > { %4657 = vmatprep.subr.mxu1 %v888_v19  ;;  %4623 = vmatpush3.msra.mxu0 %v840_v20  ;;  %v939_v16 = vld [vmem:[%s5261_s26 + $0x1578] sm:$0xff]  ;;  %v954_v18 = vld [vmem:[%s5261_s26 + $0x15f0] sm:$0xff] }
 0x153   : > { %4658 = vmatpush3.msra.mxu1 %v872_v21  ;;  %4624 = vmatprep.subr.mxu0 %v855_v22  ;;  %v906_v19 = vld [vmem:[%s5261_s26 + $0x1470] sm:$0xff]  ;;  %v921_v21 = vld [vmem:[%s5261_s26 + $0x14e8] sm:$0xff] }
 0x154   : > { %4659 = vmatprep.subr.mxu1 %v887_v23  ;;  %4625 = vmatpush3.msra.mxu0 %v839_v24  ;;  %v938_v20 = vld [vmem:[%s5261_s26 + $0x1570] sm:$0xff]  ;;  %v953_v22 = vld [vmem:[%s5261_s26 + $0x15e8] sm:$0xff] }
 0x155   : > { %4660 = vmatpush3.msra.mxu1 %v871_v25  ;;  %4626 = vmatprep.subr.mxu0 %v854_v26  ;;  %v905_v23 = vld [vmem:[%s5261_s26 + $0x1468] sm:$0xff]  ;;  %v920_v25 = vld [vmem:[%s5261_s26 + $0x14e0] sm:$0xff] }
 0x156   : > { %4661 = vmatprep.subr.mxu1 %v886_v27  ;;  %4627 = vmatpush3.msra.mxu0 %v838_v28  ;;  %v937_v24 = vld [vmem:[%s5261_s26 + $0x1568] sm:$0xff]  ;;  %v952_v26 = vld [vmem:[%s5261_s26 + $0x15e0] sm:$0xff] }
 0x157   : > { %4662 = vmatpush3.msra.mxu1 %v870_v29  ;;  %4628 = vmatprep.subr.mxu0 %v853_v30  ;;  %v904_v27 = vld [vmem:[%s5261_s26 + $0x1460] sm:$0xff]  ;;  %v919_v29 = vld [vmem:[%s5261_s26 + $0x14d8] sm:$0xff] }
 0x158   : > { %4663 = vmatprep.subr.mxu1 %v885_v31  ;;  %4629 = vmatpush3.msra.mxu0 %v837_v32  ;;  %v936_v28 = vld [vmem:[%s5261_s26 + $0x1560] sm:$0xff]  ;;  %v951_v30 = vld [vmem:[%s5261_s26 + $0x15d8] sm:$0xff] }
 0x159   : > { %4664 = vmatpush3.msra.mxu1 %v869_v33  ;;  %4630 = vmatprep.subr.mxu0 %v852_v34  ;;  %v903_v31 = vld [vmem:[%s5261_s26 + $0x1458] sm:$0xff]  ;;  %v918_v33 = vld [vmem:[%s5261_s26 + $0x14d0] sm:$0xff] }
 0x15a   : > { %4665 = vmatprep.subr.mxu1 %v884_v35  ;;  %4631 = vmatpush3.msra.mxu0 %v836_v36  ;;  %v935_v32 = vld [vmem:[%s5261_s26 + $0x1558] sm:$0xff]  ;;  %v950_v34 = vld [vmem:[%s5261_s26 + $0x15d0] sm:$0xff] }
 0x15b   : > { %4666 = vmatpush3.msra.mxu1 %v868_v37  ;;  %4632 = vmatprep.subr.mxu0 %v851_v38  ;;  %v902_v35 = vld [vmem:[%s5261_s26 + $0x1450] sm:$0xff]  ;;  %v917_v37 = vld [vmem:[%s5261_s26 + $0x14c8] sm:$0xff] }
 0x15c   : > { %4667 = vmatprep.subr.mxu1 %v883_v39  ;;  %4633 = vmatpush3.msra.mxu0 %v835_v40  ;;  %v934_v36 = vld [vmem:[%s5261_s26 + $0x1550] sm:$0xff]  ;;  %v949_v38 = vld [vmem:[%s5261_s26 + $0x15c8] sm:$0xff] }
 0x15d   : > { %4668 = vmatpush3.msra.mxu1 %v867_v41  ;;  %4634 = vmatprep.subr.mxu0 %v850_v42  ;;  %v901_v39 = vld [vmem:[%s5261_s26 + $0x1448] sm:$0xff]  ;;  %v916_v41 = vld [vmem:[%s5261_s26 + $0x14c0] sm:$0xff] }
 0x15e   : > { %4669 = vmatprep.subr.mxu1 %v882_v43  ;;  %4635 = vmatpush3.msra.mxu0 %v834_v44  ;;  %v933_v40 = vld [vmem:[%s5261_s26 + $0x1548] sm:$0xff]  ;;  %v948_v42 = vld [vmem:[%s5261_s26 + $0x15c0] sm:$0xff] }
 0x15f   : > { %4670 = vmatpush3.msra.mxu1 %v866_v45  ;;  %4636 = vmatprep.subr.mxu0 %v849_v46  ;;  %v900_v43 = vld [vmem:[%s5261_s26 + $0x1440] sm:$0xff]  ;;  %v915_v45 = vld [vmem:[%s5261_s26 + $0x14b8] sm:$0xff] }
 0x160   : > { %4671 = vmatprep.subr.mxu1 %v881_v47  ;;  %4637 = vmatpush3.msra.mxu0 %v833_v48  ;;  %v932_v44 = vld [vmem:[%s5261_s26 + $0x1540] sm:$0xff]  ;;  %v947_v46 = vld [vmem:[%s5261_s26 + $0x15b8] sm:$0xff] }
 0x161   : > { %4672 = vmatpush3.msra.mxu1 %v865_v49  ;;  %4638 = vmatprep.subr.mxu0 %v848_v51  ;;  %v899_v47 = vld [vmem:[%s5261_s26 + $0x1438] sm:$0xff]  ;;  %v914_v49 = vld [vmem:[%s5261_s26 + $0x14b0] sm:$0xff] }
 0x162   : > { %4673 = vmatprep.subr.mxu1 %v880_v53  ;;  %4639 = vmatpush3.msra.mxu0 %v832_v54  ;;  %v931_v48 = vld [vmem:[%s5261_s26 + $0x1538] sm:$0xff]  ;;  %v898_v51 = vld [vmem:[%s5261_s26 + $0x1430] sm:$0xff]  ;;  %v913_v54 = vld [vmem:[%s5261_s26 + $0x14a8] sm:$0xff] }
 0x163   : > { %4674 = vmatpush3.msra.mxu1 %v864_v55  ;;  %4640 = vmatprep.subr.mxu0 %v847_v56  ;;  %v930_v53 = vld [vmem:[%s5261_s26 + $0x1530] sm:$0xff]  ;;  %v945_v55 = vld [vmem:[%s5261_s26 + $0x15a8] sm:$0xff] }
 0x164   : > { %4675 = vmatprep.subr.mxu1 %v879_v57  ;;  %4641 = vmatpush3.msra.mxu0 %v831_v59  ;;  %v897_v56 = vld [vmem:[%s5261_s26 + $0x1428] sm:$0xff]  ;;  %v912_v59 = vld [vmem:[%s5261_s26 + $0x14a0] sm:$0xff] }
 0x165   : > { %4676 = vmatpush3.msra.mxu1 %v863_v60  ;;  %4642 = vmatprep.subr.mxu0 %v846_v61  ;;  %v929_v57 = vld [vmem:[%s5261_s26 + $0x1528] sm:$0xff]  ;;  %v944_v60 = vld [vmem:[%s5261_s26 + $0x15a0] sm:$0xff] }
 0x166   : > { %4677 = vmatprep.subr.mxu1 %v878_v62  ;;  %4643 = vmatpush3.msra.mxu0 %v830_v0  ;;  %v896_v61 = vld [vmem:[%s5261_s26 + $0x1420] sm:$0xff]  ;;  %v943_v0 = vld [vmem:[%s5261_s26 + $0x1598] sm:$0xff] }
 0x167   : > { %4678 = vmatpush3.msra.mxu1 %v862_v1  ;;  %4644 = vmatprep.subr.mxu0 %v845_v2  ;;  %v928_v62 = vld [vmem:[%s5261_s26 + $0x1520] sm:$0xff]  ;;  %v1462_v1 = vcombine.high %v246_v58, %v246_v58  ;;  %v895_v2 = vld [vmem:[%s5261_s26 + $0x1418] sm:$0xff] }
 0x168   : > { %4679 = vmatprep.subr.mxu1 %v877_v3  ;;  %4645 = vmatpush3.msra.mxu0 %v829_v5  ;;  %v927_v3 = vld [vmem:[%s5261_s26 + $0x1518] sm:$0xff]  ;;  %v942_v5 = vld [vmem:[%s5261_s26 + $0x1590] sm:$0xff] }
 0x169   : > { %4680 = vmatpush3.msra.mxu1 %v861_v6  ;;  %4646 = vmatprep.subr.mxu0 %v844_v7  ;;  %v1469_v6 = vrot.slane %v246_v58, %v5310_v52  ;;  %v894_v7 = vld [vmem:[%s5261_s26 + $0x1410] sm:$0xff] }
 0x16a   : > { %4681 = vmatprep.subr.mxu1 %v876_v8  ;;  %4647 = vmatpush3.msra.mxu0 %v828_v10  ;;  %v926_v8 = vld [vmem:[%s5261_s26 + $0x1510] sm:$0xff]  ;;  %v941_v10 = vld [vmem:[%s5261_s26 + $0x1588] sm:$0xff] }
 0x16b   : > { %2952 = vmatprep.mubr.f32.mxu0 %v1460_v9  ;;  %4682 = vmatpush3.msra.mxu1 %v860_v11  ;;  %v909_v9 = vld [vmem:[%s5261_s26 + $0x1488] sm:$0xff]  ;;  %v1476_v11 = vrot.slane %v1462_v1, %v5310_v52  ;;  %v1010_v58 = vld [vmem:[%s5261_s26 + $0x17b0] sm:$0xff]  ;;  %v247_v1 = vld [vmem:[%s5256_s22 + $0x58] sm:$0xff] }
 0x16c   : > { %2953 = vmatmul.mubr.f32.vlgmr.msra.gmra.mxu0 %v1452_v63  ;;  %3022 = vmatprep.mubr.f32.mxu1 %v1461_v12  ;;  %v911_v63 = vld [vmem:[%s5261_s26 + $0x1498] sm:$0xff]  ;;  %v893_v12 = vld [vmem:[%s5261_s26 + $0x1408] sm:$0xff] }
 0x16d   : > { %4686 = vmatprep.subr.mxu0 %v923_v13  ;;  %4721 = vmatprep.subr.mxu1 %v955_v14  ;;  %v925_v13 = vld [vmem:[%s5261_s26 + $0x1508] sm:$0xff]  ;;  %v908_v14 = vld [vmem:[%s5261_s26 + $0x1480] sm:$0xff] }
 0x16e   : > { %3023 = vmatmul.mubr.f32.vlgmr.msra.gmra.mxu1 %v1459_v4  ;;  %4687 = vmatpush3.msra.mxu0 %v907_v15  ;;  %v910_v4 = vld [vmem:[%s5261_s26 + $0x1490] sm:$0xff]  ;;  %v940_v15 = vld [vmem:[%s5261_s26 + $0x1580] sm:$0xff] }
 0x16f   : > { %4722 = vmatpush3.msra.mxu1 %v939_v16  ;;  %4688 = vmatprep.subr.mxu0 %v922_v17  ;;  %v1477_v16 = vcombine.high %v1469_v6, %v1469_v6  ;;  %v892_v17 = vld [vmem:[%s5261_s26 + $0x1400] sm:$0xff] }
 0x170   : > { %4723 = vmatprep.subr.mxu1 %v954_v18  ;;  %4689 = vmatpush3.msra.mxu0 %v906_v19  ;;  %v924_v18 = vld [vmem:[%s5261_s26 + $0x1500] sm:$0xff]  ;;  %v1478_v19 = vcombine.high %v1476_v11, %v1476_v11 }
 0x171   : > { %4724 = vmatpush3.msra.mxu1 %v938_v20  ;;  %4690 = vmatprep.subr.mxu0 %v921_v21  ;;  %v987_v20 = vld [vmem:[%s5261_s26 + $0x16f8] sm:$0xff] }
 0x172   : > { %4725 = vmatprep.subr.mxu1 %v953_v22  ;;  %4691 = vmatpush3.msra.mxu0 %v905_v23  ;;  %v1019_v21 = vld [vmem:[%s5261_s26 + $0x17f8] sm:$0xff] }
 0x173   : > { %4726 = vmatpush3.msra.mxu1 %v937_v24  ;;  %4692 = vmatprep.subr.mxu0 %v920_v25  ;;  %v971_v22 = vld [vmem:[%s5261_s26 + $0x1678] sm:$0xff]  ;;  %v986_v24 = vld [vmem:[%s5261_s26 + $0x16f0] sm:$0xff] }
 0x174   : > { %4727 = vmatprep.subr.mxu1 %v952_v26  ;;  %4693 = vmatpush3.msra.mxu0 %v904_v27  ;;  %v1003_v23 = vld [vmem:[%s5261_s26 + $0x1778] sm:$0xff]  ;;  %v1018_v25 = vld [vmem:[%s5261_s26 + $0x17f0] sm:$0xff] }
 0x175   : > { %4728 = vmatpush3.msra.mxu1 %v936_v28  ;;  %4694 = vmatprep.subr.mxu0 %v919_v29  ;;  %v970_v26 = vld [vmem:[%s5261_s26 + $0x1670] sm:$0xff]  ;;  %v985_v28 = vld [vmem:[%s5261_s26 + $0x16e8] sm:$0xff] }
 0x176   : > { %4729 = vmatprep.subr.mxu1 %v951_v30  ;;  %4695 = vmatpush3.msra.mxu0 %v903_v31  ;;  %v1002_v27 = vld [vmem:[%s5261_s26 + $0x1770] sm:$0xff]  ;;  %v1017_v29 = vld [vmem:[%s5261_s26 + $0x17e8] sm:$0xff] }
 0x177   : > { %4730 = vmatpush3.msra.mxu1 %v935_v32  ;;  %4696 = vmatprep.subr.mxu0 %v918_v33  ;;  %v969_v30 = vld [vmem:[%s5261_s26 + $0x1668] sm:$0xff]  ;;  %v984_v32 = vld [vmem:[%s5261_s26 + $0x16e0] sm:$0xff] }
 0x178   : > { %4731 = vmatprep.subr.mxu1 %v950_v34  ;;  %4697 = vmatpush3.msra.mxu0 %v902_v35  ;;  %v1001_v31 = vld [vmem:[%s5261_s26 + $0x1768] sm:$0xff]  ;;  %v1016_v33 = vld [vmem:[%s5261_s26 + $0x17e0] sm:$0xff] }
 0x179   : > { %4732 = vmatpush3.msra.mxu1 %v934_v36  ;;  %4698 = vmatprep.subr.mxu0 %v917_v37  ;;  %v968_v34 = vld [vmem:[%s5261_s26 + $0x1660] sm:$0xff]  ;;  %v983_v36 = vld [vmem:[%s5261_s26 + $0x16d8] sm:$0xff] }
 0x17a   : > { %4733 = vmatprep.subr.mxu1 %v949_v38  ;;  %4699 = vmatpush3.msra.mxu0 %v901_v39  ;;  %v1000_v35 = vld [vmem:[%s5261_s26 + $0x1760] sm:$0xff]  ;;  %v1015_v37 = vld [vmem:[%s5261_s26 + $0x17d8] sm:$0xff] }
 0x17b   : > { %4734 = vmatpush3.msra.mxu1 %v933_v40  ;;  %4700 = vmatprep.subr.mxu0 %v916_v41  ;;  %v967_v38 = vld [vmem:[%s5261_s26 + $0x1658] sm:$0xff]  ;;  %v982_v40 = vld [vmem:[%s5261_s26 + $0x16d0] sm:$0xff] }
 0x17c   : > { %4735 = vmatprep.subr.mxu1 %v948_v42  ;;  %4701 = vmatpush3.msra.mxu0 %v900_v43  ;;  %v999_v39 = vld [vmem:[%s5261_s26 + $0x1758] sm:$0xff]  ;;  %v1014_v41 = vld [vmem:[%s5261_s26 + $0x17d0] sm:$0xff] }
 0x17d   : > { %4736 = vmatpush3.msra.mxu1 %v932_v44  ;;  %4702 = vmatprep.subr.mxu0 %v915_v45  ;;  %v966_v42 = vld [vmem:[%s5261_s26 + $0x1650] sm:$0xff]  ;;  %v981_v44 = vld [vmem:[%s5261_s26 + $0x16c8] sm:$0xff] }
 0x17e   : > { %4737 = vmatprep.subr.mxu1 %v947_v46  ;;  %4703 = vmatpush3.msra.mxu0 %v899_v47  ;;  %v998_v43 = vld [vmem:[%s5261_s26 + $0x1750] sm:$0xff]  ;;  %v1013_v45 = vld [vmem:[%s5261_s26 + $0x17c8] sm:$0xff] }
 0x17f   : > { %4738 = vmatpush3.msra.mxu1 %v931_v48  ;;  %4704 = vmatprep.subr.mxu0 %v914_v49  ;;  %v965_v46 = vld [vmem:[%s5261_s26 + $0x1648] sm:$0xff]  ;;  %v980_v48 = vld [vmem:[%s5261_s26 + $0x16c0] sm:$0xff] }
 0x180   : > { %4739 = vmatprep.subr.mxu1 %v946_v50  ;;  %4705 = vmatpush3.msra.mxu0 %v898_v51  ;;  %v997_v47 = vld [vmem:[%s5261_s26 + $0x1748] sm:$0xff]  ;;  %v1012_v49 = vld [vmem:[%s5261_s26 + $0x17c0] sm:$0xff] }
 0x181   : > { %4740 = vmatpush3.msra.mxu1 %v930_v53  ;;  %4706 = vmatprep.subr.mxu0 %v913_v54  ;;  %v964_v50 = vld [vmem:[%s5261_s26 + $0x1640] sm:$0xff]  ;;  %v979_v53 = vld [vmem:[%s5261_s26 + $0x16b8] sm:$0xff] }
 0x182   : > { %4741 = vmatprep.subr.mxu1 %v945_v55  ;;  %4707 = vmatpush3.msra.mxu0 %v897_v56  ;;  %v996_v51 = vld [vmem:[%s5261_s26 + $0x1740] sm:$0xff]  ;;  %v1011_v54 = vld [vmem:[%s5261_s26 + $0x17b8] sm:$0xff] }
 0x183   : > { %4742 = vmatpush3.msra.mxu1 %v929_v57  ;;  %4708 = vmatprep.subr.mxu0 %v912_v59  ;;  %v963_v55 = vld [vmem:[%s5261_s26 + $0x1638] sm:$0xff]  ;;  %v978_v57 = vld [vmem:[%s5261_s26 + $0x16b0] sm:$0xff] }
 0x184   : > { %4743 = vmatprep.subr.mxu1 %v944_v60  ;;  %4709 = vmatpush3.msra.mxu0 %v896_v61  ;;  %v995_v56 = vld [vmem:[%s5261_s26 + $0x1738] sm:$0xff]  ;;  %v962_v59 = vld [vmem:[%s5261_s26 + $0x1630] sm:$0xff]  ;;  %v977_v61 = vld [vmem:[%s5261_s26 + $0x16a8] sm:$0xff] }
 0x185   : > { %4744 = vmatpush3.msra.mxu1 %v928_v62  ;;  %4710 = vmatprep.subr.mxu0 %v911_v63  ;;  %v994_v60 = vld [vmem:[%s5261_s26 + $0x1730] sm:$0xff]  ;;  %v1009_v62 = vld [vmem:[%s5261_s26 + $0x17a8] sm:$0xff] }
 0x186   : > { %4745 = vmatprep.subr.mxu1 %v943_v0  ;;  %4711 = vmatpush3.msra.mxu0 %v895_v2  ;;  %v961_v63 = vld [vmem:[%s5261_s26 + $0x1628] sm:$0xff]  ;;  %v976_v2 = vld [vmem:[%s5261_s26 + $0x16a0] sm:$0xff] }
 0x187   : > { %4746 = vmatpush3.msra.mxu1 %v927_v3  ;;  %4712 = vmatprep.subr.mxu0 %v910_v4  ;;  %v993_v0 = vld [vmem:[%s5261_s26 + $0x1728] sm:$0xff]  ;;  %v1008_v3 = vld [vmem:[%s5261_s26 + $0x17a0] sm:$0xff] }
 0x188   : > { %4747 = vmatprep.subr.mxu1 %v942_v5  ;;  %4713 = vmatpush3.msra.mxu0 %v894_v7  ;;  %v960_v4 = vld [vmem:[%s5261_s26 + $0x1620] sm:$0xff]  ;;  %v1007_v7 = vld [vmem:[%s5261_s26 + $0x1798] sm:$0xff] }
 0x189   : > { %4748 = vmatpush3.msra.mxu1 %v926_v8  ;;  %4714 = vmatprep.subr.mxu0 %v909_v9  ;;  %v992_v5 = vld [vmem:[%s5261_s26 + $0x1720] sm:$0xff]  ;;  %v1479_v8 = vcombine.high %v247_v1, %v247_v1  ;;  %v959_v9 = vld [vmem:[%s5261_s26 + $0x1618] sm:$0xff] }
 0x18a   : > { %4749 = vmatprep.subr.mxu1 %v941_v10  ;;  %4715 = vmatpush3.msra.mxu0 %v893_v12  ;;  %v991_v10 = vld [vmem:[%s5261_s26 + $0x1718] sm:$0xff]  ;;  %v1006_v12 = vld [vmem:[%s5261_s26 + $0x1790] sm:$0xff] }
 0x18b   : > { %4750 = vmatpush3.msra.mxu1 %v925_v13  ;;  %4716 = vmatprep.subr.mxu0 %v908_v14  ;;  %v1486_v13 = vrot.slane %v247_v1, %v5310_v52  ;;  %v958_v14 = vld [vmem:[%s5261_s26 + $0x1610] sm:$0xff] }
 0x18c   : > { %4751 = vmatprep.subr.mxu1 %v940_v15  ;;  %4717 = vmatpush3.msra.mxu0 %v892_v17  ;;  %v990_v15 = vld [vmem:[%s5261_s26 + $0x1710] sm:$0xff]  ;;  %v1005_v17 = vld [vmem:[%s5261_s26 + $0x1788] sm:$0xff] }
 0x18d   : > { %3092 = vmatprep.mubr.f32.mxu0 %v1477_v16  ;;  %4752 = vmatpush3.msra.mxu1 %v924_v18  ;;  %v973_v16 = vld [vmem:[%s5261_s26 + $0x1688] sm:$0xff]  ;;  %v1493_v18 = vrot.slane %v1479_v8, %v5310_v52  ;;  %v1074_v1 = vld [vmem:[%s5261_s26 + $0x19b0] sm:$0xff]  ;;  %v248_v8 = vld [vmem:[%s5256_s22 + $0x60] sm:$0xff] }
 0x18e   : > { %3093 = vmatmul.mubr.f32.vlgmr.msra.gmra.mxu0 %v1469_v6  ;;  %3162 = vmatprep.mubr.f32.mxu1 %v1478_v19  ;;  %v975_v6 = vld [vmem:[%s5261_s26 + $0x1698] sm:$0xff]  ;;  %v957_v19 = vld [vmem:[%s5261_s26 + $0x1608] sm:$0xff] }
 0x18f   : > { %4756 = vmatprep.subr.mxu0 %v987_v20  ;;  %4791 = vmatprep.subr.mxu1 %v1019_v21  ;;  %v989_v20 = vld [vmem:[%s5261_s26 + $0x1708] sm:$0xff]  ;;  %v972_v21 = vld [vmem:[%s5261_s26 + $0x1680] sm:$0xff] }
 0x190   : > { %3163 = vmatmul.mubr.f32.vlgmr.msra.gmra.mxu1 %v1476_v11  ;;  %4757 = vmatpush3.msra.mxu0 %v971_v22  ;;  %v974_v11 = vld [vmem:[%s5261_s26 + $0x1690] sm:$0xff]  ;;  %v1004_v22 = vld [vmem:[%s5261_s26 + $0x1780] sm:$0xff] }
 0x191   : > { %4792 = vmatpush3.msra.mxu1 %v1003_v23  ;;  %4758 = vmatprep.subr.mxu0 %v986_v24  ;;  %v1494_v23 = vcombine.high %v1486_v13, %v1486_v13  ;;  %v956_v24 = vld [vmem:[%s5261_s26 + $0x1600] sm:$0xff] }
 0x192   : > { %4793 = vmatprep.subr.mxu1 %v1018_v25  ;;  %4759 = vmatpush3.msra.mxu0 %v970_v26  ;;  %v988_v25 = vld [vmem:[%s5261_s26 + $0x1700] sm:$0xff]  ;;  %v1495_v26 = vcombine.high %v1493_v18, %v1493_v18 }
 0x193   : > { %4794 = vmatpush3.msra.mxu1 %v1002_v27  ;;  %4760 = vmatprep.subr.mxu0 %v985_v28  ;;  %v1051_v27 = vld [vmem:[%s5261_s26 + $0x18f8] sm:$0xff] }
 0x194   : > { %4795 = vmatprep.subr.mxu1 %v1017_v29  ;;  %4761 = vmatpush3.msra.mxu0 %v969_v30  ;;  %v1083_v28 = vld [vmem:[%s5261_s26 + $0x19f8] sm:$0xff] }
 0x195   : > { %4796 = vmatpush3.msra.mxu1 %v1001_v31  ;;  %4762 = vmatprep.subr.mxu0 %v984_v32  ;;  %v1035_v29 = vld [vmem:[%s5261_s26 + $0x1878] sm:$0xff]  ;;  %v1050_v31 = vld [vmem:[%s5261_s26 + $0x18f0] sm:$0xff] }
 0x196   : > { %4797 = vmatprep.subr.mxu1 %v1016_v33  ;;  %4763 = vmatpush3.msra.mxu0 %v968_v34  ;;  %v1067_v30 = vld [vmem:[%s5261_s26 + $0x1978] sm:$0xff]  ;;  %v1082_v32 = vld [vmem:[%s5261_s26 + $0x19f0] sm:$0xff] }
 0x197   : > { %4798 = vmatpush3.msra.mxu1 %v1000_v35  ;;  %4764 = vmatprep.subr.mxu0 %v983_v36  ;;  %v1034_v33 = vld [vmem:[%s5261_s26 + $0x1870] sm:$0xff]  ;;  %v1049_v35 = vld [vmem:[%s5261_s26 + $0x18e8] sm:$0xff] }
 0x198   : > { %4799 = vmatprep.subr.mxu1 %v1015_v37  ;;  %4765 = vmatpush3.msra.mxu0 %v967_v38  ;;  %v1066_v34 = vld [vmem:[%s5261_s26 + $0x1970] sm:$0xff]  ;;  %v1081_v36 = vld [vmem:[%s5261_s26 + $0x19e8] sm:$0xff] }
 0x199   : > { %4800 = vmatpush3.msra.mxu1 %v999_v39  ;;  %4766 = vmatprep.subr.mxu0 %v982_v40  ;;  %v1033_v37 = vld [vmem:[%s5261_s26 + $0x1868] sm:$0xff]  ;;  %v1048_v39 = vld [vmem:[%s5261_s26 + $0x18e0] sm:$0xff] }
 0x19a   : > { %4801 = vmatprep.subr.mxu1 %v1014_v41  ;;  %4767 = vmatpush3.msra.mxu0 %v966_v42  ;;  %v1065_v38 = vld [vmem:[%s5261_s26 + $0x1968] sm:$0xff]  ;;  %v1080_v40 = vld [vmem:[%s5261_s26 + $0x19e0] sm:$0xff] }
 0x19b   : > { %4802 = vmatpush3.msra.mxu1 %v998_v43  ;;  %4768 = vmatprep.subr.mxu0 %v981_v44  ;;  %v1032_v41 = vld [vmem:[%s5261_s26 + $0x1860] sm:$0xff]  ;;  %v1047_v43 = vld [vmem:[%s5261_s26 + $0x18d8] sm:$0xff] }
 0x19c   : > { %4803 = vmatprep.subr.mxu1 %v1013_v45  ;;  %4769 = vmatpush3.msra.mxu0 %v965_v46  ;;  %v1064_v42 = vld [vmem:[%s5261_s26 + $0x1960] sm:$0xff]  ;;  %v1079_v44 = vld [vmem:[%s5261_s26 + $0x19d8] sm:$0xff] }
 0x19d   : > { %4804 = vmatpush3.msra.mxu1 %v997_v47  ;;  %4770 = vmatprep.subr.mxu0 %v980_v48  ;;  %v1031_v45 = vld [vmem:[%s5261_s26 + $0x1858] sm:$0xff]  ;;  %v1046_v47 = vld [vmem:[%s5261_s26 + $0x18d0] sm:$0xff] }
 0x19e   : > { %4805 = vmatprep.subr.mxu1 %v1012_v49  ;;  %4771 = vmatpush3.msra.mxu0 %v964_v50  ;;  %v1063_v46 = vld [vmem:[%s5261_s26 + $0x1958] sm:$0xff]  ;;  %v1078_v48 = vld [vmem:[%s5261_s26 + $0x19d0] sm:$0xff] }
 0x19f   : > { %4806 = vmatpush3.msra.mxu1 %v996_v51  ;;  %4772 = vmatprep.subr.mxu0 %v979_v53  ;;  %v1030_v49 = vld [vmem:[%s5261_s26 + $0x1850] sm:$0xff]  ;;  %v1045_v51 = vld [vmem:[%s5261_s26 + $0x18c8] sm:$0xff] }
 0x1a0   : > { %4807 = vmatprep.subr.mxu1 %v1011_v54  ;;  %4773 = vmatpush3.msra.mxu0 %v963_v55  ;;  %v1062_v50 = vld [vmem:[%s5261_s26 + $0x1950] sm:$0xff]  ;;  %v1077_v53 = vld [vmem:[%s5261_s26 + $0x19c8] sm:$0xff] }
 0x1a1   : > { %4808 = vmatpush3.msra.mxu1 %v995_v56  ;;  %4774 = vmatprep.subr.mxu0 %v978_v57  ;;  %v1029_v54 = vld [vmem:[%s5261_s26 + $0x1848] sm:$0xff]  ;;  %v1044_v56 = vld [vmem:[%s5261_s26 + $0x18c0] sm:$0xff] }
 0x1a2   : > { %4809 = vmatprep.subr.mxu1 %v1010_v58  ;;  %4775 = vmatpush3.msra.mxu0 %v962_v59  ;;  %v1061_v55 = vld [vmem:[%s5261_s26 + $0x1948] sm:$0xff]  ;;  %v1076_v57 = vld [vmem:[%s5261_s26 + $0x19c0] sm:$0xff] }
 0x1a3   : > { %4810 = vmatpush3.msra.mxu1 %v994_v60  ;;  %4776 = vmatprep.subr.mxu0 %v977_v61  ;;  %v1028_v58 = vld [vmem:[%s5261_s26 + $0x1840] sm:$0xff]  ;;  %v1043_v60 = vld [vmem:[%s5261_s26 + $0x18b8] sm:$0xff] }
 0x1a4   : > { %4811 = vmatprep.subr.mxu1 %v1009_v62  ;;  %4777 = vmatpush3.msra.mxu0 %v961_v63  ;;  %v1060_v59 = vld [vmem:[%s5261_s26 + $0x1940] sm:$0xff]  ;;  %v1075_v61 = vld [vmem:[%s5261_s26 + $0x19b8] sm:$0xff] }
 0x1a5   : > { %4812 = vmatpush3.msra.mxu1 %v993_v0  ;;  %4778 = vmatprep.subr.mxu0 %v976_v2  ;;  %v1027_v62 = vld [vmem:[%s5261_s26 + $0x1838] sm:$0xff]  ;;  %v1042_v0 = vld [vmem:[%s5261_s26 + $0x18b0] sm:$0xff] }
 0x1a6   : > { %4813 = vmatprep.subr.mxu1 %v1008_v3  ;;  %4779 = vmatpush3.msra.mxu0 %v960_v4  ;;  %v1059_v63 = vld [vmem:[%s5261_s26 + $0x1938] sm:$0xff]  ;;  %v1026_v2 = vld [vmem:[%s5261_s26 + $0x1830] sm:$0xff]  ;;  %v1041_v4 = vld [vmem:[%s5261_s26 + $0x18a8] sm:$0xff] }
 0x1a7   : > { %4814 = vmatpush3.msra.mxu1 %v992_v5  ;;  %4780 = vmatprep.subr.mxu0 %v975_v6  ;;  %v1058_v3 = vld [vmem:[%s5261_s26 + $0x1930] sm:$0xff]  ;;  %v1073_v5 = vld [vmem:[%s5261_s26 + $0x19a8] sm:$0xff] }
 0x1a8   : > { %4815 = vmatprep.subr.mxu1 %v1007_v7  ;;  %4781 = vmatpush3.msra.mxu0 %v959_v9  ;;  %v1025_v6 = vld [vmem:[%s5261_s26 + $0x1828] sm:$0xff]  ;;  %v1040_v9 = vld [vmem:[%s5261_s26 + $0x18a0] sm:$0xff] }
 0x1a9   : > { %4816 = vmatpush3.msra.mxu1 %v991_v10  ;;  %4782 = vmatprep.subr.mxu0 %v974_v11  ;;  %v1057_v7 = vld [vmem:[%s5261_s26 + $0x1928] sm:$0xff]  ;;  %v1072_v10 = vld [vmem:[%s5261_s26 + $0x19a0] sm:$0xff] }
 0x1aa   : > { %4817 = vmatprep.subr.mxu1 %v1006_v12  ;;  %4783 = vmatpush3.msra.mxu0 %v958_v14  ;;  %v1024_v11 = vld [vmem:[%s5261_s26 + $0x1820] sm:$0xff]  ;;  %v1071_v14 = vld [vmem:[%s5261_s26 + $0x1998] sm:$0xff] }
 0x1ab   : > { %4818 = vmatpush3.msra.mxu1 %v990_v15  ;;  %4784 = vmatprep.subr.mxu0 %v973_v16  ;;  %v1056_v12 = vld [vmem:[%s5261_s26 + $0x1920] sm:$0xff]  ;;  %v1496_v15 = vcombine.high %v248_v8, %v248_v8  ;;  %v1023_v16 = vld [vmem:[%s5261_s26 + $0x1818] sm:$0xff] }
 0x1ac   : > { %4819 = vmatprep.subr.mxu1 %v1005_v17  ;;  %4785 = vmatpush3.msra.mxu0 %v957_v19  ;;  %v1055_v17 = vld [vmem:[%s5261_s26 + $0x1918] sm:$0xff]  ;;  %v1070_v19 = vld [vmem:[%s5261_s26 + $0x1990] sm:$0xff] }
 0x1ad   : > { %4820 = vmatpush3.msra.mxu1 %v989_v20  ;;  %4786 = vmatprep.subr.mxu0 %v972_v21  ;;  %v1503_v20 = vrot.slane %v248_v8, %v5310_v52  ;;  %v1022_v21 = vld [vmem:[%s5261_s26 + $0x1810] sm:$0xff] }
 0x1ae   : > { %4821 = vmatprep.subr.mxu1 %v1004_v22  ;;  %4787 = vmatpush3.msra.mxu0 %v956_v24  ;;  %v1054_v22 = vld [vmem:[%s5261_s26 + $0x1910] sm:$0xff]  ;;  %v1069_v24 = vld [vmem:[%s5261_s26 + $0x1988] sm:$0xff] }
 0x1af   : > { %3232 = vmatprep.mubr.f32.mxu0 %v1494_v23  ;;  %4822 = vmatpush3.msra.mxu1 %v988_v25  ;;  %v1037_v23 = vld [vmem:[%s5261_s26 + $0x1888] sm:$0xff]  ;;  %v1510_v25 = vrot.slane %v1496_v15, %v5310_v52  ;;  %v1138_v8 = vld [vmem:[%s5261_s26 + $0x1bb0] sm:$0xff] }
 0x1b0   : > { %3233 = vmatmul.mubr.f32.vlgmr.msra.gmra.mxu0 %v1486_v13  ;;  %3302 = vmatprep.mubr.f32.mxu1 %v1495_v26  ;;  %v1039_v13 = vld [vmem:[%s5261_s26 + $0x1898] sm:$0xff]  ;;  %v1021_v26 = vld [vmem:[%s5261_s26 + $0x1808] sm:$0xff] }
 0x1b1   : > { %4826 = vmatprep.subr.mxu0 %v1051_v27  ;;  %4861 = vmatprep.subr.mxu1 %v1083_v28  ;;  %v1053_v27 = vld [vmem:[%s5261_s26 + $0x1908] sm:$0xff]  ;;  %v1036_v28 = vld [vmem:[%s5261_s26 + $0x1880] sm:$0xff] }
 0x1b2   : > { %3303 = vmatmul.mubr.f32.vlgmr.msra.gmra.mxu1 %v1493_v18  ;;  %4827 = vmatpush3.msra.mxu0 %v1035_v29  ;;  %v1038_v18 = vld [vmem:[%s5261_s26 + $0x1890] sm:$0xff]  ;;  %v1068_v29 = vld [vmem:[%s5261_s26 + $0x1980] sm:$0xff]  ;;  %v249_v15 = vld [vmem:[%s5256_s22 + $0x68] sm:$0xff] }
 0x1b3   : > { %4862 = vmatpush3.msra.mxu1 %v1067_v30  ;;  %4828 = vmatprep.subr.mxu0 %v1050_v31  ;;  %v1511_v30 = vcombine.high %v1503_v20, %v1503_v20  ;;  %v1020_v31 = vld [vmem:[%s5261_s26 + $0x1800] sm:$0xff] }
 0x1b4   : > { %4863 = vmatprep.subr.mxu1 %v1082_v32  ;;  %4829 = vmatpush3.msra.mxu0 %v1034_v33  ;;  %v1052_v32 = vld [vmem:[%s5261_s26 + $0x1900] sm:$0xff]  ;;  %v1512_v33 = vcombine.high %v1510_v25, %v1510_v25 }
 0x1b5   : > { %4864 = vmatpush3.msra.mxu1 %v1066_v34  ;;  %4830 = vmatprep.subr.mxu0 %v1049_v35  ;;  %v1115_v34 = vld [vmem:[%s5261_s26 + $0x1af8] sm:$0xff] }
 0x1b6   : > { %4865 = vmatprep.subr.mxu1 %v1081_v36  ;;  %4831 = vmatpush3.msra.mxu0 %v1033_v37  ;;  %v1147_v35 = vld [vmem:[%s5261_s26 + $0x1bf8] sm:$0xff] }
 0x1b7   : > { %4866 = vmatpush3.msra.mxu1 %v1065_v38  ;;  %4832 = vmatprep.subr.mxu0 %v1048_v39  ;;  %v1099_v36 = vld [vmem:[%s5261_s26 + $0x1a78] sm:$0xff]  ;;  %v1114_v38 = vld [vmem:[%s5261_s26 + $0x1af0] sm:$0xff] }
 0x1b8   : > { %4867 = vmatprep.subr.mxu1 %v1080_v40  ;;  %4833 = vmatpush3.msra.mxu0 %v1032_v41  ;;  %v1131_v37 = vld [vmem:[%s5261_s26 + $0x1b78] sm:$0xff]  ;;  %v1146_v39 = vld [vmem:[%s5261_s26 + $0x1bf0] sm:$0xff] }
 0x1b9   : > { %4868 = vmatpush3.msra.mxu1 %v1064_v42  ;;  %4834 = vmatprep.subr.mxu0 %v1047_v43  ;;  %v1098_v40 = vld [vmem:[%s5261_s26 + $0x1a70] sm:$0xff]  ;;  %v1113_v42 = vld [vmem:[%s5261_s26 + $0x1ae8] sm:$0xff] }
 0x1ba   : > { %4869 = vmatprep.subr.mxu1 %v1079_v44  ;;  %4835 = vmatpush3.msra.mxu0 %v1031_v45  ;;  %v1130_v41 = vld [vmem:[%s5261_s26 + $0x1b70] sm:$0xff]  ;;  %v1145_v43 = vld [vmem:[%s5261_s26 + $0x1be8] sm:$0xff] }
 0x1bb   : > { %4870 = vmatpush3.msra.mxu1 %v1063_v46  ;;  %4836 = vmatprep.subr.mxu0 %v1046_v47  ;;  %v1097_v44 = vld [vmem:[%s5261_s26 + $0x1a68] sm:$0xff]  ;;  %v1112_v46 = vld [vmem:[%s5261_s26 + $0x1ae0] sm:$0xff] }
 0x1bc   : > { %4871 = vmatprep.subr.mxu1 %v1078_v48  ;;  %4837 = vmatpush3.msra.mxu0 %v1030_v49  ;;  %v1129_v45 = vld [vmem:[%s5261_s26 + $0x1b68] sm:$0xff]  ;;  %v1144_v47 = vld [vmem:[%s5261_s26 + $0x1be0] sm:$0xff] }
 0x1bd   : > { %4872 = vmatpush3.msra.mxu1 %v1062_v50  ;;  %4838 = vmatprep.subr.mxu0 %v1045_v51  ;;  %v1096_v48 = vld [vmem:[%s5261_s26 + $0x1a60] sm:$0xff]  ;;  %v1111_v50 = vld [vmem:[%s5261_s26 + $0x1ad8] sm:$0xff] }
 0x1be   : > { %4873 = vmatprep.subr.mxu1 %v1077_v53  ;;  %4839 = vmatpush3.msra.mxu0 %v1029_v54  ;;  %v1128_v49 = vld [vmem:[%s5261_s26 + $0x1b60] sm:$0xff]  ;;  %v1143_v51 = vld [vmem:[%s5261_s26 + $0x1bd8] sm:$0xff] }
 0x1bf   : > { %4874 = vmatpush3.msra.mxu1 %v1061_v55  ;;  %4840 = vmatprep.subr.mxu0 %v1044_v56  ;;  %v1095_v53 = vld [vmem:[%s5261_s26 + $0x1a58] sm:$0xff]  ;;  %v1110_v55 = vld [vmem:[%s5261_s26 + $0x1ad0] sm:$0xff] }
 0x1c0   : > { %4875 = vmatprep.subr.mxu1 %v1076_v57  ;;  %4841 = vmatpush3.msra.mxu0 %v1028_v58  ;;  %v1127_v54 = vld [vmem:[%s5261_s26 + $0x1b58] sm:$0xff]  ;;  %v1142_v56 = vld [vmem:[%s5261_s26 + $0x1bd0] sm:$0xff] }
 0x1c1   : > { %4876 = vmatpush3.msra.mxu1 %v1060_v59  ;;  %4842 = vmatprep.subr.mxu0 %v1043_v60  ;;  %v1094_v57 = vld [vmem:[%s5261_s26 + $0x1a50] sm:$0xff]  ;;  %v1109_v59 = vld [vmem:[%s5261_s26 + $0x1ac8] sm:$0xff] }
 0x1c2   : > { %4877 = vmatprep.subr.mxu1 %v1075_v61  ;;  %4843 = vmatpush3.msra.mxu0 %v1027_v62  ;;  %v1126_v58 = vld [vmem:[%s5261_s26 + $0x1b50] sm:$0xff]  ;;  %v1141_v60 = vld [vmem:[%s5261_s26 + $0x1bc8] sm:$0xff] }
 0x1c3   : > { %4878 = vmatpush3.msra.mxu1 %v1059_v63  ;;  %4844 = vmatprep.subr.mxu0 %v1042_v0  ;;  %v1093_v61 = vld [vmem:[%s5261_s26 + $0x1a48] sm:$0xff]  ;;  %v1108_v63 = vld [vmem:[%s5261_s26 + $0x1ac0] sm:$0xff] }
 0x1c4   : > { %4879 = vmatprep.subr.mxu1 %v1074_v1  ;;  %4845 = vmatpush3.msra.mxu0 %v1026_v2  ;;  %v1125_v62 = vld [vmem:[%s5261_s26 + $0x1b48] sm:$0xff]  ;;  %v1140_v0 = vld [vmem:[%s5261_s26 + $0x1bc0] sm:$0xff] }
 0x1c5   : > { %4880 = vmatpush3.msra.mxu1 %v1058_v3  ;;  %4846 = vmatprep.subr.mxu0 %v1041_v4  ;;  %v1092_v1 = vld [vmem:[%s5261_s26 + $0x1a40] sm:$0xff]  ;;  %v1107_v3 = vld [vmem:[%s5261_s26 + $0x1ab8] sm:$0xff] }
 0x1c6   : > { %4881 = vmatprep.subr.mxu1 %v1073_v5  ;;  %4847 = vmatpush3.msra.mxu0 %v1025_v6  ;;  %v1124_v2 = vld [vmem:[%s5261_s26 + $0x1b40] sm:$0xff]  ;;  %v1139_v4 = vld [vmem:[%s5261_s26 + $0x1bb8] sm:$0xff] }
 0x1c7   : > { %4882 = vmatpush3.msra.mxu1 %v1057_v7  ;;  %4848 = vmatprep.subr.mxu0 %v1040_v9  ;;  %v1091_v5 = vld [vmem:[%s5261_s26 + $0x1a38] sm:$0xff]  ;;  %v1106_v7 = vld [vmem:[%s5261_s26 + $0x1ab0] sm:$0xff] }
 0x1c8   : > { %4883 = vmatprep.subr.mxu1 %v1072_v10  ;;  %4849 = vmatpush3.msra.mxu0 %v1024_v11  ;;  %v1123_v6 = vld [vmem:[%s5261_s26 + $0x1b38] sm:$0xff]  ;;  %v1090_v9 = vld [vmem:[%s5261_s26 + $0x1a30] sm:$0xff]  ;;  %v1105_v11 = vld [vmem:[%s5261_s26 + $0x1aa8] sm:$0xff] }
 0x1c9   : > { %4884 = vmatpush3.msra.mxu1 %v1056_v12  ;;  %4850 = vmatprep.subr.mxu0 %v1039_v13  ;;  %v1122_v10 = vld [vmem:[%s5261_s26 + $0x1b30] sm:$0xff]  ;;  %v1137_v12 = vld [vmem:[%s5261_s26 + $0x1ba8] sm:$0xff] }
 0x1ca   : > { %4885 = vmatprep.subr.mxu1 %v1071_v14  ;;  %4851 = vmatpush3.msra.mxu0 %v1023_v16  ;;  %v1089_v13 = vld [vmem:[%s5261_s26 + $0x1a28] sm:$0xff]  ;;  %v1104_v16 = vld [vmem:[%s5261_s26 + $0x1aa0] sm:$0xff] }
 0x1cb   : > { %4886 = vmatpush3.msra.mxu1 %v1055_v17  ;;  %4852 = vmatprep.subr.mxu0 %v1038_v18  ;;  %v1121_v14 = vld [vmem:[%s5261_s26 + $0x1b28] sm:$0xff]  ;;  %v1136_v17 = vld [vmem:[%s5261_s26 + $0x1ba0] sm:$0xff] }
 0x1cc   : > { %4887 = vmatprep.subr.mxu1 %v1070_v19  ;;  %4853 = vmatpush3.msra.mxu0 %v1022_v21  ;;  %v1088_v18 = vld [vmem:[%s5261_s26 + $0x1a20] sm:$0xff]  ;;  %v1135_v21 = vld [vmem:[%s5261_s26 + $0x1b98] sm:$0xff] }
 0x1cd   : > { %4888 = vmatpush3.msra.mxu1 %v1054_v22  ;;  %4854 = vmatprep.subr.mxu0 %v1037_v23  ;;  %v1120_v19 = vld [vmem:[%s5261_s26 + $0x1b20] sm:$0xff]  ;;  %v1513_v22 = vcombine.high %v249_v15, %v249_v15  ;;  %v1087_v23 = vld [vmem:[%s5261_s26 + $0x1a18] sm:$0xff] }
 0x1ce   : > { %4889 = vmatprep.subr.mxu1 %v1069_v24  ;;  %4855 = vmatpush3.msra.mxu0 %v1021_v26  ;;  %v1119_v24 = vld [vmem:[%s5261_s26 + $0x1b18] sm:$0xff]  ;;  %v1134_v26 = vld [vmem:[%s5261_s26 + $0x1b90] sm:$0xff] }
 0x1cf   : > { %4890 = vmatpush3.msra.mxu1 %v1053_v27  ;;  %4856 = vmatprep.subr.mxu0 %v1036_v28  ;;  %v1520_v27 = vrot.slane %v249_v15, %v5310_v52  ;;  %v1086_v28 = vld [vmem:[%s5261_s26 + $0x1a10] sm:$0xff] }
 0x1d0   : > { %4891 = vmatprep.subr.mxu1 %v1068_v29  ;;  %4857 = vmatpush3.msra.mxu0 %v1020_v31  ;;  %v1118_v29 = vld [vmem:[%s5261_s26 + $0x1b10] sm:$0xff]  ;;  %v1133_v31 = vld [vmem:[%s5261_s26 + $0x1b88] sm:$0xff] }
 0x1d1   : > { %3372 = vmatprep.mubr.f32.mxu0 %v1511_v30  ;;  %4892 = vmatpush3.msra.mxu1 %v1052_v32  ;;  %v1101_v30 = vld [vmem:[%s5261_s26 + $0x1a88] sm:$0xff]  ;;  %v1527_v32 = vrot.slane %v1513_v22, %v5310_v52  ;;  %v1202_v15 = vld [vmem:[%s5261_s26 + $0x1db0] sm:$0xff] }
 0x1d2   : > { %3373 = vmatmul.mubr.f32.vlgmr.msra.gmra.mxu0 %v1503_v20  ;;  %3442 = vmatprep.mubr.f32.mxu1 %v1512_v33  ;;  %v1103_v20 = vld [vmem:[%s5261_s26 + $0x1a98] sm:$0xff]  ;;  %v1085_v33 = vld [vmem:[%s5261_s26 + $0x1a08] sm:$0xff]  ;;  %v250_v22 = vld [vmem:[%s5256_s22 + $0x70] sm:$0xff] }
 0x1d3   : > { %4896 = vmatprep.subr.mxu0 %v1115_v34  ;;  %4931 = vmatprep.subr.mxu1 %v1147_v35  ;;  %v1117_v34 = vld [vmem:[%s5261_s26 + $0x1b08] sm:$0xff]  ;;  %v1100_v35 = vld [vmem:[%s5261_s26 + $0x1a80] sm:$0xff] }
 0x1d4   : > { %3443 = vmatmul.mubr.f32.vlgmr.msra.gmra.mxu1 %v1510_v25  ;;  %4897 = vmatpush3.msra.mxu0 %v1099_v36  ;;  %v1102_v25 = vld [vmem:[%s5261_s26 + $0x1a90] sm:$0xff]  ;;  %v1132_v36 = vld [vmem:[%s5261_s26 + $0x1b80] sm:$0xff] }
 0x1d5   : > { %4932 = vmatpush3.msra.mxu1 %v1131_v37  ;;  %4898 = vmatprep.subr.mxu0 %v1114_v38  ;;  %v1528_v37 = vcombine.high %v1520_v27, %v1520_v27  ;;  %v1084_v38 = vld [vmem:[%s5261_s26 + $0x1a00] sm:$0xff] }
 0x1d6   : > { %4933 = vmatprep.subr.mxu1 %v1146_v39  ;;  %4899 = vmatpush3.msra.mxu0 %v1098_v40  ;;  %v1116_v39 = vld [vmem:[%s5261_s26 + $0x1b00] sm:$0xff]  ;;  %v1529_v40 = vcombine.high %v1527_v32, %v1527_v32 }
 0x1d7   : > { %4934 = vmatpush3.msra.mxu1 %v1130_v41  ;;  %4900 = vmatprep.subr.mxu0 %v1113_v42  ;;  %v1179_v41 = vld [vmem:[%s5261_s26 + $0x1cf8] sm:$0xff] }
 0x1d8   : > { %4935 = vmatprep.subr.mxu1 %v1145_v43  ;;  %4901 = vmatpush3.msra.mxu0 %v1097_v44  ;;  %v1211_v42 = vld [vmem:[%s5261_s26 + $0x1df8] sm:$0xff] }
 0x1d9   : > { %4936 = vmatpush3.msra.mxu1 %v1129_v45  ;;  %4902 = vmatprep.subr.mxu0 %v1112_v46  ;;  %v1163_v43 = vld [vmem:[%s5261_s26 + $0x1c78] sm:$0xff]  ;;  %v1178_v45 = vld [vmem:[%s5261_s26 + $0x1cf0] sm:$0xff] }
 0x1da   : > { %4937 = vmatprep.subr.mxu1 %v1144_v47  ;;  %4903 = vmatpush3.msra.mxu0 %v1096_v48  ;;  %v1195_v44 = vld [vmem:[%s5261_s26 + $0x1d78] sm:$0xff]  ;;  %v1210_v46 = vld [vmem:[%s5261_s26 + $0x1df0] sm:$0xff] }
 0x1db   : > { %4938 = vmatpush3.msra.mxu1 %v1128_v49  ;;  %4904 = vmatprep.subr.mxu0 %v1111_v50  ;;  %v1162_v47 = vld [vmem:[%s5261_s26 + $0x1c70] sm:$0xff]  ;;  %v1177_v49 = vld [vmem:[%s5261_s26 + $0x1ce8] sm:$0xff] }
 0x1dc   : > { %4939 = vmatprep.subr.mxu1 %v1143_v51  ;;  %4905 = vmatpush3.msra.mxu0 %v1095_v53  ;;  %v1194_v48 = vld [vmem:[%s5261_s26 + $0x1d70] sm:$0xff]  ;;  %v1209_v50 = vld [vmem:[%s5261_s26 + $0x1de8] sm:$0xff] }
 0x1dd   : > { %4940 = vmatpush3.msra.mxu1 %v1127_v54  ;;  %4906 = vmatprep.subr.mxu0 %v1110_v55  ;;  %v1161_v51 = vld [vmem:[%s5261_s26 + $0x1c68] sm:$0xff]  ;;  %v1176_v54 = vld [vmem:[%s5261_s26 + $0x1ce0] sm:$0xff] }
 0x1de   : > { %4941 = vmatprep.subr.mxu1 %v1142_v56  ;;  %4907 = vmatpush3.msra.mxu0 %v1094_v57  ;;  %v1193_v53 = vld [vmem:[%s5261_s26 + $0x1d68] sm:$0xff]  ;;  %v1208_v55 = vld [vmem:[%s5261_s26 + $0x1de0] sm:$0xff] }
 0x1df   : > { %4942 = vmatpush3.msra.mxu1 %v1126_v58  ;;  %4908 = vmatprep.subr.mxu0 %v1109_v59  ;;  %v1160_v56 = vld [vmem:[%s5261_s26 + $0x1c60] sm:$0xff]  ;;  %v1175_v58 = vld [vmem:[%s5261_s26 + $0x1cd8] sm:$0xff] }
 0x1e0   : > { %4943 = vmatprep.subr.mxu1 %v1141_v60  ;;  %4909 = vmatpush3.msra.mxu0 %v1093_v61  ;;  %v1192_v57 = vld [vmem:[%s5261_s26 + $0x1d60] sm:$0xff]  ;;  %v1207_v59 = vld [vmem:[%s5261_s26 + $0x1dd8] sm:$0xff] }
 0x1e1   : > { %4944 = vmatpush3.msra.mxu1 %v1125_v62  ;;  %4910 = vmatprep.subr.mxu0 %v1108_v63  ;;  %v1159_v60 = vld [vmem:[%s5261_s26 + $0x1c58] sm:$0xff]  ;;  %v1174_v62 = vld [vmem:[%s5261_s26 + $0x1cd0] sm:$0xff] }
 0x1e2   : > { %4945 = vmatprep.subr.mxu1 %v1140_v0  ;;  %4911 = vmatpush3.msra.mxu0 %v1092_v1  ;;  %v1191_v61 = vld [vmem:[%s5261_s26 + $0x1d58] sm:$0xff]  ;;  %v1206_v63 = vld [vmem:[%s5261_s26 + $0x1dd0] sm:$0xff] }
 0x1e3   : > { %4946 = vmatpush3.msra.mxu1 %v1124_v2  ;;  %4912 = vmatprep.subr.mxu0 %v1107_v3  ;;  %v1158_v0 = vld [vmem:[%s5261_s26 + $0x1c50] sm:$0xff]  ;;  %v1173_v2 = vld [vmem:[%s5261_s26 + $0x1cc8] sm:$0xff] }
 0x1e4   : > { %4947 = vmatprep.subr.mxu1 %v1139_v4  ;;  %4913 = vmatpush3.msra.mxu0 %v1091_v5  ;;  %v1190_v1 = vld [vmem:[%s5261_s26 + $0x1d50] sm:$0xff]  ;;  %v1205_v3 = vld [vmem:[%s5261_s26 + $0x1dc8] sm:$0xff] }
 0x1e5   : > { %4948 = vmatpush3.msra.mxu1 %v1123_v6  ;;  %4914 = vmatprep.subr.mxu0 %v1106_v7  ;;  %v1157_v4 = vld [vmem:[%s5261_s26 + $0x1c48] sm:$0xff]  ;;  %v1172_v6 = vld [vmem:[%s5261_s26 + $0x1cc0] sm:$0xff] }
 0x1e6   : > { %4949 = vmatprep.subr.mxu1 %v1138_v8  ;;  %4915 = vmatpush3.msra.mxu0 %v1090_v9  ;;  %v1189_v5 = vld [vmem:[%s5261_s26 + $0x1d48] sm:$0xff]  ;;  %v1204_v7 = vld [vmem:[%s5261_s26 + $0x1dc0] sm:$0xff] }
 0x1e7   : > { %4950 = vmatpush3.msra.mxu1 %v1122_v10  ;;  %4916 = vmatprep.subr.mxu0 %v1105_v11  ;;  %v1156_v8 = vld [vmem:[%s5261_s26 + $0x1c40] sm:$0xff]  ;;  %v1171_v10 = vld [vmem:[%s5261_s26 + $0x1cb8] sm:$0xff] }
 0x1e8   : > { %4951 = vmatprep.subr.mxu1 %v1137_v12  ;;  %4917 = vmatpush3.msra.mxu0 %v1089_v13  ;;  %v1188_v9 = vld [vmem:[%s5261_s26 + $0x1d40] sm:$0xff]  ;;  %v1203_v11 = vld [vmem:[%s5261_s26 + $0x1db8] sm:$0xff] }
 0x1e9   : > { %4952 = vmatpush3.msra.mxu1 %v1121_v14  ;;  %4918 = vmatprep.subr.mxu0 %v1104_v16  ;;  %v1155_v12 = vld [vmem:[%s5261_s26 + $0x1c38] sm:$0xff]  ;;  %v1170_v14 = vld [vmem:[%s5261_s26 + $0x1cb0] sm:$0xff] }
 0x1ea   : > { %4953 = vmatprep.subr.mxu1 %v1136_v17  ;;  %4919 = vmatpush3.msra.mxu0 %v1088_v18  ;;  %v1187_v13 = vld [vmem:[%s5261_s26 + $0x1d38] sm:$0xff]  ;;  %v1154_v16 = vld [vmem:[%s5261_s26 + $0x1c30] sm:$0xff]  ;;  %v1169_v18 = vld [vmem:[%s5261_s26 + $0x1ca8] sm:$0xff] }
 0x1eb   : > { %4954 = vmatpush3.msra.mxu1 %v1120_v19  ;;  %4920 = vmatprep.subr.mxu0 %v1103_v20  ;;  %v1186_v17 = vld [vmem:[%s5261_s26 + $0x1d30] sm:$0xff]  ;;  %v1201_v19 = vld [vmem:[%s5261_s26 + $0x1da8] sm:$0xff] }
 0x1ec   : > { %4955 = vmatprep.subr.mxu1 %v1135_v21  ;;  %4921 = vmatpush3.msra.mxu0 %v1087_v23  ;;  %v1153_v20 = vld [vmem:[%s5261_s26 + $0x1c28] sm:$0xff]  ;;  %v1168_v23 = vld [vmem:[%s5261_s26 + $0x1ca0] sm:$0xff] }
 0x1ed   : > { %4956 = vmatpush3.msra.mxu1 %v1119_v24  ;;  %4922 = vmatprep.subr.mxu0 %v1102_v25  ;;  %v1185_v21 = vld [vmem:[%s5261_s26 + $0x1d28] sm:$0xff]  ;;  %v1200_v24 = vld [vmem:[%s5261_s26 + $0x1da0] sm:$0xff] }
 0x1ee   : > { %4957 = vmatprep.subr.mxu1 %v1134_v26  ;;  %4923 = vmatpush3.msra.mxu0 %v1086_v28  ;;  %v1152_v25 = vld [vmem:[%s5261_s26 + $0x1c20] sm:$0xff]  ;;  %v1199_v28 = vld [vmem:[%s5261_s26 + $0x1d98] sm:$0xff] }
 0x1ef   : > { %4958 = vmatpush3.msra.mxu1 %v1118_v29  ;;  %4924 = vmatprep.subr.mxu0 %v1101_v30  ;;  %v1184_v26 = vld [vmem:[%s5261_s26 + $0x1d20] sm:$0xff]  ;;  %v1530_v29 = vcombine.high %v250_v22, %v250_v22  ;;  %v1151_v30 = vld [vmem:[%s5261_s26 + $0x1c18] sm:$0xff] }
 0x1f0   : > { %4959 = vmatprep.subr.mxu1 %v1133_v31  ;;  %4925 = vmatpush3.msra.mxu0 %v1085_v33  ;;  %v1183_v31 = vld [vmem:[%s5261_s26 + $0x1d18] sm:$0xff]  ;;  %v1198_v33 = vld [vmem:[%s5261_s26 + $0x1d90] sm:$0xff] }
 0x1f1   : > { %4960 = vmatpush3.msra.mxu1 %v1117_v34  ;;  %4926 = vmatprep.subr.mxu0 %v1100_v35  ;;  %v1537_v34 = vrot.slane %v250_v22, %v5310_v52  ;;  %v1150_v35 = vld [vmem:[%s5261_s26 + $0x1c10] sm:$0xff] }
 0x1f2   : > { %4961 = vmatprep.subr.mxu1 %v1132_v36  ;;  %4927 = vmatpush3.msra.mxu0 %v1084_v38  ;;  %v1182_v36 = vld [vmem:[%s5261_s26 + $0x1d10] sm:$0xff]  ;;  %v1197_v38 = vld [vmem:[%s5261_s26 + $0x1d88] sm:$0xff] }
 0x1f3   : > { %3512 = vmatprep.mubr.f32.mxu0 %v1528_v37  ;;  %4962 = vmatpush3.msra.mxu1 %v1116_v39  ;;  %v1165_v37 = vld [vmem:[%s5261_s26 + $0x1c88] sm:$0xff]  ;;  %v1544_v39 = vrot.slane %v1530_v29, %v5310_v52  ;;  %v1266_v22 = vld [vmem:[%s5261_s26 + $0x1fb0] sm:$0xff] }
 0x1f4   : > { %3513 = vmatmul.mubr.f32.vlgmr.msra.gmra.mxu0 %v1520_v27  ;;  %3582 = vmatprep.mubr.f32.mxu1 %v1529_v40  ;;  %v1167_v27 = vld [vmem:[%s5261_s26 + $0x1c98] sm:$0xff]  ;;  %v1149_v40 = vld [vmem:[%s5261_s26 + $0x1c08] sm:$0xff] }
 0x1f5   : > { %4966 = vmatprep.subr.mxu0 %v1179_v41  ;;  %5001 = vmatprep.subr.mxu1 %v1211_v42  ;;  %v1181_v41 = vld [vmem:[%s5261_s26 + $0x1d08] sm:$0xff]  ;;  %v1164_v42 = vld [vmem:[%s5261_s26 + $0x1c80] sm:$0xff] }
 0x1f6   : > { %3583 = vmatmul.mubr.f32.vlgmr.msra.gmra.mxu1 %v1527_v32  ;;  %4967 = vmatpush3.msra.mxu0 %v1163_v43  ;;  %v1166_v32 = vld [vmem:[%s5261_s26 + $0x1c90] sm:$0xff]  ;;  %v1196_v43 = vld [vmem:[%s5261_s26 + $0x1d80] sm:$0xff]  ;;  %v1249_v29 = vld [vmem:[%s5261_s26 + $0x1f28] sm:$0xff] }
 0x1f7   : > { %5002 = vmatpush3.msra.mxu1 %v1195_v44  ;;  %4968 = vmatprep.subr.mxu0 %v1178_v45  ;;  %v1545_v44 = vcombine.high %v1537_v34, %v1537_v34  ;;  %v1148_v45 = vld [vmem:[%s5261_s26 + $0x1c00] sm:$0xff] }
 0x1f8   : > { %5003 = vmatprep.subr.mxu1 %v1210_v46  ;;  %4969 = vmatpush3.msra.mxu0 %v1162_v47  ;;  %v1180_v46 = vld [vmem:[%s5261_s26 + $0x1d00] sm:$0xff]  ;;  %v1546_v47 = vcombine.high %v1544_v39, %v1544_v39 }
 0x1f9   : > { %5004 = vmatpush3.msra.mxu1 %v1194_v48  ;;  %4970 = vmatprep.subr.mxu0 %v1177_v49  ;;  %v1243_v48 = vld [vmem:[%s5261_s26 + $0x1ef8] sm:$0xff] }
 0x1fa   : > { %5005 = vmatprep.subr.mxu1 %v1209_v50  ;;  %4971 = vmatpush3.msra.mxu0 %v1161_v51  ;;  %v1275_v49 = vld [vmem:[%s5261_s26 + $0x1ff8] sm:$0xff] }
 0x1fb   : > { %5006 = vmatpush3.msra.mxu1 %v1193_v53  ;;  %4972 = vmatprep.subr.mxu0 %v1176_v54  ;;  %v1227_v50 = vld [vmem:[%s5261_s26 + $0x1e78] sm:$0xff]  ;;  %v1242_v53 = vld [vmem:[%s5261_s26 + $0x1ef0] sm:$0xff] }
 0x1fc   : > { %5007 = vmatprep.subr.mxu1 %v1208_v55  ;;  %4973 = vmatpush3.msra.mxu0 %v1160_v56  ;;  %v1259_v51 = vld [vmem:[%s5261_s26 + $0x1f78] sm:$0xff]  ;;  %v1274_v54 = vld [vmem:[%s5261_s26 + $0x1ff0] sm:$0xff] }
 0x1fd   : > { %5008 = vmatpush3.msra.mxu1 %v1192_v57  ;;  %4974 = vmatprep.subr.mxu0 %v1175_v58  ;;  %v1226_v55 = vld [vmem:[%s5261_s26 + $0x1e70] sm:$0xff]  ;;  %v1241_v57 = vld [vmem:[%s5261_s26 + $0x1ee8] sm:$0xff] }
 0x1fe   : > { %5009 = vmatprep.subr.mxu1 %v1207_v59  ;;  %4975 = vmatpush3.msra.mxu0 %v1159_v60  ;;  %v1258_v56 = vld [vmem:[%s5261_s26 + $0x1f70] sm:$0xff]  ;;  %v1273_v58 = vld [vmem:[%s5261_s26 + $0x1fe8] sm:$0xff] }
 0x1ff   : > { %5010 = vmatpush3.msra.mxu1 %v1191_v61  ;;  %4976 = vmatprep.subr.mxu0 %v1174_v62  ;;  %v1225_v59 = vld [vmem:[%s5261_s26 + $0x1e68] sm:$0xff]  ;;  %v1240_v61 = vld [vmem:[%s5261_s26 + $0x1ee0] sm:$0xff] }
 0x200   : > { %5011 = vmatprep.subr.mxu1 %v1206_v63  ;;  %4977 = vmatpush3.msra.mxu0 %v1158_v0  ;;  %v1257_v60 = vld [vmem:[%s5261_s26 + $0x1f68] sm:$0xff]  ;;  %v1272_v62 = vld [vmem:[%s5261_s26 + $0x1fe0] sm:$0xff] }
 0x201   : > { %5012 = vmatpush3.msra.mxu1 %v1190_v1  ;;  %4978 = vmatprep.subr.mxu0 %v1173_v2  ;;  %v1224_v63 = vld [vmem:[%s5261_s26 + $0x1e60] sm:$0xff]  ;;  %v1239_v1 = vld [vmem:[%s5261_s26 + $0x1ed8] sm:$0xff] }
 0x202   : > { %5013 = vmatprep.subr.mxu1 %v1205_v3  ;;  %4979 = vmatpush3.msra.mxu0 %v1157_v4  ;;  %v1256_v0 = vld [vmem:[%s5261_s26 + $0x1f60] sm:$0xff]  ;;  %v1271_v2 = vld [vmem:[%s5261_s26 + $0x1fd8] sm:$0xff] }
 0x203   : > { %5014 = vmatpush3.msra.mxu1 %v1189_v5  ;;  %4980 = vmatprep.subr.mxu0 %v1172_v6  ;;  %v1223_v3 = vld [vmem:[%s5261_s26 + $0x1e58] sm:$0xff]  ;;  %v1238_v5 = vld [vmem:[%s5261_s26 + $0x1ed0] sm:$0xff] }
 0x204   : > { %5015 = vmatprep.subr.mxu1 %v1204_v7  ;;  %4981 = vmatpush3.msra.mxu0 %v1156_v8  ;;  %v1255_v4 = vld [vmem:[%s5261_s26 + $0x1f58] sm:$0xff]  ;;  %v1270_v6 = vld [vmem:[%s5261_s26 + $0x1fd0] sm:$0xff] }
 0x205   : > { %5016 = vmatpush3.msra.mxu1 %v1188_v9  ;;  %4982 = vmatprep.subr.mxu0 %v1171_v10  ;;  %v1222_v7 = vld [vmem:[%s5261_s26 + $0x1e50] sm:$0xff]  ;;  %v1237_v9 = vld [vmem:[%s5261_s26 + $0x1ec8] sm:$0xff] }
 0x206   : > { %5017 = vmatprep.subr.mxu1 %v1203_v11  ;;  %4983 = vmatpush3.msra.mxu0 %v1155_v12  ;;  %v1254_v8 = vld [vmem:[%s5261_s26 + $0x1f50] sm:$0xff]  ;;  %v1269_v10 = vld [vmem:[%s5261_s26 + $0x1fc8] sm:$0xff] }
 0x207   : > { %5018 = vmatpush3.msra.mxu1 %v1187_v13  ;;  %4984 = vmatprep.subr.mxu0 %v1170_v14  ;;  %v1221_v11 = vld [vmem:[%s5261_s26 + $0x1e48] sm:$0xff]  ;;  %v1236_v13 = vld [vmem:[%s5261_s26 + $0x1ec0] sm:$0xff] }
 0x208   : > { %5019 = vmatprep.subr.mxu1 %v1202_v15  ;;  %4985 = vmatpush3.msra.mxu0 %v1154_v16  ;;  %v1253_v12 = vld [vmem:[%s5261_s26 + $0x1f48] sm:$0xff]  ;;  %v1268_v14 = vld [vmem:[%s5261_s26 + $0x1fc0] sm:$0xff] }
 0x209   : > { %5020 = vmatpush3.msra.mxu1 %v1186_v17  ;;  %4986 = vmatprep.subr.mxu0 %v1169_v18  ;;  %v1220_v15 = vld [vmem:[%s5261_s26 + $0x1e40] sm:$0xff]  ;;  %v1235_v17 = vld [vmem:[%s5261_s26 + $0x1eb8] sm:$0xff] }
 0x20a   : > { %5021 = vmatprep.subr.mxu1 %v1201_v19  ;;  %4987 = vmatpush3.msra.mxu0 %v1153_v20  ;;  %v1252_v16 = vld [vmem:[%s5261_s26 + $0x1f40] sm:$0xff]  ;;  %v1267_v18 = vld [vmem:[%s5261_s26 + $0x1fb8] sm:$0xff] }
 0x20b   : > { %5022 = vmatpush3.msra.mxu1 %v1185_v21  ;;  %4988 = vmatprep.subr.mxu0 %v1168_v23  ;;  %v1219_v19 = vld [vmem:[%s5261_s26 + $0x1e38] sm:$0xff]  ;;  %v1234_v21 = vld [vmem:[%s5261_s26 + $0x1eb0] sm:$0xff] }
 0x20c   : > { %5023 = vmatprep.subr.mxu1 %v1200_v24  ;;  %4989 = vmatpush3.msra.mxu0 %v1152_v25  ;;  %v1251_v20 = vld [vmem:[%s5261_s26 + $0x1f38] sm:$0xff]  ;;  %v1218_v23 = vld [vmem:[%s5261_s26 + $0x1e30] sm:$0xff]  ;;  %v1233_v25 = vld [vmem:[%s5261_s26 + $0x1ea8] sm:$0xff] }
 0x20d   : > { %5024 = vmatpush3.msra.mxu1 %v1184_v26  ;;  %4990 = vmatprep.subr.mxu0 %v1167_v27  ;;  %v1250_v24 = vld [vmem:[%s5261_s26 + $0x1f30] sm:$0xff]  ;;  %v1265_v26 = vld [vmem:[%s5261_s26 + $0x1fa8] sm:$0xff]  ;;  %v251_v27 = vld [vmem:[%s5256_s22 + $0x78] sm:$0xff] }
 0x20e   : > { %5025 = vmatprep.subr.mxu1 %v1199_v28  ;;  %4991 = vmatpush3.msra.mxu0 %v1151_v30  ;;  %v1217_v28 = vld [vmem:[%s5261_s26 + $0x1e28] sm:$0xff]  ;;  %v1232_v30 = vld [vmem:[%s5261_s26 + $0x1ea0] sm:$0xff] }
 0x20f   : > { %5026 = vmatpush3.msra.mxu1 %v1183_v31  ;;  %4992 = vmatprep.subr.mxu0 %v1166_v32  ;;  %v1264_v31 = vld [vmem:[%s5261_s26 + $0x1fa0] sm:$0xff] }
 0x210   : > { %5027 = vmatprep.subr.mxu1 %v1198_v33  ;;  %4993 = vmatpush3.msra.mxu0 %v1150_v35  ;;  %v1216_v32 = vld [vmem:[%s5261_s26 + $0x1e20] sm:$0xff]  ;;  %v1231_v35 = vld [vmem:[%s5261_s26 + $0x1e98] sm:$0xff] }
 0x211   : > { %5028 = vmatpush3.msra.mxu1 %v1182_v36  ;;  %4994 = vmatprep.subr.mxu0 %v1165_v37  ;;  %v1248_v33 = vld [vmem:[%s5261_s26 + $0x1f20] sm:$0xff]  ;;  %v1263_v36 = vld [vmem:[%s5261_s26 + $0x1f98] sm:$0xff] }
 0x212   : > { %5029 = vmatprep.subr.mxu1 %v1197_v38  ;;  %4995 = vmatpush3.msra.mxu0 %v1149_v40  ;;  %v1215_v37 = vld [vmem:[%s5261_s26 + $0x1e18] sm:$0xff]  ;;  %v1262_v40 = vld [vmem:[%s5261_s26 + $0x1f90] sm:$0xff] }
 0x213   : > { %5030 = vmatpush3.msra.mxu1 %v1181_v41  ;;  %4996 = vmatprep.subr.mxu0 %v1164_v42  ;;  %v1247_v38 = vld [vmem:[%s5261_s26 + $0x1f18] sm:$0xff]  ;;  %v1554_v41 = vrot.slane %v251_v27, %v5310_v52  ;;  %v1214_v42 = vld [vmem:[%s5261_s26 + $0x1e10] sm:$0xff] }
 0x214   : > { %5031 = vmatprep.subr.mxu1 %v1196_v43  ;;  %4997 = vmatpush3.msra.mxu0 %v1148_v45  ;;  %v1246_v43 = vld [vmem:[%s5261_s26 + $0x1f10] sm:$0xff]  ;;  %v1229_v45 = vld [vmem:[%s5261_s26 + $0x1e88] sm:$0xff] }
 0x215   : > { %3652 = vmatprep.mubr.f32.mxu0 %v1545_v44  ;;  %5032 = vmatpush3.msra.mxu1 %v1180_v46  ;;  %v1261_v46 = vld [vmem:[%s5261_s26 + $0x1f88] sm:$0xff] }
 0x216   : > { %3653 = vmatmul.mubr.f32.vlgmr.msra.gmra.mxu0 %v1537_v34  ;;  %3722 = vmatprep.mubr.f32.mxu1 %v1546_v47  ;;  %v1547_v34 = vcombine.high %v251_v27, %v251_v27  ;;  %v1213_v47 = vld [vmem:[%s5261_s26 + $0x1e08] sm:$0xff] }
 0x217   : > { %5036 = vmatprep.subr.mxu0 %v1243_v48  ;;  %5071 = vmatprep.subr.mxu1 %v1275_v49  ;;  %v1245_v48 = vld [vmem:[%s5261_s26 + $0x1f08] sm:$0xff]  ;;  %v1228_v49 = vld [vmem:[%s5261_s26 + $0x1e80] sm:$0xff] }
 0x218   : > { %3723 = vmatmul.mubr.f32.vlgmr.msra.gmra.mxu1 %v1544_v39  ;;  %5037 = vmatpush3.msra.mxu0 %v1227_v50  ;;  %v1230_v39 = vld [vmem:[%s5261_s26 + $0x1e90] sm:$0xff]  ;;  %v1561_v44 = vrot.slane %v1547_v34, %v5310_v52  ;;  %v1260_v50 = vld [vmem:[%s5261_s26 + $0x1f80] sm:$0xff] }
 0x219   : > { %5072 = vmatpush3.msra.mxu1 %v1259_v51  ;;  %5038 = vmatprep.subr.mxu0 %v1242_v53  ;;  %v1562_v51 = vcombine.high %v1554_v41, %v1554_v41  ;;  %v1212_v53 = vld [vmem:[%s5261_s26 + $0x1e00] sm:$0xff] }
 0x21a   : > { %5073 = vmatprep.subr.mxu1 %v1274_v54  ;;  %5039 = vmatpush3.msra.mxu0 %v1226_v55  ;;  %v1563_v54 = vcombine.high %v1561_v44, %v1561_v44  ;;  %v1244_v52 = vld [vmem:[%s5261_s26 + $0x1f00] sm:$0xff]  ;;  %v4018_v55 = vpop.f32.mrf.mxu0 }
 0x21b   : > { %5074 = vmatpush3.msra.mxu1 %v1258_v56  ;;  %5040 = vmatprep.subr.mxu0 %v1241_v57  ;;  %v4053_v56 = vpop.f32.mrf.mxu1 }
 0x21c   : > { %5075 = vmatprep.subr.mxu1 %v1273_v58  ;;  %5041 = vmatpush3.msra.mxu0 %v1225_v59  ;;  %v4019_v57 = vpop.f32.mrf.mxu0 }
 0x21d   : > { %5076 = vmatpush3.msra.mxu1 %v1257_v60  ;;  %5042 = vmatprep.subr.mxu0 %v1240_v61  ;;  %v4054_v59 = vpop.f32.mrf.mxu1 }
 0x21e   : > { %5077 = vmatprep.subr.mxu1 %v1272_v62  ;;  %5043 = vmatpush3.msra.mxu0 %v1224_v63  ;;  %v4088_v58 = vpop.f32.mrf.mxu0  ;;  %v4020_v62 = vadd.f32 %v4019_v57, %v4018_v55  ;;  %v4055_v63 = vadd.f32 %v4054_v59, %v4053_v56 }
 0x21f   : > { %5078 = vmatpush3.msra.mxu1 %v1256_v0  ;;  %5044 = vmatprep.subr.mxu0 %v1239_v1  ;;  %v4123_v60 = vpop.f32.mrf.mxu1 }
 0x220   : > { %5079 = vmatprep.subr.mxu1 %v1271_v2  ;;  %5045 = vmatpush3.msra.mxu0 %v1223_v3  ;;  %v4089_v61 = vpop.f32.mrf.mxu0  ;;  %v1765_v3 = vadd.f32 %v4055_v63, %v4020_v62 }
 0x221   : > { %5080 = vmatpush3.msra.mxu1 %v1255_v4  ;;  %5046 = vmatprep.subr.mxu0 %v1238_v5  ;;  %v4090_v1 = vadd.f32 %v4089_v61, %v4088_v58  ;;  %v4124_v2 = vpop.f32.mrf.mxu1 }
 0x222   : > { %5081 = vmatprep.subr.mxu1 %v1270_v6  ;;  %5047 = vmatpush3.msra.mxu0 %v1222_v7  ;;  %v4158_v0 = vpop.f32.mrf.mxu0  ;;  %v4125_v7 = vadd.f32 %v4124_v2, %v4123_v60 }
 0x223   : > { %5082 = vmatpush3.msra.mxu1 %v1254_v8  ;;  %5048 = vmatprep.subr.mxu0 %v1237_v9  ;;  %v4193_v4 = vpop.f32.mrf.mxu1  ;;  %v1835_v6 = vadd.f32 %v4090_v1, %v1765_v3 }
 0x224   : > { %5083 = vmatprep.subr.mxu1 %v1269_v10  ;;  %5049 = vmatpush3.msra.mxu0 %v1221_v11  ;;  %v4159_v5 = vpop.f32.mrf.mxu0 }
 0x225   : > { %5084 = vmatpush3.msra.mxu1 %v1253_v12  ;;  %5050 = vmatprep.subr.mxu0 %v1236_v13  ;;  %v4160_v9 = vadd.f32 %v4159_v5, %v4158_v0  ;;  %v4194_v10 = vpop.f32.mrf.mxu1  ;;  %v1905_v11 = vadd.f32 %v4125_v7, %v1835_v6 }
 0x226   : > { %5085 = vmatprep.subr.mxu1 %v1268_v14  ;;  %5051 = vmatpush3.msra.mxu0 %v1220_v15  ;;  %v4228_v8 = vpop.f32.mrf.mxu0  ;;  %v4195_v15 = vadd.f32 %v4194_v10, %v4193_v4 }
 0x227   : > { %5086 = vmatpush3.msra.mxu1 %v1252_v16  ;;  %5052 = vmatprep.subr.mxu0 %v1235_v17  ;;  %v4263_v12 = vpop.f32.mrf.mxu1  ;;  %v1975_v14 = vadd.f32 %v4160_v9, %v1905_v11 }
 0x228   : > { %5087 = vmatprep.subr.mxu1 %v1267_v18  ;;  %5053 = vmatpush3.msra.mxu0 %v1219_v19  ;;  %v4229_v13 = vpop.f32.mrf.mxu0 }
 0x229   : > { %5088 = vmatpush3.msra.mxu1 %v1251_v20  ;;  %5054 = vmatprep.subr.mxu0 %v1234_v21  ;;  %v4230_v17 = vadd.f32 %v4229_v13, %v4228_v8  ;;  %v4264_v18 = vpop.f32.mrf.mxu1  ;;  %v2045_v19 = vadd.f32 %v4195_v15, %v1975_v14 }
 0x22a   : > { %5089 = vmatprep.subr.mxu1 %v1266_v22  ;;  %5055 = vmatpush3.msra.mxu0 %v1218_v23  ;;  %v4298_v16 = vpop.f32.mrf.mxu0  ;;  %v4265_v23 = vadd.f32 %v4264_v18, %v4263_v12 }
 0x22b   : > { %5090 = vmatpush3.msra.mxu1 %v1250_v24  ;;  %5056 = vmatprep.subr.mxu0 %v1233_v25  ;;  %v4333_v20 = vpop.f32.mrf.mxu1  ;;  %v2115_v22 = vadd.f32 %v4230_v17, %v2045_v19 }
 0x22c   : > { %5091 = vmatprep.subr.mxu1 %v1265_v26  ;;  %5057 = vmatpush3.msra.mxu0 %v1217_v28  ;;  %v4299_v21 = vpop.f32.mrf.mxu0 }
 0x22d   : > { %5092 = vmatpush3.msra.mxu1 %v1249_v29  ;;  %5058 = vmatprep.subr.mxu0 %v1232_v30  ;;  %v4300_v25 = vadd.f32 %v4299_v21, %v4298_v16  ;;  %v4334_v26 = vpop.f32.mrf.mxu1  ;;  %v2185_v27 = vadd.f32 %v4265_v23, %v2115_v22 }
 0x22e   : > { %5093 = vmatprep.subr.mxu1 %v1264_v31  ;;  %5059 = vmatpush3.msra.mxu0 %v1216_v32  ;;  %v4368_v24 = vpop.f32.mrf.mxu0  ;;  %v4335_v31 = vadd.f32 %v4334_v26, %v4333_v20 }
 0x22f   : > { %5094 = vmatpush3.msra.mxu1 %v1248_v33  ;;  %5060 = vmatprep.subr.mxu0 %v1231_v35  ;;  %v4403_v28 = vpop.f32.mrf.mxu1  ;;  %v2255_v30 = vadd.f32 %v4300_v25, %v2185_v27 }
 0x230   : > { %5095 = vmatprep.subr.mxu1 %v1263_v36  ;;  %5061 = vmatpush3.msra.mxu0 %v1215_v37  ;;  %v4369_v29 = vpop.f32.mrf.mxu0 }
 0x231   : > { %5096 = vmatpush3.msra.mxu1 %v1247_v38  ;;  %5062 = vmatprep.subr.mxu0 %v1230_v39  ;;  %v4370_v33 = vadd.f32 %v4369_v29, %v4368_v24  ;;  %v4404_v34 = vpop.f32.mrf.mxu1  ;;  %v2325_v35 = vadd.f32 %v4335_v31, %v2255_v30 }
 0x232   : > { %5097 = vmatprep.subr.mxu1 %v1262_v40  ;;  %5063 = vmatpush3.msra.mxu0 %v1214_v42  ;;  %v4438_v32 = vpop.f32.mrf.mxu0  ;;  %v4405_v39 = vadd.f32 %v4404_v34, %v4403_v28 }
 0x233   : > { %5098 = vmatpush3.msra.mxu1 %v1246_v43  ;;  %5064 = vmatprep.subr.mxu0 %v1229_v45  ;;  %v4473_v36 = vpop.f32.mrf.mxu1  ;;  %v2395_v38 = vadd.f32 %v4370_v33, %v2325_v35 }
 0x234   : > { %5099 = vmatprep.subr.mxu1 %v1261_v46  ;;  %5065 = vmatpush3.msra.mxu0 %v1213_v47  ;;  %v4439_v37 = vpop.f32.mrf.mxu0 }
 0x235   : > { %5100 = vmatpush3.msra.mxu1 %v1245_v48  ;;  %5066 = vmatprep.subr.mxu0 %v1228_v49  ;;  %v4474_v42 = vpop.f32.mrf.mxu1  ;;  %v2465_v43 = vadd.f32 %v4405_v39, %v2395_v38 }
 0x236   : > { %5101 = vmatprep.subr.mxu1 %v1260_v50  ;;  %5067 = vmatpush3.msra.mxu0 %v1212_v53  ;;  %v4508_v40 = vpop.f32.mrf.mxu0  ;;  %v4475_v47 = vadd.f32 %v4474_v42, %v4473_v36 }
 0x237   : > { %3792 = vmatprep.mubr.f32.mxu0 %v1562_v51  ;;  %5102 = vmatpush3.msra.mxu1 %v1244_v52 }
 0x238   : > { %3862 = vmatprep.mubr.f32.mxu1 %v1563_v54  ;;  %3793 = vmatmul.mubr.f32.vlgmr.msra.gmra.mxu0 %v1554_v41  ;;  %v4440_v41 = vadd.f32 %v4439_v37, %v4438_v32  ;;  %v4509_v45 = vpop.f32.mrf.mxu0 }
 0x239   : > { %3863 = vmatmul.mubr.f32.vlgmr.msra.gmra.mxu1 %v1561_v44  ;;  %v4543_v44 = vpop.f32.mrf.mxu1  ;;  %v4510_v49 = vadd.f32 %v4509_v45, %v4508_v40 }
 0x23a   : > { %v2535_v46 = vadd.f32 %v4440_v41, %v2465_v43  ;;  %v4578_v48 = vpop.f32.mrf.mxu0 }
 0x23b   : > { %v4544_v50 = vpop.f32.mrf.mxu1 }
 0x23c   : > { %v2605_v51 = vadd.f32 %v4475_v47, %v2535_v46  ;;  %v4579_v54 = vpop.f32.mrf.mxu0  ;;  %v4545_v55 = vadd.f32 %v4544_v50, %v4543_v44 }
 0x23d   : > { %v4613_v53 = vpop.f32.mrf.mxu1  ;;  %v4580_v57 = vadd.f32 %v4579_v54, %v4578_v48  ;;  %v235_v54 = vld [vmem:[#allocation2] sm:$0x3] }
 0x23e   : > { %v2675_v52 = vadd.f32 %v4510_v49, %v2605_v51  ;;  %v4648_v56 = vpop.f32.mrf.mxu0 }
 0x23f   : > { %v4614_v58 = vpop.f32.mrf.mxu1 }
 0x240   : > { %v2745_v59 = vadd.f32 %v4545_v55, %v2675_v52  ;;  %v4649_v61 = vpop.f32.mrf.mxu0  ;;  %v4615_v63 = vadd.f32 %v4614_v58, %v4613_v53 }
 0x241   : > { %v4683_v60 = vpop.f32.mrf.mxu1  ;;  %v4650_v1 = vadd.f32 %v4649_v61, %v4648_v56 }
 0x242   : > { %v2815_v62 = vadd.f32 %v4580_v57, %v2745_v59 }
 0x243   : > { %v4684_v2 = vpop.f32.mrf.mxu1 }
 0x244   : > { %v2885_v3 = vadd.f32 %v4615_v63, %v2815_v62  ;;  %v4685_v7 = vadd.f32 %v4684_v2, %v4683_v60 }
 0x246   : > { %v2955_v6 = vadd.f32 %v4650_v1, %v2885_v3 }
 0x248   : > { %v3025_v11 = vadd.f32 %v4685_v7, %v2955_v6 }
 0x24e   : > { %v4718_v0 = vpop.f32.mrf.mxu0 }
 0x250   : > { %v4753_v4 = vpop.f32.mrf.mxu1  ;;  %v4719_v5 = vpop.f32.mrf.mxu0 }
 0x251   : > { %v4720_v9 = vadd.f32 %v4719_v5, %v4718_v0 }
 0x252   : > { %v4754_v10 = vpop.f32.mrf.mxu1 }
 0x253   : > { %v3095_v14 = vadd.f32 %v4720_v9, %v3025_v11  ;;  %v4755_v15 = vadd.f32 %v4754_v10, %v4753_v4 }
 0x255   : > { %v3165_v19 = vadd.f32 %v4755_v15, %v3095_v14 }
 0x270   : > { %v4788_v8 = vpop.f32.mrf.mxu0 }
 0x272   : > { %v4823_v12 = vpop.f32.mrf.mxu1  ;;  %v4789_v13 = vpop.f32.mrf.mxu0 }
 0x273   : > { %v4790_v17 = vadd.f32 %v4789_v13, %v4788_v8 }
 0x274   : > { %v4824_v18 = vpop.f32.mrf.mxu1 }
 0x275   : > { %v3235_v22 = vadd.f32 %v4790_v17, %v3165_v19  ;;  %v4825_v23 = vadd.f32 %v4824_v18, %v4823_v12 }
 0x277   : > { %v3305_v27 = vadd.f32 %v4825_v23, %v3235_v22 }
 0x292   : > { %v4858_v16 = vpop.f32.mrf.mxu0 }
 0x294   : > { %v4893_v20 = vpop.f32.mrf.mxu1  ;;  %v4859_v21 = vpop.f32.mrf.mxu0 }
 0x295   : > { %v4860_v25 = vadd.f32 %v4859_v21, %v4858_v16 }
 0x296   : > { %v4894_v26 = vpop.f32.mrf.mxu1 }
 0x297   : > { %v3375_v30 = vadd.f32 %v4860_v25, %v3305_v27  ;;  %v4895_v31 = vadd.f32 %v4894_v26, %v4893_v20 }
 0x299   : > { %v3445_v35 = vadd.f32 %v4895_v31, %v3375_v30 }
 0x2b4   : > { %v4928_v24 = vpop.f32.mrf.mxu0 }
 0x2b6   : > { %v4963_v28 = vpop.f32.mrf.mxu1  ;;  %v4929_v29 = vpop.f32.mrf.mxu0 }
 0x2b7   : > { %v4930_v33 = vadd.f32 %v4929_v29, %v4928_v24 }
 0x2b8   : > { %v4964_v34 = vpop.f32.mrf.mxu1 }
 0x2b9   : > { %v3515_v38 = vadd.f32 %v4930_v33, %v3445_v35  ;;  %v4965_v39 = vadd.f32 %v4964_v34, %v4963_v28 }
 0x2bb   : > { %v3585_v42 = vadd.f32 %v4965_v39, %v3515_v38 }
 0x2d6   : > { %v4998_v32 = vpop.f32.mrf.mxu0 }
 0x2d8   : > { %v5033_v36 = vpop.f32.mrf.mxu1  ;;  %v4999_v37 = vpop.f32.mrf.mxu0 }
 0x2d9   : > { %v5000_v40 = vadd.f32 %v4999_v37, %v4998_v32 }
 0x2da   : > { %v5034_v41 = vpop.f32.mrf.mxu1 }
 0x2db   : > { %v3655_v43 = vadd.f32 %v5000_v40, %v3585_v42  ;;  %v5035_v44 = vadd.f32 %v5034_v41, %v5033_v36 }
 0x2dd   : > { %v3725_v49 = vadd.f32 %v5035_v44, %v3655_v43 }
 0x2f8   : > { %v5068_v45 = vpop.f32.mrf.mxu0 }
 0x2f9   : > { %v5103_v46 = vpop.f32.mrf.mxu1 }
 0x2fa   : > { %v5069_v47 = vpop.f32.mrf.mxu0 }
 0x2fb   : > { %v5104_v48 = vpop.f32.mrf.mxu1  ;;  %v5070_v50 = vadd.f32 %v5069_v47, %v5068_v45 }
 0x2fc   : > { %v5105_v53 = vadd.f32 %v5104_v48, %v5103_v46 }
 0x2fd   : > { %v3795_v51 = vadd.f32 %v5070_v50, %v3725_v49 }
 0x2ff   : > { %v3865_v52 = vadd.f32 %v5105_v53, %v3795_v51  ;;  %3874 = sbr.rel (%p3981_p7) target bundleno = 782 (0x30e), region = 40 }
 0x301   : > { %v3868_v55 = vadd.f32 %v3865_v52, %v235_v54 }
 0x303   : > { %3870 = vst.msk [vmem:[#allocation2] sm:$0x3] %vm3869_vm1, %v3868_v55 }
 0x304   : > { %v3876_v57 = vld [vmem:[%s6370_s2] sm:$0x3] }
 0x30a   : > { %v3875_v56 = vld [vmem:[#allocation2] sm:$0x3] }
 0x30b   : > { %v3877_v58 = vadd.f32 %v3876_v57, %v3875_v56 }
 0x30d   : > { %3878 = vst.msk [vmem:[#allocation3] sm:$0x3] %vm3869_vm1, %v3877_v58 }
 0x30e PF: > { %p6344_p8 = scmp.eq.s32.totalorder %s3971_s15, 3  ;;  %s5209_s30 = smov [#allocation3]  }
 0x30f   : > { %s3888_s4 = sshll.u32 %s5209_s30, 4  ;;  %s3889_s4 = int_to_ptr.vmem [resolvable:$true] %s3888_s4 }
 0x310   : > { %s5155_s5 = scalar_lea.vmem %s3889_s4, 32  ;;  %p5162_p12 = scmp.lt.s32.totalorder %s3889_s4, %s3889_s4 }
 0x311   : > { %p5156_p9 = scmp.ne.s32.totalorder %s3889_s4, %s5155_s5  ;;  %p5163_p13 = scmp.lt.s32.totalorder %s5155_s5, %s5155_s5 }
 0x313   : > { %p5157_p10 = pnand %p5156_p9, %p6344_p8  ;;  %p5164_p0 = por %p5163_p13, %p5162_p12 }
 0x315   : > { %p5158_p11 = pneg %p5157_p10 }
 0x317   : > { %p5165_p1 = pnand %p5164_p0, %p5158_p11 }
 0x319   : > { %5168 = shalt.err (!%p5165_p1)
}
 0x31a   : > { %5107 = dma.vmem_to_hbm [thread:$0]  (%p6344_p8), %s3889_s4, 32, %s6371_s3, [#allocation4]  }
 0x31b   : > { %5192 = dma.done.wait (%p6344_p8), [#allocation4], 32  }
 0x31c   : > { %5194 = vsyncadd (%p6344_p8), [#allocation4], 4294967264 }
 0x31d PF: > { %s14_s14 = sadd.s32 1, %s5205_s14   ;;  %s6373_s12 = smov %s5201_s13 }
 0x31e   : > { %p11_p2 = scmp.ge.s32.totalorder %s14_s14, 6   ;;  %s6374_s13 = smov %s6376_s16 }
 0x320   :  { %13 = sbr.rel (!%p11_p2) target bundleno = 2 (0x2), region = 74 }
 0x325   :  { %3901 = vsyncpa [#allocation4], 1 }
 0x326   :  { %3903 = vsyncpa [#allocation4 + $0x1], 1 }

</bundles_post_ra>
